<compile_context>
chip_gen: v7x
topology: tpu7x:2x2x1
jax: 0.10.0
libtpu: 0.0.40
codegen_flags: <defaults>
</compile_context>

<pallas_src>
import jax
import jax.numpy as jnp
from jax.experimental import pallas as pl
from jax.experimental.pallas import tpu as pltpu

N_ACT = 373
N_RES = 246
N_CONTR = 4
N_YEAR = 2
N_MONTH = 12
N_LAST = 3
X_LEN = 2 + N_ACT + 6          # 381

LANE = 128
BT = 128                       # examples per grid step (batch tile, on lanes)
F_PAD = 3 * LANE               # 373 activities padded to 384 (3x128)
R_PAD = 2 * LANE               # 246 resources  padded to 256 (2x128)


def _predict_kernel(expw_ref,    # VMEM (R_PAD, F_PAD) f32  resident exp(W)
                    act_ref,     # VMEM (F_PAD, BT)    f32  activities, batch on lanes
                    res_ref,     # VMEM (1, BT)        i32  resource ids
                    extras_ref,  # VMEM (8, BT)        f32  rows 0-2: last3,
                                 #                          3: month_w, 4: year_w,
                                 #                          5: contr_w, 6-7: zero
                    l3w_ref,     # VMEM (8, 1)         f32  rows 0-2: last3_w, rest 0
                    out_ref):    # VMEM (1, BT)        f32
    # MXU: all-resources x all-examples activity sums (f32 accumulation).
    full = jnp.dot(expw_ref[...], act_ref[...],
                   preferred_element_type=jnp.float32,
                   precision=jax.lax.Precision.HIGHEST)        # (R_PAD, BT)

    # Per-lane (per-example) one-hot select of the row res_id[i], then a
    # vectorized sublane reduce -> (1, BT) activity sums.
    row_ids = jax.lax.broadcasted_iota(jnp.int32, (R_PAD, BT), 0)
    sel = jnp.where(row_ids == res_ref[...], full, jnp.float32(0.0))
    sum_act = jnp.sum(sel, axis=0, keepdims=True)              # (1, BT)

    # sum(relu(last3_w * last3)) on the VPU.  Rows 3..7 of l3w are zero so the
    # month/year/contractor rows of `extras` contribute exactly 0 here.
    s3 = jnp.sum(jnp.maximum(l3w_ref[...] * extras_ref[...], jnp.float32(0.0)),
                 axis=0, keepdims=True)                        # (1, BT)

    # month -> year -> contractor scaling, same order as the PyTorch forward.
    v = extras_ref[3:4, :] * (sum_act + s3)
    v = extras_ref[4:5, :] * v
    v = extras_ref[5:6, :] * v
    out_ref[...] = v.astype(out_ref.dtype)


def _build_call(nblk, b_pad):
    grid_spec = pltpu.PrefetchScalarGridSpec(
        num_scalar_prefetch=0,
        grid=(nblk,),
        in_specs=[
            # exp(W) table: constant index_map => resident across grid steps.
            pl.BlockSpec((R_PAD, F_PAD), lambda i: (0, 0)),
            pl.BlockSpec((F_PAD, BT), lambda i: (0, i)),   # activities
            pl.BlockSpec((1, BT), lambda i: (0, i)),       # resource ids
            pl.BlockSpec((8, BT), lambda i: (0, i)),       # extras
            pl.BlockSpec((8, 1), lambda i: (0, 0)),        # last3 weights
        ],
        out_specs=pl.BlockSpec((1, BT), lambda i: (0, i)),
    )
    return pl.pallas_call(
        _predict_kernel,
        out_shape=jax.ShapeDtypeStruct((1, b_pad), jnp.float32),
        grid_spec=grid_spec,
        compiler_params=pltpu.CompilerParams(
            dimension_semantics=("parallel",)),   # v7x: shard batch over 2 TCs
    )


def init_params(key):
    """Deterministic parameter init matching the module's shapes, plus the
    one-time (hoisted) exp + pad preprocessing of the activity weight."""
    k1, k2, k3, k4, k5, k6 = jax.random.split(key, 6)
    # xavier_uniform for activity_dense.weight (246, 373)
    xav = (6.0 / (N_RES + N_ACT)) ** 0.5
    activity_w = jax.random.uniform(k1, (N_RES, N_ACT), jnp.float32, -xav, xav)

    def linear_w(k, n_in):
        bound = 1.0 / (n_in ** 0.5)
        return jax.random.uniform(k, (n_in,), jnp.float32, -bound, bound)

    params = {
        "activity_w": activity_w,
        "proj_w": linear_w(k2, 23),   # present in the module, unused by forward
        "contr_w": linear_w(k3, N_CONTR),
        "year_w": linear_w(k4, N_YEAR),
        "month_w": linear_w(k5, N_MONTH),
        "last3_w": linear_w(k6, N_LAST),
    }
    # One-time preprocessing (NOT per forward call): exp(W), zero-pad
    # 246x373 -> 256x384.  Pad rows/cols are exactly 0 so the padded matmul /
    # masked select equals the 373-wide dot.
    expw = jnp.zeros((R_PAD, F_PAD), jnp.float32)
    expw = expw.at[:N_RES, :N_ACT].set(jnp.exp(activity_w))
    params["activity_expw_padded"] = expw
    # last-3-month weights as an (8,1) lane-broadcastable column (rows 3..7 = 0).
    params["last3_w_col"] = jnp.zeros((8, 1), jnp.float32).at[:N_LAST, 0].set(
        params["last3_w"])
    return params


@jax.jit
def predict_hours_net_3month_batched(xs, params):
    """Batched forward pass. xs: (B, 381) f32 -> (B,) f32."""
    B = xs.shape[0]
    b_pad = ((B + BT - 1) // BT) * BT
    nblk = b_pad // BT

    # Integer fields (exact small floats), clamped into range.
    month = jnp.clip(xs[:, X_LEN - 6].astype(jnp.int32) - 1, 0, N_MONTH - 1)
    year = jnp.clip(xs[:, X_LEN - 5].astype(jnp.int32), 0, N_YEAR - 1)
    res = jnp.clip(xs[:, X_LEN - 4].astype(jnp.int32), 0, N_RES - 1)
    contr = jnp.clip(xs[:, 1].astype(jnp.int32), 0, N_CONTR - 1)
    last3 = xs[:, X_LEN - 3:].astype(jnp.float32)                 # (B, 3)

    # Tiny (12/2/4-entry) table gathers -- negligible, done in the wrapper.
    month_w_g = jnp.take(params["month_w"], month)
    year_w_g = jnp.take(params["year_w"], year)
    contr_w_g = jnp.take(params["contr_w"], contr)

    # Layout plumbing: batch on lanes, activities zero-padded 373 -> 384,
    # batch zero-padded to a multiple of BT.
    act_t = jnp.zeros((F_PAD, b_pad), jnp.float32).at[:N_ACT, :B].set(
        xs[:, 2:2 + N_ACT].astype(jnp.float32).T)
    res_row = jnp.zeros((1, b_pad), jnp.int32).at[0, :B].set(res)
    extras = jnp.zeros((8, b_pad), jnp.float32)
    extras = extras.at[0:N_LAST, :B].set(last3.T)
    extras = extras.at[3, :B].set(month_w_g)
    extras = extras.at[4, :B].set(year_w_g)
    extras = extras.at[5, :B].set(contr_w_g)

    out = _build_call(nblk, b_pad)(
        params["activity_expw_padded"], act_t, res_row, extras,
        params["last3_w_col"])
    return out[0, :B]


def predict_hours_net_3month(x, params):
    """Single-example forward (same semantics as the PyTorch module)."""
    return predict_hours_net_3month_batched(x[None, :], params)[0]


def _reference(x, params):
    """Pure-JAX reference mirroring the PyTorch forward."""
    month = x[-6].astype(jnp.int32) - 1
    year = x[-5].astype(jnp.int32)
    res_id = x[-4].astype(jnp.int32)
    contr_id = x[1].astype(jnp.int32)
    sum_of_activities = jnp.dot(jnp.exp(params["activity_w"][res_id]), x[2:-6])
    sum_of_month = jnp.sum(jax.nn.relu(params["last3_w"] * x[-3:]))
    v = params["month_w"][month] * (sum_of_activities + sum_of_month)
    v = params["year_w"][year] * v
    return params["contr_w"][contr_id] * v


if __name__ == "__main__":
    key = jax.random.PRNGKey(0)
    pkey, xkey = jax.random.split(key)
    params = init_params(pkey)

    def make_xs(k, B):
        ka, kb, kc, kd, ke, kf, kg = jax.random.split(k, 7)
        activities = jax.random.uniform(ka, (B, N_ACT), jnp.float32, 0.0, 2.0)
        last3 = jax.random.uniform(kb, (B, N_LAST), jnp.float32, 0.0, 10.0)
        proj_id = jax.random.randint(kc, (B,), 0, 23).astype(jnp.float32)
        contr_id = jax.random.randint(kd, (B,), 0, N_CONTR).astype(jnp.float32)
        month = jax.random.randint(ke, (B,), 1, N_MONTH + 1).astype(jnp.float32)
        year = jax.random.randint(kf, (B,), 0, N_YEAR).astype(jnp.float32)
        res_id = jax.random.randint(kg, (B,), 0, N_RES).astype(jnp.float32)
        xs = jnp.concatenate([
            proj_id[:, None], contr_id[:, None], activities,
            month[:, None], year[:, None], res_id[:, None], last3,
        ], axis=1)
        assert xs.shape == (B, X_LEN)
        return xs

    ref_fn = jax.jit(jax.vmap(lambda x: _reference(x, params)))

    # Small batch (single grid step, heavy lane padding) and a multi-tile
    # batch (3 grid steps, partial last tile).
    xs_small = make_xs(jax.random.fold_in(xkey, 0), 8)
    xs_big = make_xs(jax.random.fold_in(xkey, 1), 300)

    for xs in (xs_small, xs_big):
        pred = jax.block_until_ready(predict_hours_net_3month_batched(xs, params))
        ref = jax.block_until_ready(ref_fn(xs))
        assert pred.shape == ref.shape
        assert jnp.allclose(pred, ref, rtol=1e-4, atol=1e-3), (pred, ref)

    # Single-example path (batch of 1 through the same kernel).
    p1 = jax.block_until_ready(predict_hours_net_3month(xs_small[0], params))
    r1 = ref_fn(xs_small)[0]
    assert jnp.allclose(p1, r1, rtol=1e-4, atol=1e-3), (p1, r1)

    print("KERNEL_OK")
</pallas_src>

<mosaic_0001>
module attributes {stable_mosaic.version = 11 : i64} {
  func.func @_predict_kernel(%arg0: i32, %arg1: memref<256x384xf32, #tpu.memory_space<vmem>>, %arg2: memref<384x128xf32, #tpu.memory_space<vmem>>, %arg3: memref<1x128xi32, #tpu.memory_space<vmem>>, %arg4: memref<8x128xf32, #tpu.memory_space<vmem>>, %arg5: memref<8x1xf32, #tpu.memory_space<vmem>>, %arg6: memref<1x128xf32, #tpu.memory_space<vmem>>) attributes {dimension_semantics = [#tpu.dimension_semantics<parallel>], iteration_bounds = array<i64: 1>, scalar_prefetch = 0 : i64, scratch_operands = 0 : i64, tpu.core_type = #tpu.core_type<tc>, window_params = [{pipeline_mode = #tpu.pipeline_mode<synchronous>, transform_indices = @transform_0, window_bounds = array<i64: 256, 384>}, {transform_indices = @transform_1, window_bounds = array<i64: 384, 128>}, {transform_indices = @transform_2, window_bounds = array<i64: 1, 128>}, {transform_indices = @transform_3, window_bounds = array<i64: 8, 128>}, {pipeline_mode = #tpu.pipeline_mode<synchronous>, transform_indices = @transform_4, window_bounds = array<i64: 8, 1>}, {transform_indices = @transform_5, window_bounds = array<i64: 1, 128>}]} {
    %c0 = arith.constant 0 : index
    %c0_0 = arith.constant 0 : index
    %0 = vector.load %arg1[%c0, %c0_0] : memref<256x384xf32, #tpu.memory_space<vmem>>, vector<256x384xf32>
    %c0_1 = arith.constant 0 : index
    %c0_2 = arith.constant 0 : index
    %1 = vector.load %arg2[%c0_1, %c0_2] : memref<384x128xf32, #tpu.memory_space<vmem>>, vector<384x128xf32>
    %cst = arith.constant dense<0.000000e+00> : vector<256x128xf32>
    %2 = tpu.matmul %0, %1, %cst {dimension_numbers = #tpu.dot_dimension_numbers<[1], [0], [0], [1], [0, 0, 1, 1], [], []>, precision = #tpu.contract_precision<fp32>} : vector<256x384xf32>, vector<384x128xf32>, vector<256x128xf32> -> vector<256x128xf32>
    %3 = tpu.iota {dimensions = array<i32: 0>} : vector<256x128xi32>
    %c0_3 = arith.constant 0 : index
    %c0_4 = arith.constant 0 : index
    %4 = vector.load %arg3[%c0_3, %c0_4] : memref<1x128xi32, #tpu.memory_space<vmem>>, vector<1x128xi32>
    %5 = vector.broadcast %4 : vector<1x128xi32> to vector<256x128xi32>
    %6 = arith.cmpi eq, %3, %5 : vector<256x128xi32>
    %cst_5 = arith.constant 0.000000e+00 : f32
    %7 = vector.broadcast %cst_5 : f32 to vector<256x128xf32>
    %8 = arith.select %6, %2, %7 : vector<256x128xi1>, vector<256x128xf32>
    %cst_6 = arith.constant dense<0.000000e+00> : vector<128xf32>
    %9 = vector.multi_reduction <add>, %8, %cst_6 [0] : vector<256x128xf32> to vector<128xf32>
    %10 = vector.shape_cast %9 : vector<128xf32> to vector<1x128xf32>
    %c0_7 = arith.constant 0 : index
    %c0_8 = arith.constant 0 : index
    %11 = vector.load %arg5[%c0_7, %c0_8] : memref<8x1xf32, #tpu.memory_space<vmem>>, vector<8x1xf32>
    %c0_9 = arith.constant 0 : index
    %c0_10 = arith.constant 0 : index
    %12 = vector.load %arg4[%c0_9, %c0_10] : memref<8x128xf32, #tpu.memory_space<vmem>>, vector<8x128xf32>
    %13 = vector.broadcast %11 : vector<8x1xf32> to vector<8x128xf32>
    %14 = arith.mulf %13, %12 : vector<8x128xf32>
    %cst_11 = arith.constant 0.000000e+00 : f32
    %15 = vector.broadcast %cst_11 : f32 to vector<8x128xf32>
    %16 = arith.maximumf %14, %15 : vector<8x128xf32>
    %cst_12 = arith.constant dense<0.000000e+00> : vector<128xf32>
    %17 = vector.multi_reduction <add>, %16, %cst_12 [0] : vector<8x128xf32> to vector<128xf32>
    %18 = vector.shape_cast %17 : vector<128xf32> to vector<1x128xf32>
    %c3 = arith.constant 3 : index
    %c0_13 = arith.constant 0 : index
    %19 = vector.load %arg4[%c3, %c0_13] : memref<8x128xf32, #tpu.memory_space<vmem>>, vector<1x128xf32>
    %20 = arith.addf %10, %18 : vector<1x128xf32>
    %21 = arith.mulf %19, %20 : vector<1x128xf32>
    %c4 = arith.constant 4 : index
    %c0_14 = arith.constant 0 : index
    %22 = vector.load %arg4[%c4, %c0_14] : memref<8x128xf32, #tpu.memory_space<vmem>>, vector<1x128xf32>
    %23 = arith.mulf %22, %21 : vector<1x128xf32>
    %c5 = arith.constant 5 : index
    %c0_15 = arith.constant 0 : index
    %24 = vector.load %arg4[%c5, %c0_15] : memref<8x128xf32, #tpu.memory_space<vmem>>, vector<1x128xf32>
    %25 = arith.mulf %24, %23 : vector<1x128xf32>
    %c0_16 = arith.constant 0 : index
    %c0_17 = arith.constant 0 : index
    %26 = vector.load %arg6[%c0_16, %c0_17] : memref<1x128xf32, #tpu.memory_space<vmem>>, vector<1x128xf32>
    tpu.vector_store %arg6[%c0_16, %c0_17], %25 {strides = array<i32>} : memref<1x128xf32, #tpu.memory_space<vmem>>, vector<1x128xf32>,
    return
  }
  func.func @transform_0(%arg0: i32) -> (i32, i32) {
    %c0_i32 = arith.constant 0 : i32
    %c0_i32_0 = arith.constant 0 : i32
    %c0_i32_1 = arith.constant 0 : i32
    return %c0_i32, %c0_i32_0 : i32, i32
  }
  func.func @transform_1(%arg0: i32) -> (i32, i32) {
    %c0_i32 = arith.constant 0 : i32
    %c0_i32_0 = arith.constant 0 : i32
    return %c0_i32, %arg0 : i32, i32
  }
  func.func @transform_2(%arg0: i32) -> (i32, i32) {
    %c0_i32 = arith.constant 0 : i32
    %c0_i32_0 = arith.constant 0 : i32
    return %c0_i32, %arg0 : i32, i32
  }
  func.func @transform_3(%arg0: i32) -> (i32, i32) {
    %c0_i32 = arith.constant 0 : i32
    %c0_i32_0 = arith.constant 0 : i32
    return %c0_i32, %arg0 : i32, i32
  }
  func.func @transform_4(%arg0: i32) -> (i32, i32) {
    %c0_i32 = arith.constant 0 : i32
    %c0_i32_0 = arith.constant 0 : i32
    %c0_i32_1 = arith.constant 0 : i32
    return %c0_i32, %c0_i32_0 : i32, i32
  }
  func.func @transform_5(%arg0: i32) -> (i32, i32) {
    %c0_i32 = arith.constant 0 : i32
    %c0_i32_0 = arith.constant 0 : i32
    return %c0_i32, %arg0 : i32, i32
  }
}

</mosaic_0001>

<bundles_post_ra>
// kernel: predict_hours_net_3month_batched.1
= control target key start
LH: loop header
LB: loop body
LE: loop exit
PB: predicated region body
PF: predicated region fallthrough
CT: control target
= control target key end

     0   :  { %v10181_v0 = vmov 0.0|0.0   ;;  %s10151_s1 = inlined_call_operand.vmem [shape: f32[384,128], index: 1, kind: input, shape index: {}]   ;;  %s10152_s0 = inlined_call_operand.vmem [shape: f32[256,384], index: 0, kind: input, shape index: {}]   ;;  %s10153_s4 = inlined_call_operand.vmem [shape: f32[8,1], index: 4, kind: input, shape index: {}]   ;;  %s10154_s2 = inlined_call_operand.vmem [shape: s32[1,128], index: 2, kind: input, shape index: {}]   ;;  %s10155_s3 = inlined_call_operand.vmem [shape: f32[8,128], index: 3, kind: input, shape index: {}]   ;;  %s10156_s5 = inlined_call_operand.vmem [shape: f32[1,128], index: 5, kind: output, shape index: {}]  }
   0x1   :  { %5671 = vmatprep.subr.bf16.mxu1 %v10181_v0  ;;  %v116_v1 = vld [vmem:[%s10151_s1] sm:$0xff]  ;;  %v117_v2 = vld [vmem:[%s10151_s1 + $0x8] sm:$0xff]  ;;  %v118_v3 = vld [vmem:[%s10151_s1 + $0x10] sm:$0xff]  ;;  %5719 = vmatprep.subr.bf16.mxu0 %v10181_v0 }
   0x2   :  { %v165_v4 = vand.u32 4294901760, %v116_v1  ;;  %v168_v5 = vand.u32 4294901760, %v117_v2  ;;  %v119_v6 = vld [vmem:[%s10151_s1 + $0x18] sm:$0xff]  ;;  %v171_v7 = vand.u32 4294901760, %v118_v3  ;;  %v120_v8 = vld [vmem:[%s10151_s1 + $0x20] sm:$0xff]  ;;  %v121_v9 = vld [vmem:[%s10151_s1 + $0x28] sm:$0xff] }
   0x3   :  { %v174_v10 = vand.u32 4294901760, %v119_v6  ;;  %v177_v11 = vand.u32 4294901760, %v120_v8  ;;  %v180_v12 = vand.u32 4294901760, %v121_v9  ;;  %v122_v13 = vld [vmem:[%s10151_s1 + $0x30] sm:$0xff]  ;;  %v123_v18 = vld [vmem:[%s10151_s1 + $0x38] sm:$0xff]  ;;  %v124_v19 = vld [vmem:[%s10151_s1 + $0x40] sm:$0xff] }
   0x4   :  { %v6529_v14 = vpack.c.bf16 %v168_v5, %v165_v4  ;;  %v6531_v15 = vsub.f32 %v116_v1, %v165_v4  ;;  %v6533_v16 = vsub.f32 %v117_v2, %v168_v5  ;;  %v6535_v17 = vsub.f32 %v118_v3, %v171_v7  ;;  %v125_v26 = vld [vmem:[%s10151_s1 + $0x48] sm:$0xff]  ;;  %v126_v39 = vld [vmem:[%s10151_s1 + $0x50] sm:$0xff]  ;;  %v127_v40 = vld [vmem:[%s10151_s1 + $0x58] sm:$0xff] }
   0x5   :  { %v6543_v20 = vpack.c.bf16 %v174_v10, %v171_v7  ;;  %v6545_v21 = vsub.f32 %v119_v6, %v174_v10  ;;  %v6548_v22 = vsub.f32 %v120_v8, %v177_v11  ;;  %v183_v25 = vand.u32 4294901760, %v122_v13  ;;  %v6594_v49 = vld [vmem:[%s10151_s1 + $0x60] sm:$0xff]  ;;  %v129_v58 = vld [vmem:[%s10151_s1 + $0x68] sm:$0xff]  ;;  %v6622_v63 = vld [vmem:[%s10151_s1 + $0x70] sm:$0xff] }
   0x6   :  { %10659 = vst [vmem:[#allocation2_spill] sm:$0xff] %v6529_v14  ;;  %10660 = vst [vmem:[#allocation3_spill] sm:$0xff] %v6531_v15  ;;  %5673 = vmatpush1.bf16.msra.mxu1 %v6529_v14  ;;  %v10174_v23 = vand.u32 4294901760, %v6531_v15  ;;  %v10173_v24 = vand.u32 4294901760, %v6533_v16  ;;  %v186_v27 = vand.u32 4294901760, %v123_v18  ;;  %v10172_v28 = vand.u32 4294901760, %v6535_v17 }
   0x7   :  { %10661 = vst [vmem:[#allocation4_spill] sm:$0xff] %v6533_v16  ;;  %10662 = vst [vmem:[#allocation5_spill] sm:$0xff] %v6535_v17  ;;  %5674 = vmatprep.subr.bf16.mxu1 %v10181_v0  ;;  %v10171_v29 = vand.u32 4294901760, %v6545_v21  ;;  %v189_v30 = vand.u32 4294901760, %v124_v19  ;;  %v6558_v31 = vsub.f32 %v121_v9, %v180_v12  ;;  %v6566_v34 = vsub.f32 %v122_v13, %v183_v25  ;;  %v131_v5 = vld [vmem:[%s10151_s1 + $0x78] sm:$0xff] }
   0x8   :  { %10663 = vst [vmem:[#allocation6_spill] sm:$0xff] %v6543_v20  ;;  %10664 = vst [vmem:[#allocation7_spill] sm:$0xff] %v6545_v21  ;;  %v745_v32 = vsub.f32 %v6531_v15, %v10174_v23  ;;  %v752_v33 = vsub.f32 %v6533_v16, %v10173_v24  ;;  %v6568_v35 = vsub.f32 %v123_v18, %v186_v27  ;;  %v192_v38 = vand.u32 4294901760, %v125_v26 }
   0x9   :  { %10665 = vst [vmem:[#allocation8_spill] sm:$0xff] %v6548_v22  ;;  %10666 = vst [vmem:[#allocation9_spill] sm:$0xff] %v6558_v31  ;;  %v759_v36 = vsub.f32 %v6535_v17, %v10172_v28  ;;  %v766_v37 = vsub.f32 %v6545_v21, %v10171_v29  ;;  %v6583_v41 = vpack.c.bf16 %v180_v12, %v177_v11  ;;  %v10170_v48 = vand.u32 4294901760, %v6548_v22 }
   0xa   :  { %10667 = vst [vmem:[#allocation10_spill] sm:$0xff] %v6566_v34  ;;  %10668 = vst [vmem:[#allocation11_spill] sm:$0xff] %v6568_v35  ;;  %5676 = vmatpush1.bf16.msra.mxu1 %v6543_v20  ;;  %v746_v42 = vand.u32 4294901760, %v745_v32  ;;  %v753_v43 = vand.u32 4294901760, %v752_v33  ;;  %v6585_v44 = vpack.c.bf16 %v186_v27, %v183_v25  ;;  %v6588_v47 = vsub.f32 %v124_v19, %v189_v30  ;;  %v6654_v27 = vld [vmem:[%s10151_s1 + $0x80] sm:$0xff] }
   0xb   :  { %10669 = vst [vmem:[#allocation12_spill] sm:$0xff] %v6583_v41  ;;  %5677 = vmatprep.subr.bf16.mxu1 %v10181_v0  ;;  %v760_v45 = vand.u32 4294901760, %v759_v36  ;;  %v767_v46 = vand.u32 4294901760, %v766_v37  ;;  %v10167_v51 = vand.u32 4294901760, %v6558_v31  ;;  %v195_v52 = vand.u32 4294901760, %v126_v39  ;;  %v133_v37 = vld [vmem:[%s10151_s1 + $0x88] sm:$0xff] }
   0xc   :  { %10670 = vst [vmem:[#allocation13_spill] sm:$0xff] %v6585_v44  ;;  %10671 = vst [vmem:[#allocation14_spill] sm:$0xff] %v6588_v47  ;;  %v6596_v50 = vpack.c.bf16 %v753_v43, %v746_v42  ;;  %v198_v53 = vand.u32 4294901760, %v127_v40  ;;  %v6599_v54 = vsub.f32 %v125_v26, %v192_v38  ;;  %v773_v55 = vsub.f32 %v6548_v22, %v10170_v48  ;;  %v6803_v48 = vld [vmem:[%s10151_s1 + $0xd0] sm:$0xff] }
   0xd   :  { %v10166_v56 = vand.u32 4294901760, %v6566_v34  ;;  %v10165_v57 = vand.u32 4294901760, %v6568_v35  ;;  %v6611_v59 = vpack.c.bf16 %v767_v46, %v760_v45  ;;  %v6613_v60 = vpack.c.bf16 %v192_v38, %v189_v30 }
   0xe   :  { %10672 = vst [vmem:[#allocation15_spill] sm:$0xff] %v6599_v54  ;;  %5679 = vmatpush1.bf16.msra.mxu1 %v6583_v41  ;;  %5721 = vmatpush1.bf16.msra.mxu0 %v6596_v50  ;;  %v780_v61 = vsub.f32 %v6558_v31, %v10167_v51  ;;  %v201_v62 = vand.u32 4294901760, %v6594_v49  ;;  %v774_v1 = vand.u32 4294901760, %v773_v55  ;;  %v6626_v2 = vsub.f32 %v126_v39, %v195_v52 }
   0xf   :  { %10673 = vst [vmem:[#allocation16_spill] sm:$0xff] %v6613_v60  ;;  %5680 = vmatprep.subr.bf16.mxu1 %v10181_v0  ;;  %5722 = vmatprep.subr.bf16.mxu0 %v10181_v0  ;;  %v787_v3 = vsub.f32 %v6566_v34, %v10166_v56  ;;  %v794_v4 = vsub.f32 %v6568_v35, %v10165_v57  ;;  %v204_v8 = vand.u32 4294901760, %v129_v58  ;;  %v10164_v9 = vand.u32 4294901760, %v6588_v47 }
  0x10   :  { %10674 = vst [vmem:[#allocation17_spill] sm:$0xff] %v6626_v2  ;;  %v781_v6 = vand.u32 4294901760, %v780_v61  ;;  %v6637_v7 = vsub.f32 %v127_v40, %v198_v53  ;;  %v10161_v12 = vand.u32 4294901760, %v6599_v54  ;;  %v207_v13 = vand.u32 4294901760, %v6622_v63 }
  0x11   :  { %v788_v10 = vand.u32 4294901760, %v787_v3  ;;  %v795_v11 = vand.u32 4294901760, %v794_v4  ;;  %v6647_v19 = vsub.f32 %v6594_v49, %v201_v62  ;;  %v6649_v25 = vsub.f32 %v129_v58, %v204_v8 }
  0x12   :  { %10675 = vst [vmem:[#allocation18_spill] sm:$0xff] %v6637_v7  ;;  %5682 = vmatpush1.bf16.msra.mxu1 %v6585_v44  ;;  %5724 = vmatpush1.bf16.msra.mxu0 %v6611_v59  ;;  %v6644_v18 = vpack.c.bf16 %v781_v6, %v774_v1  ;;  %v210_v26 = vand.u32 4294901760, %v131_v5  ;;  %v6658_v30 = vpack.c.bf16 %v198_v53, %v195_v52  ;;  %v10160_v36 = vand.u32 4294901760, %v6626_v2  ;;  %v6685_v52 = vld [vmem:[%s10151_s1 + $0x90] sm:$0xff]  ;;  %v6707_v6 = vld [vmem:[%s10151_s1 + $0xa0] sm:$0xff] }
  0x13   :  { %10676 = vst [vmem:[#allocation19_spill] sm:$0xff] %v6647_v19  ;;  %10677 = vst [vmem:[#allocation20_spill] sm:$0xff] %v6649_v25  ;;  %5683 = vmatprep.subr.bf16.mxu1 %v10181_v0  ;;  %5725 = vmatprep.subr.bf16.mxu0 %v10181_v0  ;;  %v801_v32 = vsub.f32 %v6588_v47, %v10164_v9  ;;  %v808_v33 = vsub.f32 %v6599_v54, %v10161_v12  ;;  %v10158_v42 = vand.u32 4294901760, %v6637_v7 }
  0x14   :  { %10678 = vst [vmem:[#allocation21_spill] sm:$0xff] %v6658_v30  ;;  %v6670_v38 = vpack.c.bf16 %v795_v11, %v788_v10  ;;  %v6673_v39 = vsub.f32 %v6622_v63, %v207_v13  ;;  %v6675_v40 = vsub.f32 %v131_v5, %v210_v26  ;;  %v815_v46 = vsub.f32 %v6626_v2, %v10160_v36  ;;  %v135_v63 = vld [vmem:[%s10151_s1 + $0x98] sm:$0xff] }
  0x15   :  { %v802_v43 = vand.u32 4294901760, %v801_v32  ;;  %v809_v45 = vand.u32 4294901760, %v808_v33  ;;  %v213_v49 = vand.u32 4294901760, %v6654_v27  ;;  %v822_v53 = vsub.f32 %v6637_v7, %v10158_v42 }
  0x16   :  { %10679 = vst [vmem:[#allocation22_spill] sm:$0xff] %v6670_v38  ;;  %10680 = vst [vmem:[#allocation23_spill] sm:$0xff] %v6673_v39  ;;  %5685 = vmatpush1.bf16.msra.mxu1 %v6613_v60  ;;  %5727 = vmatpush1.bf16.msra.mxu0 %v6644_v18  ;;  %v216_v55 = vand.u32 4294901760, %v133_v37  ;;  %v10157_v58 = vand.u32 4294901760, %v6647_v19  ;;  %v10159_v61 = vand.u32 4294901760, %v6649_v25  ;;  %v6699_v1 = vpack.c.bf16 %v204_v8, %v201_v62  ;;  %v6718_v62 = vld [vmem:[%s10151_s1 + $0xa8] sm:$0xff] }
  0x17   :  { %10681 = vst [vmem:[#allocation24_spill] sm:$0xff] %v6675_v40  ;;  %5686 = vmatprep.subr.bf16.mxu1 %v10181_v0  ;;  %5728 = vmatprep.subr.bf16.mxu0 %v10181_v0  ;;  %v6701_v3 = vpack.c.bf16 %v809_v45, %v802_v43  ;;  %v816_v4 = vand.u32 4294901760, %v815_v46  ;;  %v219_v5 = vand.u32 4294901760, %v6685_v52  ;;  %v823_v10 = vand.u32 4294901760, %v822_v53 }
  0x18   :  { %10682 = vst [vmem:[#allocation25_spill] sm:$0xff] %v6699_v1  ;;  %v6710_v11 = vsub.f32 %v6654_v27, %v213_v49  ;;  %v6712_v32 = vsub.f32 %v133_v37, %v216_v55  ;;  %v10163_v33 = vand.u32 4294901760, %v6673_v39  ;;  %v829_v8 = vsub.f32 %v6647_v19, %v10157_v58 }
  0x19   :  { %10683 = vst [vmem:[#allocation26_spill] sm:$0xff] %v6701_v3  ;;  %v836_v27 = vsub.f32 %v6649_v25, %v10159_v61  ;;  %v222_v37 = vand.u32 4294901760, %v135_v63  ;;  %v10162_v43 = vand.u32 4294901760, %v6675_v40  ;;  %v225_v45 = vand.u32 4294901760, %v6707_v6 }
  0x1a   :  { %10684 = vst [vmem:[#allocation27_spill] sm:$0xff] %v6710_v11  ;;  %10685 = vst [vmem:[#allocation28_spill] sm:$0xff] %v6712_v32  ;;  %5688 = vmatpush1.bf16.msra.mxu1 %v6658_v30  ;;  %5730 = vmatpush1.bf16.msra.mxu0 %v6670_v38  ;;  %v6732_v46 = vpack.c.bf16 %v210_v26, %v207_v13  ;;  %v6735_v53 = vsub.f32 %v6685_v52, %v219_v5  ;;  %v228_v58 = vand.u32 4294901760, %v6718_v62  ;;  %v6750_v13 = vld [vmem:[%s10151_s1 + $0xb0] sm:$0xff] }
  0x1b   :  { %5689 = vmatprep.subr.bf16.mxu1 %v10181_v0  ;;  %5731 = vmatprep.subr.bf16.mxu0 %v10181_v0  ;;  %v6738_v42 = vpack.c.bf16 %v823_v10, %v816_v4  ;;  %v843_v61 = vsub.f32 %v6673_v39, %v10163_v33  ;;  %v850_v36 = vsub.f32 %v6675_v40, %v10162_v43  ;;  %v10169_v12 = vand.u32 4294901760, %v6710_v11  ;;  %v139_v43 = vld [vmem:[%s10151_s1 + $0xb8] sm:$0xff] }
  0x1c   :  { %10686 = vst [vmem:[#allocation29_spill] sm:$0xff] %v6732_v46  ;;  %10687 = vst [vmem:[#allocation30_spill] sm:$0xff] %v6735_v53  ;;  %v830_v26 = vand.u32 4294901760, %v829_v8  ;;  %v837_v52 = vand.u32 4294901760, %v836_v27  ;;  %v6754_v4 = vsub.f32 %v135_v63, %v222_v37  ;;  %v10168_v10 = vand.u32 4294901760, %v6712_v32 }
  0x1d   :  { %10688 = vst [vmem:[#allocation31_spill] sm:$0xff] %v6738_v42  ;;  %v6763_v33 = vsub.f32 %v6707_v6, %v225_v45  ;;  %v6765_v9 = vpack.c.bf16 %v216_v55, %v213_v49  ;;  %v6768_v8 = vsub.f32 %v6718_v62, %v228_v58  ;;  %v231_v63 = vand.u32 4294901760, %v6750_v13  ;;  %v141_v62 = vld [vmem:[%s10151_s1 + $0xc8] sm:$0xff] }
  0x1e   :  { %5691 = vmatpush1.bf16.msra.mxu1 %v6699_v1  ;;  %5733 = vmatpush1.bf16.msra.mxu0 %v6701_v3  ;;  %10689 = vst [vmem:[#allocation32_spill] sm:$0xff] %v6754_v4  ;;  %v844_v27 = vand.u32 4294901760, %v843_v61  ;;  %v851_v57 = vand.u32 4294901760, %v850_v36  ;;  %v857_v56 = vsub.f32 %v6710_v11, %v10169_v12  ;;  %v234_v51 = vand.u32 4294901760, %v139_v43  ;;  %v6786_v36 = vld [vmem:[%s10151_s1 + $0xc0] sm:$0xff] }
  0x1f   :  { %5692 = vmatprep.subr.bf16.mxu1 %v10181_v0  ;;  %5734 = vmatprep.subr.bf16.mxu0 %v10181_v0  ;;  %10690 = vst [vmem:[#allocation33_spill] sm:$0xff] %v6763_v33  ;;  %10691 = vst [vmem:[#allocation34_spill] sm:$0xff] %v6765_v9  ;;  %v6776_v6 = vpack.c.bf16 %v837_v52, %v830_v26  ;;  %v864_v49 = vsub.f32 %v6712_v32, %v10168_v10  ;;  %v10175_v55 = vand.u32 4294901760, %v6735_v53 }
  0x20   :  { %10692 = vst [vmem:[#allocation35_spill] sm:$0xff] %v6768_v8  ;;  %v10178_v61 = vand.u32 4294901760, %v6754_v4  ;;  %v10183_v26 = vand.u32 4294901760, %v6763_v33  ;;  %v6794_v52 = vpack.c.bf16 %v222_v37, %v219_v5  ;;  %v6797_v10 = vsub.f32 %v6750_v13, %v231_v63  ;;  %v6813_v5 = vld [vmem:[%s10151_s1 + $0xd8] sm:$0xff] }
  0x21   :  { %10693 = vst [vmem:[#allocation36_spill] sm:$0xff] %v6776_v6  ;;  %v10184_v12 = vand.u32 4294901760, %v6768_v8  ;;  %v6805_v29 = vpack.c.bf16 %v851_v57, %v844_v27  ;;  %v858_v28 = vand.u32 4294901760, %v857_v56  ;;  %v6807_v24 = vsub.f32 %v139_v43, %v234_v51 }
  0x22   :  { %5694 = vmatpush1.bf16.msra.mxu1 %v6732_v46  ;;  %5736 = vmatpush1.bf16.msra.mxu0 %v6738_v42  ;;  %10694 = vst [vmem:[#allocation37_spill] sm:$0xff] %v6794_v52  ;;  %10695 = vst [vmem:[#allocation38_spill] sm:$0xff] %v6797_v10  ;;  %v237_v23 = vand.u32 4294901760, %v6786_v36  ;;  %v865_v37 = vand.u32 4294901760, %v864_v49  ;;  %v871_v57 = vsub.f32 %v6735_v53, %v10175_v55  ;;  %v240_v43 = vand.u32 4294901760, %v141_v62 }
  0x23   :  { %5695 = vmatprep.subr.bf16.mxu1 %v10181_v0  ;;  %5737 = vmatprep.subr.bf16.mxu0 %v10181_v0  ;;  %10696 = vst [vmem:[#allocation39_spill] sm:$0xff] %v6805_v29  ;;  %10697 = vst [vmem:[#allocation40_spill] sm:$0xff] %v6807_v24  ;;  %v878_v56 = vsub.f32 %v6754_v4, %v10178_v61  ;;  %v885_v13 = vsub.f32 %v6763_v33, %v10183_v26  ;;  %v6843_v26 = vld [vmem:[%s10151_s1 + $0xe0] sm:$0xff]  ;;  %v10702_v55 = vmov 0.0|0.0  }
  0x24   :  { %v892_v49 = vsub.f32 %v6768_v8, %v10184_v12  ;;  %v6836_v61 = vsub.f32 %v6786_v36, %v237_v23  ;;  %v21_v12 = vld [vmem:[%s10152_s0 + $0x8] sm:$0xff]  ;;  %v6852_v46 = vsub.f32 %v141_v62, %v240_v43  ;;  %v6859_v27 = vpack.c.bf16 %v234_v51, %v231_v63  ;;  %v6869_v62 = vld [vmem:[%s10151_s1 + $0xf0] sm:$0xff]  ;;  %v6880_v63 = vld [vmem:[%s10151_s1 + $0xf8] sm:$0xff] }
  0x25   :  { %v879_v36 = vand.u32 4294901760, %v878_v56  ;;  %v886_v1 = vand.u32 4294901760, %v885_v13  ;;  %v249_v51 = vand.u32 4294901760, %v6843_v26  ;;  %v20_v13 = vld [vmem:[%s10152_s0] sm:$0xff] }
  0x26   :  { %5697 = vmatpush1.bf16.msra.mxu1 %v6765_v9  ;;  %5739 = vmatpush1.bf16.msra.mxu0 %v6776_v6  ;;  %v6833_v9 = vpack.c.bf16 %v228_v58, %v225_v45  ;;  %10699 = vst [vmem:[#allocation42_spill] sm:$0xff] %v6836_v61  ;;  %v6850_v58 = vpack.c.bf16 %v865_v37, %v858_v28  ;;  %v872_v45 = vand.u32 4294901760, %v871_v57  ;;  %10701 = vst [vmem:[#allocation44_spill] sm:$0xff] %v6852_v46 }
  0x27   :  { %5698 = vmatprep.subr.bf16.mxu1 %v10181_v0  ;;  %5740 = vmatprep.subr.bf16.mxu0 %v10181_v0  ;;  %v145_v0 = vld [vmem:[%s10151_s1 + $0xe8] sm:$0xff]  ;;  %10703 = vst [vmem:[#allocation45_spill] sm:$0xff] %v6859_v27  ;;  %v893_v37 = vand.u32 4294901760, %v892_v49  ;;  %v10706_v57 = vand.u32 4294901760, %v6813_v5  ;;  %v10709_v49 = vand.u32 4294901760, %v6797_v10 }
  0x28   :  { %10698 = vst [vmem:[#allocation41_spill] sm:$0xff] %v6833_v9  ;;  %10700 = vst [vmem:[#allocation43_spill] sm:$0xff] %v6850_v58  ;;  %v252_v44 = vand.u32 4294901760, %v145_v0  ;;  %v6896_v20 = vpack.c.bf16 %v879_v36, %v872_v45  ;;  %v24_v45 = vld [vmem:[%s10152_s0 + $0x20] sm:$0xff] }
  0x29   :  { %v6874_v56 = vsub.f32 %v6813_v5, %v10706_v57  ;;  %v899_v30 = vsub.f32 %v6797_v10, %v10709_v49  ;;  %v10710_v57 = vand.u32 4294901760, %v6807_v24  ;;  %v6905_v49 = vpack.c.bf16 %v240_v43, %v237_v23 }
  0x2a   :  { %5700 = vmatpush1.bf16.msra.mxu1 %v6794_v52  ;;  %5742 = vmatpush1.bf16.msra.mxu0 %v6805_v29  ;;  %v10704_v52 = vand.u32 4294901760, %v6803_v48  ;;  %10711 = vst [vmem:[#allocation49_spill] sm:$0xff] %v6896_v20  ;;  %v6914_v36 = vpack.c.bf16 %v893_v37, %v886_v1  ;;  %v6922_v41 = vsub.f32 %v145_v0, %v252_v44  ;;  %v23_v1 = vld [vmem:[%s10152_s0 + $0x18] sm:$0xff]  ;;  %v6946_v29 = vand.u32 4294901760, %v24_v45 }
  0x2b   :  { %5701 = vmatprep.subr.bf16.mxu1 %v10702_v55  ;;  %5743 = vmatprep.subr.bf16.mxu0 %v10702_v55  ;;  %10707 = vst [vmem:[#allocation47_spill] sm:$0xff] %v6874_v56  ;;  %v906_v60 = vsub.f32 %v6807_v24, %v10710_v57  ;;  %10713 = vst [vmem:[#allocation51_spill] sm:$0xff] %v6905_v49  ;;  %v258_v57 = vand.u32 4294901760, %v6880_v63  ;;  %v900_v43 = vand.u32 4294901760, %v899_v30  ;;  %v10720_v30 = vand.u32 4294901760, %v6869_v62 }
  0x2c   :  { %v6864_v28 = vsub.f32 %v6803_v48, %v10704_v52  ;;  %v6882_v52 = vand.u32 4294901760, %v21_v12  ;;  %10715 = vst [vmem:[#allocation53_spill] sm:$0xff] %v6914_v36  ;;  %10717 = vst [vmem:[#allocation55_spill] sm:$0xff] %v6922_v41  ;;  %v6962_v3 = vand.u32 4294901760, %v23_v1 }
  0x2d   :  { %v907_v14 = vand.u32 4294901760, %v906_v60  ;;  %v10719_v60 = vand.u32 4294901760, %v6852_v46  ;;  %10722 = vst [vmem:[#allocation57_spill] sm:$0xff] %v6946_v29 }
  0x2e   :  { %10705 = vst [vmem:[#allocation46_spill] sm:$0xff] %v6864_v28  ;;  %10708 = vst [vmem:[#allocation48_spill] sm:$0xff] %v6882_v52  ;;  %5703 = vmatpush1.bf16.msra.mxu1 %v6833_v9  ;;  %5745 = vmatpush1.bf16.msra.mxu0 %v6850_v58  ;;  %v6901_v6 = vsub.f32 %v21_v12, %v6882_v52  ;;  %v6909_v9 = vand.u32 4294901760, %v20_v13  ;;  %v6917_v12 = vsub.f32 %v6843_v26, %v249_v51  ;;  %v27_v26 = vld [vmem:[%s10152_s0 + $0x38] sm:$0xff] }
  0x2f   :  { %5704 = vmatprep.subr.bf16.mxu1 %v10702_v55  ;;  %5746 = vmatprep.subr.bf16.mxu0 %v10702_v55  ;;  %v10718_v58 = vand.u32 4294901760, %v6836_v61  ;;  %v920_v0 = vsub.f32 %v6852_v46, %v10719_v60  ;;  %v10724_v60 = vand.u32 4294901760, %v6864_v28  ;;  %10727 = vst [vmem:[#allocation60_spill] sm:$0xff] %v6962_v3  ;;  %v6964_v38 = vand.u32 4294901760, %v27_v26 }
  0x30   :  { %10712 = vst [vmem:[#allocation50_spill] sm:$0xff] %v6901_v6  ;;  %10714 = vst [vmem:[#allocation52_spill] sm:$0xff] %v6909_v9  ;;  %v10212_v23 = vand.u32 4294901760, %v6901_v6  ;;  %966 = vmatprep.mubr.f32.mxu0 %v6882_v52  ;;  %v6951_v52 = vsub.f32 %v6880_v63, %v258_v57  ;;  %v10729_v46 = vand.u32 4294901760, %v6803_v48  ;;  %v10730_v63 = vand.u32 4294901760, %v6813_v5 }
  0x31   :  { %10716 = vst [vmem:[#allocation54_spill] sm:$0xff] %v6917_v12  ;;  %v913_v42 = vsub.f32 %v6836_v61, %v10718_v58  ;;  %v6941_v58 = vsub.f32 %v6869_v62, %v10720_v30  ;;  %v6957_v30 = vsub.f32 %v20_v13, %v6909_v9  ;;  %10728 = vst [vmem:[#allocation61_spill] sm:$0xff] %v6964_v38  ;;  %v10225_v13 = vand.u32 4294901760, %v6917_v12 }
  0x32   :  { %5706 = vmatpush1.bf16.msra.mxu1 %v6859_v27  ;;  %5748 = vmatpush1.bf16.msra.mxu0 %v6896_v20  ;;  %v263_v37 = vsub.f32 %v6901_v6, %v10212_v23  ;;  %10723 = vst [vmem:[#allocation58_spill] sm:$0xff] %v6951_v52  ;;  %v927_v27 = vsub.f32 %v6864_v28, %v10724_v60  ;;  %v10726_v20 = vand.u32 4294901760, %v6874_v56 }
  0x33   :  { %10721 = vst [vmem:[#allocation56_spill] sm:$0xff] %v6941_v58  ;;  %5707 = vmatprep.subr.bf16.mxu1 %v10702_v55  ;;  %5749 = vmatprep.subr.bf16.mxu0 %v10702_v55  ;;  %10725 = vst [vmem:[#allocation59_spill] sm:$0xff] %v6957_v30  ;;  %v6970_v61 = vpack.c.bf16 %v10730_v63, %v10729_v46  ;;  %v6972_v24 = vpack.c.bf16 %v907_v14, %v900_v43  ;;  %v26_v14 = vld [vmem:[%s10152_s0 + $0x30] sm:$0xff] }
  0x34   :  { %v934_v23 = vsub.f32 %v6874_v56, %v10726_v20  ;;  %v264_v6 = vand.u32 4294901760, %v263_v37  ;;  %v6974_v60 = vpack.c.bf16 %v252_v44, %v249_v51  ;;  %v914_v20 = vand.u32 4294901760, %v913_v42  ;;  %v30_v44 = vld [vmem:[%s10152_s0 + $0x50] sm:$0xff] }
  0x35   :  { %10731 = vst [vmem:[#allocation62_spill] sm:$0xff] %v6970_v61  ;;  %10732 = vst [vmem:[#allocation63_spill] sm:$0xff] %v6972_v24  ;;  %v921_v37 = vand.u32 4294901760, %v920_v0  ;;  %v10226_v56 = vand.u32 4294901760, %v6922_v41  ;;  %v6981_v48 = vsub.f32 %v24_v45, %v6946_v29  ;;  %v928_v46 = vand.u32 4294901760, %v927_v27  ;;  %v36_v0 = vld [vmem:[%s10152_s0 + $0x80] sm:$0xff] }
  0x36   :  { %10733 = vst [vmem:[#allocation64_spill] sm:$0xff] %v6974_v60  ;;  %5709 = vmatpush1.bf16.msra.mxu1 %v6905_v49  ;;  %5751 = vmatpush1.bf16.msra.mxu0 %v6914_v36  ;;  %v935_v45 = vand.u32 4294901760, %v934_v23  ;;  %v6996_v43 = vsub.f32 %v23_v1, %v6962_v3  ;;  %v7000_v63 = vsub.f32 %v27_v26, %v6964_v38  ;;  %v7005_v42 = vand.u32 4294901760, %v26_v14  ;;  %v29_v23 = vld [vmem:[%s10152_s0 + $0x48] sm:$0xff] }
  0x37   :  { %10734 = vst [vmem:[#allocation65_spill] sm:$0xff] %v6981_v48  ;;  %5710 = vmatprep.subr.bf16.mxu1 %v10702_v55  ;;  %5752 = vmatprep.subr.bf16.mxu0 %v10702_v55  ;;  %v941_v27 = vsub.f32 %v6917_v12, %v10225_v13  ;;  %v7007_v5 = vand.u32 4294901760, %v30_v44  ;;  %v10740_v1 = vand.u32 4294901760, %v6869_v62  ;;  %v948_v13 = vsub.f32 %v6922_v41, %v10226_v56 }
  0x38   :  { %265 = vmatprep.mubr.f32.mxu1 %v264_v6  ;;  %10735 = vst [vmem:[#allocation66_spill] sm:$0xff] %v6996_v43  ;;  %10736 = vst [vmem:[#allocation67_spill] sm:$0xff] %v7000_v63  ;;  %v7013_v6 = vpack.c.bf16 %v921_v37, %v914_v20  ;;  %v10742_v20 = vand.u32 4294901760, %v6957_v30  ;;  %v7039_v51 = vpack.c.bf16 %v935_v45, %v928_v46  ;;  %v32_v46 = vld [vmem:[%s10152_s0 + $0x60] sm:$0xff]  ;;  %v10749_v45 = vand.u32 4294901760, %v6981_v48 }
  0x39   :  { %10737 = vst [vmem:[#allocation68_spill] sm:$0xff] %v7005_v42  ;;  %10738 = vst [vmem:[#allocation69_spill] sm:$0xff] %v7007_v5  ;;  %v7017_v26 = vpack.c.bf16 %v258_v57, %v10740_v1  ;;  %v10743_v57 = vand.u32 4294901760, %v6941_v58  ;;  %v33_v1 = vld [vmem:[%s10152_s0 + $0x68] sm:$0xff]  ;;  %v7050_v36 = vsub.f32 %v30_v44, %v7007_v5  ;;  %v7077_v44 = vand.u32 4294901760, %v32_v46 }
  0x3a   :  { %5712 = vmatpush1.bf16.msra.mxu1 %v6970_v61  ;;  %5754 = vmatpush1.bf16.msra.mxu0 %v6972_v24  ;;  %10739 = vst [vmem:[#allocation70_spill] sm:$0xff] %v7013_v6  ;;  %v269_v62 = vsub.f32 %v6957_v30, %v10742_v20  ;;  %10744 = vst [vmem:[#allocation72_spill] sm:$0xff] %v7039_v51  ;;  %v10745_v61 = vand.u32 4294901760, %v6951_v52  ;;  %v942_v24 = vand.u32 4294901760, %v941_v27  ;;  %v7052_v30 = vand.u32 4294901760, %v29_v23 }
  0x3b   :  { %10741 = vst [vmem:[#allocation71_spill] sm:$0xff] %v7017_v26  ;;  %5713 = vmatprep.subr.bf16.mxu1 %v10702_v55  ;;  %5755 = vmatprep.subr.bf16.mxu0 %v10702_v55  ;;  %v955_v37 = vsub.f32 %v6941_v58, %v10743_v57  ;;  %v7047_v57 = vsub.f32 %v26_v14, %v7005_v42  ;;  %10747 = vst [vmem:[#allocation74_spill] sm:$0xff] %v7050_v36  ;;  %v7062_v14 = vand.u32 4294901760, %v33_v1  ;;  %v35_v58 = vld [vmem:[%s10152_s0 + $0x78] sm:$0xff] }
  0x3c   :  { %v962_v49 = vsub.f32 %v6951_v52, %v10745_v61  ;;  %10748 = vst [vmem:[#allocation75_spill] sm:$0xff] %v7052_v30  ;;  %v949_v61 = vand.u32 4294901760, %v948_v13  ;;  %v278_v27 = vsub.f32 %v6981_v48, %v10749_v45  ;;  %v270_v56 = vand.u32 4294901760, %v269_v62  ;;  %10753 = vst [vmem:[#allocation77_spill] sm:$0xff] %v7077_v44 }
  0x3d   :  { %10746 = vst [vmem:[#allocation73_spill] sm:$0xff] %v7047_v57  ;;  %10750 = vst [vmem:[#allocation76_spill] sm:$0xff] %v7062_v14  ;;  %v956_v20 = vand.u32 4294901760, %v955_v37  ;;  %v10751_v13 = vand.u32 4294901760, %v6996_v43  ;;  %v7082_v37 = vsub.f32 %v29_v23, %v7052_v30  ;;  %v7094_v52 = vsub.f32 %v33_v1, %v7062_v14  ;;  %v39_v23 = vld [vmem:[%s10152_s0 + $0x98] sm:$0xff] }
  0x3e   :  { %5715 = vmatpush1.bf16.msra.mxu1 %v6974_v60  ;;  %5757 = vmatpush1.bf16.msra.mxu0 %v7013_v6  ;;  %v963_v45 = vand.u32 4294901760, %v962_v49  ;;  %v10752_v6 = vand.u32 4294901760, %v7000_v63  ;;  %v7096_v62 = vand.u32 4294901760, %v36_v0  ;;  %v7110_v1 = vand.u32 4294901760, %v35_v58 }
  0x3f   :  { %5716 = vmatprep.subr.bf16.mxu1 %v10702_v55  ;;  %5758 = vmatprep.subr.bf16.mxu0 %v10702_v55  ;;  %v284_v60 = vsub.f32 %v6996_v43, %v10751_v13  ;;  %10754 = vst [vmem:[#allocation78_spill] sm:$0xff] %v7082_v37  ;;  %v279_v13 = vand.u32 4294901760, %v278_v27  ;;  %10756 = vst [vmem:[#allocation80_spill] sm:$0xff] %v7094_v52  ;;  %v10762_v43 = vand.u32 4294901760, %v7050_v36  ;;  %v10256_v49 = vand.u32 4294901760, %v7082_v37 }
  0x40   :  { %v293_v48 = vsub.f32 %v7000_v63, %v10752_v6  ;;  %v7091_v6 = vpack.c.bf16 %v949_v61, %v942_v24  ;;  %10757 = vst [vmem:[#allocation81_spill] sm:$0xff] %v7096_v62  ;;  %v7105_v24 = vpack.c.bf16 %v963_v45, %v956_v20  ;;  %v7108_v61 = vsub.f32 %v32_v46, %v7077_v44 }
  0x41   :  { %10760 = vst [vmem:[#allocation84_spill] sm:$0xff] %v7110_v1  ;;  %v308_v47 = vsub.f32 %v7050_v36, %v10762_v43  ;;  %v7127_v20 = vand.u32 4294901760, %v39_v23  ;;  %v7138_v45 = vsub.f32 %v35_v58, %v7110_v1  ;;  %v314_v43 = vsub.f32 %v7082_v37, %v10256_v49 }
  0x42   :  { %5718 = vmatpush1.bf16.msra.mxu1 %v7017_v26  ;;  %5760 = vmatpush1.bf16.msra.mxu0 %v7039_v51  ;;  %10755 = vst [vmem:[#allocation79_spill] sm:$0xff] %v7091_v6  ;;  %v285_v26 = vand.u32 4294901760, %v284_v60  ;;  %10758 = vst [vmem:[#allocation82_spill] sm:$0xff] %v7105_v24  ;;  %v294_v27 = vand.u32 4294901760, %v293_v48  ;;  %v10761_v51 = vand.u32 4294901760, %v7047_v57  ;;  %v38_v60 = vld [vmem:[%s10152_s0 + $0x90] sm:$0xff]  ;;  %v7125_v48 = vsub.f32 %v36_v0, %v7096_v62 }
  0x43   :  { %5761 = vmatprep.subr.bf16.mxu0 %v10702_v55  ;;  %6151 = vmatprep.subr.bf16.mxu1 %v10702_v55  ;;  %10759 = vst [vmem:[#allocation83_spill] sm:$0xff] %v7108_v61  ;;  %10764 = vst [vmem:[#allocation86_spill] sm:$0xff] %v7127_v20  ;;  %v7140_v0 = vand.u32 4294901760, %v38_v60  ;;  %v7154_v36 = vsub.f32 %v39_v23, %v7127_v20 }
  0x44   :  { %v299_v63 = vsub.f32 %v7047_v57, %v10761_v51  ;;  %10763 = vst [vmem:[#allocation85_spill] sm:$0xff] %v7125_v48  ;;  %v42_v51 = vld [vmem:[%s10152_s0 + $0xb0] sm:$0xff]  ;;  %10765 = vst [vmem:[#allocation87_spill] sm:$0xff] %v7138_v45 }
  0x45   :  { %271 = vmatmul.mubr.f32.vlgmr.msra.gmra.mrb[0].mxu1 %v270_v56  ;;  %10766 = vst [vmem:[#allocation88_spill] sm:$0xff] %v7140_v0  ;;  %v309_v56 = vand.u32 4294901760, %v308_v47  ;;  %10769 = vst [vmem:[#allocation90_spill] sm:$0xff] %v7154_v36  ;;  %v41_v47 = vld [vmem:[%s10152_s0 + $0xa8] sm:$0xff]  ;;  %v7171_v49 = vsub.f32 %v38_v60, %v7140_v0 }
  0x46   :  { %5763 = vmatpush1.bf16.msra.mxu0 %v7091_v6  ;;  %280 = vmatprep.mubr.f32.mxu1 %v279_v13  ;;  %v300_v13 = vand.u32 4294901760, %v299_v63  ;;  %v7146_v6 = vand.u32 4294901760, %v42_v51 }
  0x47   :  { %5764 = vmatprep.subr.bf16.mxu0 %v10702_v55  ;;  %6167 = vmatpush1.bf16.msra.mxu1 %v6596_v50  ;;  %v10768_v50 = vand.u32 4294901760, %v7094_v52  ;;  %10771 = vst [vmem:[#allocation91_spill] sm:$0xff] %v7171_v49 }
  0x48   :  { %6152 = vmatprep.subr.bf16.mxu1 %v10702_v55  ;;  %10767 = vst [vmem:[#allocation89_spill] sm:$0xff] %v7146_v6  ;;  %v7178_v46 = vsub.f32 %v42_v51, %v7146_v6  ;;  %v44_v51 = vld [vmem:[%s10152_s0 + $0xc0] sm:$0xff] }
  0x49   :  { %286 = vmatmul.mubr.f32.gmra.mrb[2].mxu1 %v285_v26  ;;  %v323_v58 = vsub.f32 %v7094_v52, %v10768_v50  ;;  %v45_v26 = vld [vmem:[%s10152_s0 + $0xc8] sm:$0xff]  ;;  %v10775_v50 = vand.u32 4294901760, %v7125_v48 }
  0x4a   :  { %5766 = vmatpush1.bf16.msra.mxu0 %v7105_v24  ;;  %295 = vmatprep.mubr.f32.mxu1 %v294_v27  ;;  %v10770_v27 = vand.u32 4294901760, %v7108_v61  ;;  %10772 = vst [vmem:[#allocation92_spill] sm:$0xff] %v7178_v46  ;;  %v7180_v24 = vand.u32 4294901760, %v41_v47  ;;  %v7189_v63 = vand.u32 4294901760, %v45_v26 }
  0x4b   :  { %5767 = vmatprep.subr.bf16.mxu0 %v10702_v55  ;;  %6168 = vmatpush1.bf16.msra.mxu1 %v6611_v59  ;;  %v315_v59 = vand.u32 4294901760, %v314_v43  ;;  %v324_v60 = vand.u32 4294901760, %v323_v58  ;;  %v10781_v43 = vand.u32 4294901760, %v7154_v36 }
  0x4c   :  { %v329_v23 = vsub.f32 %v7108_v61, %v10770_v27  ;;  %6153 = vmatprep.subr.bf16.mxu1 %v10702_v55  ;;  %10773 = vst [vmem:[#allocation93_spill] sm:$0xff] %v7180_v24  ;;  %v10774_v27 = vpack.c.bf16 %v6533_v16, %v6531_v15  ;;  %v338_v61 = vsub.f32 %v7125_v48, %v10775_v50  ;;  %10776 = vst [vmem:[#allocation94_spill] sm:$0xff] %v7189_v63 }
  0x4d   :  { %301 = vmatmul.mubr.f32.gmra.mrb[4].mxu1 %v300_v13  ;;  %968 = vmatmul.mubr.f32.vlgmr.msra.gmra.mrb[0].mxu0 %v6909_v9  ;;  %v10777_v50 = vand.u32 4294901760, %v7138_v45  ;;  %v7209_v9 = vsub.f32 %v41_v47, %v7180_v24  ;;  %v7211_v16 = vand.u32 4294901760, %v44_v51  ;;  %v353_v47 = vsub.f32 %v7154_v36, %v10781_v43 }
  0x4e   :  { %5769 = vmatpush1.bf16.msra.mxu0 %v10774_v27  ;;  %310 = vmatprep.mubr.f32.mxu1 %v309_v56  ;;  %v48_v56 = vld [vmem:[%s10152_s0 + $0xe0] sm:$0xff]  ;;  %v330_v58 = vand.u32 4294901760, %v329_v23  ;;  %v47_v23 = vld [vmem:[%s10152_s0 + $0xd8] sm:$0xff]  ;;  %v10789_v43 = vpack.c.bf16 %v6558_v31, %v6548_v22  ;;  %v10793_v31 = vld [vmem:[#allocation44_spill] sm:$0xff] }
  0x4f   :  { %973 = vmatprep.mubr.f32.mxu0 %v6946_v29  ;;  %5770 = vmatprep.subr.bf16.mxu0 %v10702_v55  ;;  %v344_v27 = vsub.f32 %v7138_v45, %v10777_v50  ;;  %10778 = vst [vmem:[#allocation95_spill] sm:$0xff] %v7209_v9  ;;  %10779 = vst [vmem:[#allocation96_spill] sm:$0xff] %v7211_v16  ;;  %v7225_v29 = vsub.f32 %v45_v26, %v7189_v63  ;;  %v7227_v13 = vand.u32 4294901760, %v48_v56  ;;  %v51_v50 = vld [vmem:[%s10152_s0 + $0xf8] sm:$0xff]  ;;  %v10786_v26 = vld [vmem:[#allocation40_spill] sm:$0xff] }
  0x50   :  { %6169 = vmatpush1.bf16.msra.mxu1 %v6644_v18  ;;  %v10780_v18 = vpack.c.bf16 %v6545_v21, %v6535_v17  ;;  %v7248_v15 = vsub.f32 %v44_v51, %v7211_v16  ;;  %v54_v51 = vld [vmem:[%s10152_s0 + $0x110] sm:$0xff]  ;;  %v10792_v17 = vld [vmem:[#allocation42_spill] sm:$0xff]  ;;  %v10796_v22 = vand.u32 4294901760, %v7209_v9 }
  0x51   :  { %316 = vmatmul.mubr.f32.gmra.mrb[6].mxu1 %v315_v59  ;;  %975 = vmatmul.mubr.f32.gmra.mrb[2].mxu0 %v6962_v3  ;;  %v339_v59 = vand.u32 4294901760, %v338_v61  ;;  %10782 = vst [vmem:[#allocation97_spill] sm:$0xff] %v7225_v29  ;;  %10783 = vst [vmem:[#allocation98_spill] sm:$0xff] %v7227_v13  ;;  %v10787_v3 = vand.u32 4294901760, %v7178_v46 }
  0x52   :  { %5772 = vmatpush1.bf16.msra.mxu0 %v10780_v18  ;;  %325 = vmatprep.mubr.f32.mxu1 %v324_v60  ;;  %v10784_v60 = vand.u32 4294901760, %v7171_v49  ;;  %v7237_v18 = vand.u32 4294901760, %v47_v23  ;;  %10788 = vst [vmem:[#allocation100_spill] sm:$0xff] %v7248_v15 }
  0x53   :  { %980 = vmatprep.mubr.f32.mxu0 %v6964_v38  ;;  %5773 = vmatprep.subr.bf16.mxu0 %v10702_v55  ;;  %v345_v38 = vand.u32 4294901760, %v344_v27  ;;  %v368_v21 = vsub.f32 %v7178_v46, %v10787_v3  ;;  %v7260_v3 = vand.u32 4294901760, %v51_v50  ;;  %v374_v46 = vsub.f32 %v7209_v9, %v10796_v22 }
  0x54   :  { %v359_v61 = vsub.f32 %v7171_v49, %v10784_v60  ;;  %10785 = vst [vmem:[#allocation99_spill] sm:$0xff] %v7237_v18  ;;  %6154 = vmatprep.subr.bf16.mxu1 %v10702_v55  ;;  %v50_v60 = vld [vmem:[%s10152_s0 + $0xf0] sm:$0xff]  ;;  %v10292_v49 = vand.u32 4294901760, %v7248_v15  ;;  %v7292_v22 = vand.u32 4294901760, %v54_v51 }
  0x55   :  { %331 = vmatmul.mubr.f32.gmra.mrb[8].mxu1 %v330_v58  ;;  %982 = vmatmul.mubr.f32.gmra.mrb[4].mxu0 %v7005_v42  ;;  %v354_v58 = vand.u32 4294901760, %v353_v47  ;;  %v7258_v42 = vsub.f32 %v48_v56, %v7227_v13  ;;  %10791 = vst [vmem:[#allocation102_spill] sm:$0xff] %v7260_v3  ;;  %v7270_v47 = vsub.f32 %v47_v23, %v7237_v18  ;;  %v7272_v27 = vand.u32 4294901760, %v50_v60  ;;  %v10795_v56 = vld [vmem:[#allocation22_spill] sm:$0xff] }
  0x56   :  { %5775 = vmatpush1.bf16.msra.mxu0 %v10789_v43  ;;  %340 = vmatprep.mubr.f32.mxu1 %v339_v59  ;;  %v360_v59 = vand.u32 4294901760, %v359_v61  ;;  %v10797_v43 = vld [vmem:[#allocation47_spill] sm:$0xff]  ;;  %v10798_v23 = vpack.c.bf16 %v6568_v35, %v6566_v34  ;;  %10800 = vst [vmem:[#allocation22_spill] sm:$0xff] %v7292_v22 }
  0x57   :  { %10790 = vst [vmem:[#allocation101_spill] sm:$0xff] %v7258_v42  ;;  %987 = vmatprep.mubr.f32.mxu0 %v7007_v5  ;;  %5776 = vmatprep.subr.bf16.mxu0 %v10702_v55  ;;  %10794 = vst [vmem:[#allocation103_spill] sm:$0xff] %v7272_v27  ;;  %v369_v5 = vand.u32 4294901760, %v368_v21  ;;  %v53_v61 = vld [vmem:[%s10152_s0 + $0x108] sm:$0xff]  ;;  %v375_v21 = vand.u32 4294901760, %v374_v46  ;;  %v10808_v46 = vld [vmem:[#allocation56_spill] sm:$0xff] }
  0x58   :  { %6170 = vmatpush1.bf16.msra.mxu1 %v10795_v56  ;;  %v10799_v56 = vand.u32 4294901760, %v7225_v29  ;;  %v7313_v35 = vand.u32 4294901760, %v53_v61 }
  0x59   :  { %346 = vmatmul.mubr.f32.gmra.mrb[10].mxu1 %v345_v38  ;;  %989 = vmatmul.mubr.f32.gmra.mrb[6].mxu0 %v7052_v30  ;;  %v7290_v30 = vsub.f32 %v51_v50, %v7260_v3  ;;  %v10805_v50 = vand.u32 4294901760, %v7258_v42 }
  0x5a   :  { %5778 = vmatpush1.bf16.msra.mxu0 %v10798_v23  ;;  %355 = vmatprep.mubr.f32.mxu1 %v354_v58  ;;  %v383_v38 = vsub.f32 %v7225_v29, %v10799_v56  ;;  %v57_v23 = vld [vmem:[%s10152_s0 + $0x128] sm:$0xff]  ;;  %v7304_v56 = vsub.f32 %v50_v60, %v7272_v27  ;;  %10801 = vst [vmem:[#allocation104_spill] sm:$0xff] %v7313_v35  ;;  %v10803_v60 = vld [vmem:[#allocation14_spill] sm:$0xff] }
  0x5b   :  { %994 = vmatprep.mubr.f32.mxu0 %v7062_v14  ;;  %5779 = vmatprep.subr.bf16.mxu0 %v10702_v55  ;;  %v389_v14 = vsub.f32 %v7248_v15, %v10292_v49  ;;  %v7315_v34 = vand.u32 4294901760, %v57_v23  ;;  %v10804_v58 = vpack.c.bf16 %v6599_v54, %v10803_v60  ;;  %v56_v49 = vld [vmem:[%s10152_s0 + $0x120] sm:$0xff]  ;;  %v10812_v60 = vand.u32 4294901760, %v7290_v30 }
  0x5c   :  { %6155 = vmatprep.subr.bf16.mxu1 %v10702_v55  ;;  %v384_v29 = vand.u32 4294901760, %v383_v38  ;;  %v10806_v38 = vand.u32 4294901760, %v7270_v47  ;;  %v10809_v54 = vld [vmem:[#allocation58_spill] sm:$0xff]  ;;  %v7349_v9 = vand.u32 4294901760, %v56_v49 }
  0x5d   :  { %361 = vmatmul.mubr.f32.gmra.mrb[12].mxu1 %v360_v59  ;;  %996 = vmatmul.mubr.f32.gmra.mrb[8].mxu0 %v7077_v44  ;;  %10802 = vst [vmem:[#allocation105_spill] sm:$0xff] %v7315_v34  ;;  %v398_v59 = vsub.f32 %v7258_v42, %v10805_v50  ;;  %v7325_v44 = vsub.f32 %v54_v51, %v7292_v22  ;;  %v10807_v51 = vld [vmem:[#allocation26_spill] sm:$0xff] }
  0x5e   :  { %5781 = vmatpush1.bf16.msra.mxu0 %v10804_v58  ;;  %370 = vmatprep.mubr.f32.mxu1 %v369_v5  ;;  %v60_v5 = vld [vmem:[%s10152_s0 + $0x140] sm:$0xff]  ;;  %v404_v58 = vsub.f32 %v7270_v47, %v10806_v38  ;;  %v7344_v42 = vsub.f32 %v53_v61, %v7313_v35  ;;  %v7347_v15 = vsub.f32 %v57_v23, %v7315_v34  ;;  %v59_v61 = vld [vmem:[%s10152_s0 + $0x138] sm:$0xff] }
  0x5f   :  { %1001 = vmatprep.mubr.f32.mxu0 %v7096_v62  ;;  %5782 = vmatprep.subr.bf16.mxu0 %v10702_v55  ;;  %v390_v62 = vand.u32 4294901760, %v389_v14  ;;  %10810 = vst [vmem:[#allocation26_spill] sm:$0xff] %v7349_v9  ;;  %v10811_v38 = vpack.c.bf16 %v6637_v7, %v6626_v2  ;;  %v7358_v50 = vand.u32 4294901760, %v60_v5 }
  0x60   :  { %6171 = vmatpush1.bf16.msra.mxu1 %v10807_v51  ;;  %v399_v51 = vand.u32 4294901760, %v398_v59  ;;  %v405_v23 = vand.u32 4294901760, %v404_v58  ;;  %v10814_v59 = vand.u32 4294901760, %v7304_v56  ;;  %v62_v58 = vld [vmem:[%s10152_s0 + $0x150] sm:$0xff] }
  0x61   :  { %376 = vmatmul.mubr.f32.gmra.mrb[14].mxu1 %v375_v21  ;;  %1003 = vmatmul.mubr.f32.gmra.mrb[10].mxu0 %v7110_v1  ;;  %v413_v21 = vsub.f32 %v7290_v30, %v10812_v60  ;;  %10813 = vst [vmem:[#allocation106_spill] sm:$0xff] %v7358_v50  ;;  %v7378_v1 = vand.u32 4294901760, %v59_v61  ;;  %v7390_v14 = vsub.f32 %v60_v5, %v7358_v50 }
  0x62   :  { %5784 = vmatpush1.bf16.msra.mxu0 %v10811_v38  ;;  %385 = vmatprep.mubr.f32.mxu1 %v384_v29  ;;  %v63_v29 = vld [vmem:[%s10152_s0 + $0x158] sm:$0xff]  ;;  %v419_v60 = vsub.f32 %v7304_v56, %v10814_v59  ;;  %v10816_v59 = vpack.c.bf16 %v6649_v25, %v6647_v19  ;;  %v66_v25 = vld [vmem:[%s10152_s0 + $0x170] sm:$0xff] }
  0x63   :  { %1008 = vmatprep.mubr.f32.mxu0 %v7127_v20  ;;  %5785 = vmatprep.subr.bf16.mxu0 %v10702_v55  ;;  %v7376_v20 = vsub.f32 %v56_v49, %v7349_v9  ;;  %10815 = vst [vmem:[#allocation107_spill] sm:$0xff] %v7378_v1  ;;  %v7392_v49 = vand.u32 4294901760, %v63_v29  ;;  %v7411_v2 = vsub.f32 %v59_v61, %v7378_v1  ;;  %v69_v61 = vld [vmem:[%s10152_s0 + $0x188] sm:$0xff] }
  0x64   :  { %6156 = vmatprep.subr.bf16.mxu1 %v10702_v55 }
  0x65   :  { %391 = vmatmul.mubr.f32.gmra.mrb[16].mxu1 %v390_v62  ;;  %1010 = vmatmul.mubr.f32.gmra.mrb[12].mxu0 %v7140_v0  ;;  %v414_v62 = vand.u32 4294901760, %v413_v21  ;;  %v10817_v0 = vand.u32 4294901760, %v7325_v44  ;;  %10818 = vst [vmem:[#allocation108_spill] sm:$0xff] %v7392_v49  ;;  %v10820_v21 = vld [vmem:[#allocation31_spill] sm:$0xff] }
  0x66   :  { %5787 = vmatpush1.bf16.msra.mxu0 %v10816_v59  ;;  %400 = vmatprep.mubr.f32.mxu1 %v399_v51  ;;  %v420_v59 = vand.u32 4294901760, %v419_v60  ;;  %v7399_v51 = vand.u32 4294901760, %v62_v58  ;;  %v65_v60 = vld [vmem:[%s10152_s0 + $0x168] sm:$0xff] }
  0x67   :  { %v428_v38 = vsub.f32 %v7325_v44, %v10817_v0  ;;  %1015 = vmatprep.mubr.f32.mxu0 %v7146_v6  ;;  %5788 = vmatprep.subr.bf16.mxu0 %v10702_v55  ;;  %v10821_v0 = vand.u32 4294901760, %v7344_v42  ;;  %v10822_v6 = vand.u32 4294901760, %v7347_v15 }
  0x68   :  { %10819 = vst [vmem:[#allocation109_spill] sm:$0xff] %v7399_v51  ;;  %6172 = vmatpush1.bf16.msra.mxu1 %v10820_v21  ;;  %v7431_v7 = vsub.f32 %v62_v58, %v7399_v51  ;;  %v10828_v58 = vand.u32 4294901760, %v7390_v14 }
  0x69   :  { %406 = vmatmul.mubr.f32.gmra.mrb[18].mxu1 %v405_v23  ;;  %1017 = vmatmul.mubr.f32.gmra.mrb[14].mxu0 %v7180_v24  ;;  %v434_v5 = vsub.f32 %v7344_v42, %v10821_v0  ;;  %v443_v19 = vsub.f32 %v7347_v15, %v10822_v6  ;;  %v10823_v23 = vpack.c.bf16 %v6675_v40, %v6673_v39  ;;  %v429_v21 = vand.u32 4294901760, %v428_v38 }
  0x6a   :  { %415 = vmatprep.mubr.f32.mxu1 %v414_v62  ;;  %v7421_v24 = vsub.f32 %v63_v29, %v7392_v49  ;;  %v7423_v6 = vand.u32 4294901760, %v66_v25  ;;  %1022 = vmatprep.mubr.f32.mxu0 %v7189_v63  ;;  %v7433_v62 = vand.u32 4294901760, %v65_v60  ;;  %v10327_v63 = vand.u32 4294901760, %v7411_v2 }
  0x6b   :  { %5790 = vmatpush1.bf16.msra.mxu0 %v10823_v23  ;;  %6157 = vmatprep.subr.bf16.mxu1 %v10702_v55  ;;  %v435_v29 = vand.u32 4294901760, %v434_v5  ;;  %v444_v38 = vand.u32 4294901760, %v443_v19  ;;  %v10826_v23 = vand.u32 4294901760, %v7376_v20  ;;  %v10827_v40 = vpack.c.bf16 %v6712_v32, %v6710_v11 }
  0x6c   :  { %10824 = vst [vmem:[#allocation31_spill] sm:$0xff] %v7423_v6  ;;  %5791 = vmatprep.subr.bf16.mxu0 %v10702_v55  ;;  %10825 = vst [vmem:[#allocation110_spill] sm:$0xff] %v7433_v62  ;;  %v458_v39 = vsub.f32 %v7390_v14, %v10828_v58  ;;  %v7449_v5 = vsub.f32 %v66_v25, %v7423_v6  ;;  %v7451_v19 = vand.u32 4294901760, %v69_v61  ;;  %v10832_v25 = vld [vmem:[#allocation36_spill] sm:$0xff] }
  0x6d   :  { %421 = vmatmul.mubr.f32.gmra.mrb[20].mxu1 %v420_v59  ;;  %1024 = vmatmul.mubr.f32.gmra.mrb[16].mxu0 %v7211_v16  ;;  %v449_v0 = vsub.f32 %v7376_v20, %v10826_v23  ;;  %v68_v23 = vld [vmem:[%s10152_s0 + $0x180] sm:$0xff]  ;;  %v7463_v58 = vsub.f32 %v65_v60, %v7433_v62  ;;  %v464_v16 = vsub.f32 %v7411_v2, %v10327_v63  ;;  %v71_v63 = vld [vmem:[%s10152_s0 + $0x198] sm:$0xff] }
  0x6e   :  { %430 = vmatprep.mubr.f32.mxu1 %v429_v21  ;;  %10829 = vst [vmem:[#allocation111_spill] sm:$0xff] %v7449_v5  ;;  %10830 = vst [vmem:[#allocation112_spill] sm:$0xff] %v7451_v19  ;;  %1029 = vmatprep.mubr.f32.mxu0 %v7227_v13  ;;  %v7470_v32 = vand.u32 4294901760, %v68_v23  ;;  %v10835_v21 = vpack.c.bf16 %v6754_v4, %v6735_v53  ;;  %v459_v60 = vand.u32 4294901760, %v458_v39  ;;  %v75_v39 = vld [vmem:[%s10152_s0 + $0x1b8] sm:$0xff]  ;;  %v7504_v4 = vand.u32 4294901760, %v71_v63 }
  0x6f   :  { %5793 = vmatpush1.bf16.msra.mxu0 %v10827_v40  ;;  %v72_v40 = vld [vmem:[%s10152_s0 + $0x1a0] sm:$0xff]  ;;  %10831 = vst [vmem:[#allocation113_spill] sm:$0xff] %v7463_v58  ;;  %6173 = vmatpush1.bf16.msra.mxu1 %v10832_v25  ;;  %v450_v59 = vand.u32 4294901760, %v449_v0  ;;  %v10836_v25 = vand.u32 4294901760, %v7421_v24  ;;  %v10842_v53 = vpack.c.bf16 %v6768_v8, %v6763_v33 }
  0x70   :  { %5794 = vmatprep.subr.bf16.mxu0 %v10702_v55  ;;  %10833 = vst [vmem:[#allocation36_spill] sm:$0xff] %v7470_v32  ;;  %v7472_v13 = vand.u32 4294901760, %v72_v40  ;;  %6158 = vmatprep.subr.bf16.mxu1 %v10702_v55  ;;  %v7499_v0 = vsub.f32 %v68_v23, %v7470_v32  ;;  %10841 = vst [vmem:[#allocation118_spill] sm:$0xff] %v7504_v4  ;;  %v74_v23 = vld [vmem:[%s10152_s0 + $0x1b0] sm:$0xff]  ;;  %v7531_v8 = vsub.f32 %v71_v63, %v7504_v4 }
  0x71   :  { %436 = vmatmul.mubr.f32.gmra.mrb[22].mxu1 %v435_v29  ;;  %1031 = vmatmul.mubr.f32.gmra.mrb[18].mxu0 %v7237_v18  ;;  %v473_v29 = vsub.f32 %v7421_v24, %v10836_v25  ;;  %v7482_v18 = vsub.f32 %v69_v61, %v7451_v19  ;;  %v465_v61 = vand.u32 4294901760, %v464_v16  ;;  %v10843_v25 = vand.u32 4294901760, %v7449_v5 }
  0x72   :  { %10834 = vst [vmem:[#allocation114_spill] sm:$0xff] %v7472_v13  ;;  %445 = vmatprep.mubr.f32.mxu1 %v444_v38  ;;  %1036 = vmatprep.mubr.f32.mxu0 %v7260_v3  ;;  %v10838_v38 = vand.u32 4294901760, %v7431_v7  ;;  %10839 = vst [vmem:[#allocation116_spill] sm:$0xff] %v7499_v0  ;;  %v7502_v3 = vsub.f32 %v72_v40, %v7472_v13  ;;  %v7533_v33 = vand.u32 4294901760, %v74_v23 }
  0x73   :  { %5796 = vmatpush1.bf16.msra.mxu0 %v10835_v21  ;;  %10837 = vst [vmem:[#allocation115_spill] sm:$0xff] %v7482_v18 }
  0x74   :  { %5797 = vmatprep.subr.bf16.mxu0 %v10702_v55  ;;  %v479_v21 = vsub.f32 %v7431_v7, %v10838_v38  ;;  %10840 = vst [vmem:[#allocation117_spill] sm:$0xff] %v7502_v3  ;;  %v474_v38 = vand.u32 4294901760, %v473_v29  ;;  %10848 = vst [vmem:[#allocation120_spill] sm:$0xff] %v7533_v33 }
  0x75   :  { %451 = vmatmul.mubr.f32.gmra.mrb[24].mxu1 %v450_v59  ;;  %1038 = vmatmul.mubr.f32.gmra.mrb[20].mxu0 %v7272_v27  ;;  %v488_v59 = vsub.f32 %v7449_v5, %v10843_v25  ;;  %v7513_v27 = vand.u32 4294901760, %v75_v39  ;;  %v10846_v25 = vld [vmem:[#allocation39_spill] sm:$0xff] }
  0x76   :  { %460 = vmatprep.mubr.f32.mxu1 %v459_v60  ;;  %1043 = vmatprep.mubr.f32.mxu0 %v7292_v22  ;;  %v480_v40 = vand.u32 4294901760, %v479_v21  ;;  %v10845_v60 = vand.u32 4294901760, %v7463_v58  ;;  %10847 = vst [vmem:[#allocation39_spill] sm:$0xff] %v7531_v8  ;;  %v77_v21 = vld [vmem:[%s10152_s0 + $0x1c8] sm:$0xff] }
  0x77   :  { %5799 = vmatpush1.bf16.msra.mxu0 %v10842_v53  ;;  %10844 = vst [vmem:[#allocation119_spill] sm:$0xff] %v7513_v27  ;;  %v78_v53 = vld [vmem:[%s10152_s0 + $0x1d0] sm:$0xff]  ;;  %6174 = vmatpush1.bf16.msra.mxu1 %v10846_v25  ;;  %v10850_v25 = vand.u32 4294901760, %v7482_v18  ;;  %v7545_v22 = vsub.f32 %v75_v39, %v7513_v27  ;;  %v10854_v39 = vand.u32 4294901760, %v7499_v0 }
  0x78   :  { %5800 = vmatprep.subr.bf16.mxu0 %v10702_v55  ;;  %v494_v29 = vsub.f32 %v7463_v58, %v10845_v60  ;;  %v10849_v60 = vpack.c.bf16 %v10786_v26, %v6797_v10  ;;  %v7547_v63 = vand.u32 4294901760, %v78_v53  ;;  %6159 = vmatprep.subr.bf16.mxu1 %v10702_v55  ;;  %v7566_v10 = vsub.f32 %v74_v23, %v7533_v33  ;;  %v84_v23 = vld [vmem:[%s10152_s0 + $0x200] sm:$0xff] }
  0x79   :  { %466 = vmatmul.mubr.f32.gmra.mrb[26].mxu1 %v465_v61  ;;  %1045 = vmatmul.mubr.f32.gmra.mrb[22].mxu0 %v7313_v35  ;;  %v489_v61 = vand.u32 4294901760, %v488_v59  ;;  %v503_v16 = vsub.f32 %v7482_v18, %v10850_v25  ;;  %10851 = vst [vmem:[#allocation121_spill] sm:$0xff] %v7545_v22  ;;  %v81_v35 = vld [vmem:[%s10152_s0 + $0x1e8] sm:$0xff]  ;;  %v509_v59 = vsub.f32 %v7499_v0, %v10854_v39  ;;  %v10855_v25 = vand.u32 4294901760, %v7502_v3 }
  0x7a   :  { %475 = vmatprep.mubr.f32.mxu1 %v474_v38  ;;  %10852 = vst [vmem:[#allocation122_spill] sm:$0xff] %v7547_v63  ;;  %1050 = vmatprep.mubr.f32.mxu0 %v7315_v34  ;;  %v7554_v38 = vand.u32 4294901760, %v77_v21  ;;  %10856 = vst [vmem:[#allocation124_spill] sm:$0xff] %v7566_v10  ;;  %v7576_v11 = vsub.f32 %v78_v53, %v7547_v63  ;;  %v10863_v39 = vand.u32 4294901760, %v7531_v8 }
  0x7b   :  { %5802 = vmatpush1.bf16.msra.mxu0 %v10849_v60  ;;  %v495_v60 = vand.u32 4294901760, %v494_v29  ;;  %v518_v34 = vsub.f32 %v7502_v3, %v10855_v25  ;;  %v80_v29 = vld [vmem:[%s10152_s0 + $0x1e0] sm:$0xff]  ;;  %v7578_v25 = vand.u32 4294901760, %v81_v35  ;;  %v510_v53 = vand.u32 4294901760, %v509_v59 }
  0x7c   :  { %5803 = vmatprep.subr.bf16.mxu0 %v10702_v55  ;;  %10853 = vst [vmem:[#allocation123_spill] sm:$0xff] %v7554_v38  ;;  %10858 = vst [vmem:[#allocation125_spill] sm:$0xff] %v7576_v11  ;;  %v7586_v26 = vsub.f32 %v77_v21, %v7554_v38  ;;  %v10865_v21 = vand.u32 4294901760, %v7545_v22 }
  0x7d   :  { %481 = vmatmul.mubr.f32.gmra.mrb[28].mxu1 %v480_v40  ;;  %1052 = vmatmul.mubr.f32.gmra.mrb[24].mxu0 %v7349_v9  ;;  %v10857_v40 = vpack.c.bf16 %v10793_v31, %v10792_v17  ;;  %v504_v9 = vand.u32 4294901760, %v503_v16  ;;  %10859 = vst [vmem:[#allocation126_spill] sm:$0xff] %v7578_v25  ;;  %v10862_v16 = vld [vmem:[#allocation43_spill] sm:$0xff]  ;;  %v10358_v31 = vand.u32 4294901760, %v7566_v10  ;;  %v10864_v17 = vpack.c.bf16 %v10797_v43, %v6864_v28 }
  0x7e   :  { %490 = vmatprep.mubr.f32.mxu1 %v489_v61  ;;  %1057 = vmatprep.mubr.f32.mxu0 %v7358_v50  ;;  %10860 = vst [vmem:[#allocation127_spill] sm:$0xff] %v7586_v26  ;;  %v7588_v61 = vand.u32 4294901760, %v80_v29  ;;  %v524_v50 = vsub.f32 %v7531_v8, %v10863_v39  ;;  %v7604_v59 = vsub.f32 %v81_v35, %v7578_v25  ;;  %v83_v39 = vld [vmem:[%s10152_s0 + $0x1f8] sm:$0xff]  ;;  %v10872_v43 = vand.u32 4294901760, %v7576_v11  ;;  %v93_v28 = vld [vmem:[%s10152_s0 + $0x248] sm:$0xff] }
  0x7f   :  { %5805 = vmatpush1.bf16.msra.mxu0 %v10857_v40  ;;  %6175 = vmatpush1.bf16.msra.mxu1 %v10862_v16  ;;  %v519_v40 = vand.u32 4294901760, %v518_v34  ;;  %v533_v16 = vsub.f32 %v7545_v22, %v10865_v21  ;;  %v7606_v34 = vand.u32 4294901760, %v84_v23 }
  0x80   :  { %5806 = vmatprep.subr.bf16.mxu0 %v10702_v55  ;;  %10861 = vst [vmem:[#allocation128_spill] sm:$0xff] %v7588_v61  ;;  %10866 = vst [vmem:[#allocation43_spill] sm:$0xff] %v7604_v59  ;;  %v7618_v21 = vsub.f32 %v80_v29, %v7588_v61  ;;  %6160 = vmatprep.subr.bf16.mxu1 %v10702_v55  ;;  %v525_v35 = vand.u32 4294901760, %v524_v50 }
  0x81   :  { %496 = vmatmul.mubr.f32.gmra.mrb[30].mxu1 %v495_v60  ;;  %1059 = vmatmul.mubr.f32.gmra.mrb[26].mxu0 %v7378_v1  ;;  %10867 = vst [vmem:[#allocation129_spill] sm:$0xff] %v7606_v34  ;;  %v539_v60 = vsub.f32 %v7566_v10, %v10358_v31  ;;  %v7625_v1 = vand.u32 4294901760, %v83_v39  ;;  %v534_v29 = vand.u32 4294901760, %v533_v16  ;;  %v86_v31 = vld [vmem:[%s10152_s0 + $0x210] sm:$0xff]  ;;  %v10874_v16 = vand.u32 4294901760, %v7586_v26 }
  0x82   :  { %505 = vmatprep.mubr.f32.mxu1 %v504_v9  ;;  %1064 = vmatprep.mubr.f32.mxu0 %v7392_v49  ;;  %10868 = vst [vmem:[#allocation130_spill] sm:$0xff] %v7618_v21  ;;  %v10871_v9 = vpack.c.bf16 %v6922_v41, %v6917_v12  ;;  %v7659_v12 = vand.u32 4294901760, %v86_v31 }
  0x83   :  { %5808 = vmatpush1.bf16.msra.mxu0 %v10864_v17  ;;  %v87_v17 = vld [vmem:[%s10152_s0 + $0x218] sm:$0xff]  ;;  %10869 = vst [vmem:[#allocation131_spill] sm:$0xff] %v7625_v1  ;;  %v540_v50 = vand.u32 4294901760, %v539_v60  ;;  %v10880_v60 = vand.u32 4294901760, %v7604_v59 }
  0x84   :  { %5809 = vmatprep.subr.bf16.mxu0 %v10702_v55  ;;  %v7627_v49 = vand.u32 4294901760, %v87_v17  ;;  %10878 = vst [vmem:[#allocation135_spill] sm:$0xff] %v7659_v12 }
  0x85   :  { %511 = vmatmul.mubr.f32.gmra.mrb[32].mxu1 %v510_v53  ;;  %1066 = vmatmul.mubr.f32.gmra.mrb[28].mxu0 %v7399_v51  ;;  %v548_v53 = vsub.f32 %v7576_v11, %v10872_v43  ;;  %v7637_v51 = vsub.f32 %v84_v23, %v7606_v34  ;;  %v554_v43 = vsub.f32 %v7586_v26, %v10874_v16  ;;  %v10875_v23 = vld [vmem:[#allocation49_spill] sm:$0xff]  ;;  %v89_v16 = vld [vmem:[%s10152_s0 + $0x228] sm:$0xff] }
  0x86   :  { %10870 = vst [vmem:[#allocation132_spill] sm:$0xff] %v7627_v49  ;;  %520 = vmatprep.mubr.f32.mxu1 %v519_v40  ;;  %1071 = vmatprep.mubr.f32.mxu0 %v7423_v6  ;;  %v90_v40 = vld [vmem:[%s10152_s0 + $0x230] sm:$0xff]  ;;  %v7654_v6 = vsub.f32 %v83_v39, %v7625_v1  ;;  %v7657_v41 = vsub.f32 %v87_v17, %v7627_v49 }
  0x87   :  { %5811 = vmatpush1.bf16.msra.mxu0 %v10871_v9  ;;  %10873 = vst [vmem:[#allocation133_spill] sm:$0xff] %v7637_v51  ;;  %6176 = vmatpush1.bf16.msra.mxu1 %v10875_v23  ;;  %v10879_v9 = vpack.c.bf16 %v10809_v54, %v10808_v46  ;;  %v563_v39 = vsub.f32 %v7604_v59, %v10880_v60  ;;  %v7671_v17 = vand.u32 4294901760, %v90_v40  ;;  %v555_v54 = vand.u32 4294901760, %v554_v43  ;;  %v92_v43 = vld [vmem:[%s10152_s0 + $0x240] sm:$0xff]  ;;  %v10891_v46 = vld [vmem:[#allocation65_spill] sm:$0xff] }
  0x88   :  { %5812 = vmatprep.subr.bf16.mxu0 %v10702_v55  ;;  %10876 = vst [vmem:[#allocation49_spill] sm:$0xff] %v7654_v6  ;;  %10877 = vst [vmem:[#allocation134_spill] sm:$0xff] %v7657_v41  ;;  %6161 = vmatprep.subr.bf16.mxu1 %v10702_v55  ;;  %v10887_v59 = vld [vmem:[#allocation2_spill] sm:$0xff]  ;;  %v7700_v23 = vand.u32 4294901760, %v93_v28 }
  0x89   :  { %526 = vmatmul.mubr.f32.gmra.mrb[34].mxu1 %v525_v35  ;;  %1073 = vmatmul.mubr.f32.gmra.mrb[30].mxu0 %v7433_v62  ;;  %v549_v35 = vand.u32 4294901760, %v548_v53  ;;  %10881 = vst [vmem:[#allocation136_spill] sm:$0xff] %v7671_v17  ;;  %v10882_v62 = vld [vmem:[#allocation50_spill] sm:$0xff]  ;;  %v10885_v53 = vand.u32 4294901760, %v7618_v21 }
  0x8a   :  { %535 = vmatprep.mubr.f32.mxu1 %v534_v29  ;;  %1320 = vmatprep.mubr.f32.mxu0 %v10882_v62  ;;  %v10884_v29 = vld [vmem:[#allocation59_spill] sm:$0xff]  ;;  %v7688_v62 = vsub.f32 %v86_v31, %v7659_v12  ;;  %10890 = vst [vmem:[#allocation140_spill] sm:$0xff] %v7700_v23  ;;  %v96_v31 = vld [vmem:[%s10152_s0 + $0x260] sm:$0xff] }
  0x8b   :  { %5814 = vmatpush1.bf16.msra.mxu0 %v10879_v9  ;;  %v7678_v9 = vand.u32 4294901760, %v89_v16  ;;  %v569_v60 = vsub.f32 %v7618_v21, %v10885_v53  ;;  %v7698_v53 = vsub.f32 %v90_v40, %v7671_v17  ;;  %v10895_v40 = vld [vmem:[#allocation66_spill] sm:$0xff]  ;;  %v10897_v17 = vand.u32 4294901760, %v7657_v41 }
  0x8c   :  { %5815 = vmatprep.subr.bf16.mxu0 %v10702_v55  ;;  %10886 = vst [vmem:[#allocation138_spill] sm:$0xff] %v7688_v62 }
  0x8d   :  { %10883 = vst [vmem:[#allocation137_spill] sm:$0xff] %v7678_v9  ;;  %541 = vmatmul.mubr.f32.gmra.mrb[36].mxu1 %v540_v50  ;;  %v564_v50 = vand.u32 4294901760, %v563_v39  ;;  %10889 = vst [vmem:[#allocation139_spill] sm:$0xff] %v7698_v53  ;;  %v7710_v39 = vand.u32 4294901760, %v92_v43  ;;  %v593_v21 = vsub.f32 %v7657_v41, %v10897_v17  ;;  %v99_v17 = vld [vmem:[%s10152_s0 + $0x278] sm:$0xff] }
  0x8e   :  { %1323 = vmatmul.mubr.f32.vlgmr.msra.gmra.mrb[0].mxu0 %v10884_v29  ;;  %550 = vmatprep.mubr.f32.mxu1 %v549_v35  ;;  %v10888_v29 = vand.u32 4294901760, %v7637_v51  ;;  %v7708_v35 = vsub.f32 %v89_v16, %v7678_v9  ;;  %v10898_v16 = vld [vmem:[#allocation67_spill] sm:$0xff] }
  0x8f   :  { %5817 = vmatpush1.bf16.msra.mxu0 %v10887_v59  ;;  %1329 = vmatprep.mubr.f32.mxu0 %v10891_v46  ;;  %10893 = vst [vmem:[#allocation142_spill] sm:$0xff] %v7710_v39  ;;  %v10894_v59 = vld [vmem:[#allocation53_spill] sm:$0xff]  ;;  %v594_v12 = vand.u32 4294901760, %v593_v21  ;;  %v98_v21 = vld [vmem:[%s10152_s0 + $0x270] sm:$0xff] }
  0x90   :  { %v578_v49 = vsub.f32 %v7637_v51, %v10888_v29  ;;  %5818 = vmatprep.subr.bf16.mxu0 %v10702_v55  ;;  %10892 = vst [vmem:[#allocation141_spill] sm:$0xff] %v7708_v35  ;;  %6177 = vmatpush1.bf16.msra.mxu1 %v10894_v59  ;;  %v570_v29 = vand.u32 4294901760, %v569_v60  ;;  %v10896_v51 = vand.u32 4294901760, %v7654_v6  ;;  %v7726_v60 = vand.u32 4294901760, %v96_v31 }
  0x91   :  { %556 = vmatmul.mubr.f32.gmra.mrb[38].mxu1 %v555_v54  ;;  %v7724_v54 = vsub.f32 %v93_v28, %v7700_v23  ;;  %6162 = vmatprep.subr.bf16.mxu1 %v10702_v55  ;;  %v7739_v28 = vsub.f32 %v92_v43, %v7710_v39  ;;  %v10906_v23 = vld [vmem:[#allocation74_spill] sm:$0xff] }
  0x92   :  { %1332 = vmatmul.mubr.f32.gmra.mrb[2].mxu0 %v10895_v40  ;;  %v584_v46 = vsub.f32 %v7654_v6, %v10896_v51  ;;  %565 = vmatprep.mubr.f32.mxu1 %v564_v50  ;;  %v579_v9 = vand.u32 4294901760, %v578_v49  ;;  %10900 = vst [vmem:[#allocation143_spill] sm:$0xff] %v7726_v60  ;;  %v95_v51 = vld [vmem:[%s10152_s0 + $0x258] sm:$0xff]  ;;  %v10901_v40 = vld [vmem:[#allocation6_spill] sm:$0xff]  ;;  %v10903_v50 = vld [vmem:[#allocation63_spill] sm:$0xff]  ;;  %v10907_v49 = vand.u32 4294901760, %v7698_v53 }
  0x93   :  { %1338 = vmatprep.mubr.f32.mxu0 %v10898_v16  ;;  %10899 = vst [vmem:[#allocation53_spill] sm:$0xff] %v7724_v54  ;;  %5820 = vmatpush1.bf16.msra.mxu0 %v10901_v40  ;;  %10902 = vst [vmem:[#allocation144_spill] sm:$0xff] %v7739_v28  ;;  %v10904_v40 = vand.u32 4294901760, %v7688_v62  ;;  %v7746_v41 = vand.u32 4294901760, %v95_v51 }
  0x94   :  { %5821 = vmatprep.subr.bf16.mxu0 %v10702_v55  ;;  %6178 = vmatpush1.bf16.msra.mxu1 %v10903_v50  ;;  %v585_v59 = vand.u32 4294901760, %v584_v46  ;;  %v608_v43 = vsub.f32 %v7698_v53, %v10907_v49  ;;  %v7756_v46 = vand.u32 4294901760, %v99_v17  ;;  %v10911_v49 = vand.u32 4294901760, %v7708_v35 }
  0x95   :  { %571 = vmatmul.mubr.f32.gmra.mrb[40].mxu1 %v570_v29  ;;  %v599_v16 = vsub.f32 %v7688_v62, %v10904_v40  ;;  %10905 = vst [vmem:[#allocation63_spill] sm:$0xff] %v7746_v41  ;;  %v7754_v29 = vsub.f32 %v96_v31, %v7726_v60  ;;  %v10910_v40 = vld [vmem:[#allocation12_spill] sm:$0xff]  ;;  %6163 = vmatprep.subr.bf16.mxu1 %v10702_v55 }
  0x96   :  { %1341 = vmatmul.mubr.f32.gmra.mrb[4].mxu0 %v7047_v57  ;;  %580 = vmatprep.mubr.f32.mxu1 %v579_v9  ;;  %10909 = vst [vmem:[#allocation146_spill] sm:$0xff] %v7756_v46  ;;  %v102_v9 = vld [vmem:[%s10152_s0 + $0x290] sm:$0xff]  ;;  %v614_v50 = vsub.f32 %v7708_v35, %v10911_v49  ;;  %v7774_v53 = vsub.f32 %v95_v51, %v7746_v41  ;;  %v101_v49 = vld [vmem:[%s10152_s0 + $0x288] sm:$0xff]  ;;  %v609_v31 = vand.u32 4294901760, %v608_v43  ;;  %v104_v41 = vld [vmem:[%s10152_s0 + $0x2a0] sm:$0xff] }
  0x97   :  { %1347 = vmatprep.mubr.f32.mxu0 %v10906_v23  ;;  %10908 = vst [vmem:[#allocation145_spill] sm:$0xff] %v7754_v29  ;;  %5823 = vmatpush1.bf16.msra.mxu0 %v10910_v40  ;;  %v10912_v23 = vld [vmem:[#allocation70_spill] sm:$0xff]  ;;  %v600_v57 = vand.u32 4294901760, %v599_v16  ;;  %v7776_v40 = vand.u32 4294901760, %v98_v21  ;;  %v7778_v60 = vand.u32 4294901760, %v102_v9  ;;  %v7789_v51 = vsub.f32 %v99_v17, %v7756_v46  ;;  %v105_v35 = vld [vmem:[%s10152_s0 + $0x2a8] sm:$0xff] }
  0x98   :  { %5824 = vmatprep.subr.bf16.mxu0 %v10702_v55  ;;  %6179 = vmatpush1.bf16.msra.mxu1 %v10912_v23  ;;  %10913 = vst [vmem:[#allocation70_spill] sm:$0xff] %v7774_v53  ;;  %v10916_v23 = vand.u32 4294901760, %v7724_v54  ;;  %v7797_v43 = vand.u32 4294901760, %v101_v49  ;;  %v7803_v17 = vld [vmem:[%s10151_s1 + $0x100] sm:$0xff]  ;;  %v10921_v16 = vld [vmem:[#allocation83_spill] sm:$0xff] }
  0x99   :  { %586 = vmatmul.mubr.f32.gmra.mrb[42].mxu1 %v585_v59  ;;  %10914 = vst [vmem:[#allocation147_spill] sm:$0xff] %v7776_v40  ;;  %10915 = vst [vmem:[#allocation148_spill] sm:$0xff] %v7778_v60  ;;  %6164 = vmatprep.subr.bf16.mxu1 %v10702_v55  ;;  %v7819_v46 = vsub.f32 %v102_v9, %v7778_v60  ;;  %v108_v9 = vld [vmem:[%s10152_s0 + $0x2c0] sm:$0xff] }
  0x9a   :  { %1350 = vmatmul.mubr.f32.gmra.mrb[6].mxu0 %v7082_v37  ;;  %595 = vmatprep.mubr.f32.mxu1 %v594_v12  ;;  %v623_v59 = vsub.f32 %v7724_v54, %v10916_v23  ;;  %10917 = vst [vmem:[#allocation149_spill] sm:$0xff] %v7789_v51  ;;  %v10918_v37 = vld [vmem:[#allocation13_spill] sm:$0xff]  ;;  %v615_v12 = vand.u32 4294901760, %v614_v50  ;;  %10919 = vst [vmem:[#allocation150_spill] sm:$0xff] %v7797_v43  ;;  %v7808_v23 = vld [vmem:[%s10151_s1 + $0x108] sm:$0xff]  ;;  %v10922_v50 = vand.u32 4294901760, %v7739_v28 }
  0x9b   :  { %1356 = vmatprep.mubr.f32.mxu0 %v7094_v52  ;;  %5826 = vmatpush1.bf16.msra.mxu0 %v10918_v37  ;;  %v10920_v52 = vld [vmem:[#allocation72_spill] sm:$0xff]  ;;  %10924 = vst [vmem:[#allocation151_spill] sm:$0xff] %v7819_v46  ;;  %v10930_v54 = vld [vmem:[#allocation79_spill] sm:$0xff] }
  0x9c   :  { %5827 = vmatprep.subr.bf16.mxu0 %v10702_v55  ;;  %6180 = vmatpush1.bf16.msra.mxu1 %v10920_v52  ;;  %v629_v37 = vsub.f32 %v7739_v28, %v10922_v50  ;;  %v7816_v52 = vsub.f32 %v98_v21, %v7776_v40  ;;  %v7829_v28 = vand.u32 4294901760, %v105_v35  ;;  %v10927_v21 = vld [vmem:[#allocation16_spill] sm:$0xff] }
  0x9d   :  { %601 = vmatmul.mubr.f32.gmra.mrb[44].mxu1 %v600_v57  ;;  %v624_v57 = vand.u32 4294901760, %v623_v59  ;;  %6165 = vmatprep.subr.bf16.mxu1 %v10702_v55 }
  0x9e   :  { %1359 = vmatmul.mubr.f32.gmra.mrb[8].mxu0 %v10921_v16  ;;  %10923 = vst [vmem:[#allocation72_spill] sm:$0xff] %v7816_v52  ;;  %610 = vmatprep.mubr.f32.mxu1 %v609_v31  ;;  %v10925_v16 = vand.u32 4294901760, %v7754_v29  ;;  %10926 = vst [vmem:[#allocation152_spill] sm:$0xff] %v7829_v28  ;;  %v10935_v31 = vld [vmem:[#allocation21_spill] sm:$0xff] }
  0x9f   :  { %1365 = vmatprep.mubr.f32.mxu0 %v7125_v48  ;;  %5829 = vmatpush1.bf16.msra.mxu0 %v10927_v21  ;;  %v7839_v48 = vsub.f32 %v101_v49, %v7797_v43  ;;  %v630_v21 = vand.u32 4294901760, %v629_v37  ;;  %v10932_v43 = vand.u32 4294901760, %v7789_v51  ;;  %v7858_v37 = vand.u32 4294901760, %v108_v9 }
  0xa0   :  { %v638_v50 = vsub.f32 %v7754_v29, %v10925_v16  ;;  %v7841_v16 = vand.u32 4294901760, %v104_v41  ;;  %5830 = vmatprep.subr.bf16.mxu0 %v10702_v55  ;;  %6181 = vmatpush1.bf16.msra.mxu1 %v10930_v54  ;;  %v10931_v29 = vand.u32 4294901760, %v7774_v53 }
  0xa1   :  { %10928 = vst [vmem:[#allocation153_spill] sm:$0xff] %v7839_v48  ;;  %616 = vmatmul.mubr.f32.gmra.mrb[46].mxu1 %v615_v12  ;;  %v653_v54 = vsub.f32 %v7789_v51, %v10932_v43  ;;  %v7856_v12 = vsub.f32 %v105_v35, %v7829_v28  ;;  %10934 = vst [vmem:[#allocation155_spill] sm:$0xff] %v7858_v37  ;;  %6166 = vmatprep.subr.bf16.mxu1 %v10702_v55  ;;  %v10937_v43 = vand.u32 4294901760, %v7808_v23 }
  0xa2   :  { %10929 = vst [vmem:[#allocation154_spill] sm:$0xff] %v7841_v16  ;;  %1368 = vmatmul.mubr.f32.gmra.mrb[10].mxu0 %v7138_v45  ;;  %v644_v60 = vsub.f32 %v7774_v53, %v10931_v29  ;;  %625 = vmatprep.mubr.f32.mxu1 %v624_v57  ;;  %v639_v49 = vand.u32 4294901760, %v638_v50  ;;  %v107_v29 = vld [vmem:[%s10152_s0 + $0x2b8] sm:$0xff]  ;;  %v10936_v50 = vand.u32 4294901760, %v7803_v17  ;;  %v10941_v45 = vld [vmem:[#allocation91_spill] sm:$0xff]  ;;  %v10942_v28 = vand.u32 4294901760, %v7816_v52 }
  0xa3   :  { %1374 = vmatprep.mubr.f32.mxu0 %v7154_v36  ;;  %10933 = vst [vmem:[#allocation79_spill] sm:$0xff] %v7856_v12  ;;  %5832 = vmatpush1.bf16.msra.mxu0 %v10935_v31  ;;  %v111_v57 = vld [vmem:[%s10152_s0 + $0x2d8] sm:$0xff]  ;;  %v7876_v36 = vsub.f32 %v104_v41, %v7841_v16  ;;  %v10940_v31 = vld [vmem:[#allocation82_spill] sm:$0xff]  ;;  %v7887_v59 = vand.u32 4294901760, %v107_v29  ;;  %v10945_v41 = vld [vmem:[#allocation92_spill] sm:$0xff]  ;;  %v654_v16 = vand.u32 4294901760, %v653_v54 }
  0xa4   :  { %v7872_v35 = vpack.c.bf16 %v10937_v43, %v10936_v50  ;;  %5833 = vmatprep.subr.bf16.mxu0 %v10702_v55  ;;  %6182 = vmatpush1.bf16.msra.mxu1 %v10940_v31  ;;  %v645_v51 = vand.u32 4294901760, %v644_v60  ;;  %v659_v53 = vsub.f32 %v7816_v52, %v10942_v28  ;;  %v10943_v50 = vand.u32 4294901760, %v7819_v46  ;;  %v110_v28 = vld [vmem:[%s10152_s0 + $0x2d0] sm:$0xff]  ;;  %v10950_v31 = vld [vmem:[#allocation95_spill] sm:$0xff]  ;;  %v10953_v52 = vld [vmem:[#allocation97_spill] sm:$0xff] }
  0xa5   :  { %10939 = vst [vmem:[#allocation157_spill] sm:$0xff] %v7876_v36  ;;  %631 = vmatmul.mubr.f32.gmra.mrb[48].mxu1 %v630_v21  ;;  %10944 = vst [vmem:[#allocation82_spill] sm:$0xff] %v7887_v59  ;;  %v7892_v21 = vsub.f32 %v108_v9, %v7858_v37  ;;  %v7894_v60 = vand.u32 4294901760, %v111_v57  ;;  %v10949_v54 = vand.u32 4294901760, %v7839_v48  ;;  %v7913_v37 = vand.u32 4294901760, %v110_v28 }
  0xa6   :  { %10938 = vst [vmem:[#allocation156_spill] sm:$0xff] %v7872_v35  ;;  %1377 = vmatmul.mubr.f32.gmra.mrb[12].mxu0 %v10941_v45  ;;  %v668_v43 = vsub.f32 %v7819_v46, %v10943_v50  ;;  %640 = vmatprep.mubr.f32.mxu1 %v639_v49  ;;  %v10948_v45 = vld [vmem:[#allocation25_spill] sm:$0xff]  ;;  %v114_v49 = vld [vmem:[%s10152_s0 + $0x2f0] sm:$0xff]  ;;  %v10954_v40 = vand.u32 4294901760, %v7856_v12 }
  0xa7   :  { %1383 = vmatprep.mubr.f32.mxu0 %v10945_v41  ;;  %10946 = vst [vmem:[#allocation158_spill] sm:$0xff] %v7892_v21  ;;  %10947 = vst [vmem:[#allocation159_spill] sm:$0xff] %v7894_v60  ;;  %5835 = vmatpush1.bf16.msra.mxu0 %v10948_v45  ;;  %v674_v50 = vsub.f32 %v7839_v48, %v10949_v54  ;;  %v660_v41 = vand.u32 4294901760, %v659_v53  ;;  %v7911_v45 = vsub.f32 %v107_v29, %v7887_v59  ;;  %v113_v53 = vld [vmem:[%s10152_s0 + $0x2e8] sm:$0xff]  ;;  %v10957_v29 = vld [vmem:[#allocation29_spill] sm:$0xff] }
  0xa8   :  { %5960 = vmatprep.subr.bf16.mxu1 %v7872_v35  ;;  %5836 = vmatprep.subr.bf16.mxu0 %v10702_v55  ;;  %v669_v46 = vand.u32 4294901760, %v668_v43  ;;  %10952 = vst [vmem:[#allocation161_spill] sm:$0xff] %v7913_v37  ;;  %v683_v54 = vsub.f32 %v7856_v12, %v10954_v40  ;;  %v10958_v43 = vld [vmem:[#allocation100_spill] sm:$0xff]  ;;  %v10959_v40 = vand.u32 4294901760, %v7876_v36  ;;  %v7938_v12 = vand.u32 4294901760, %v113_v53 }
  0xa9   :  { %646 = vmatmul.mubr.f32.gmra.mrb[50].mxu1 %v645_v51  ;;  %10951 = vst [vmem:[#allocation160_spill] sm:$0xff] %v7911_v45  ;;  %v7921_v51 = vsub.f32 %v111_v57, %v7894_v60  ;;  %v10434_v57 = vand.u32 4294901760, %v7911_v45  ;;  %v10962_v60 = vld [vmem:[#allocation101_spill] sm:$0xff] }
  0xaa   :  { %1386 = vmatmul.mubr.f32.gmra.mrb[14].mxu0 %v10950_v31  ;;  %655 = vmatprep.mubr.f32.mxu1 %v654_v16  ;;  %v7923_v31 = vand.u32 4294901760, %v114_v49  ;;  %v675_v16 = vand.u32 4294901760, %v674_v50  ;;  %v689_v9 = vsub.f32 %v7876_v36, %v10959_v40  ;;  %10961 = vst [vmem:[#allocation165_spill] sm:$0xff] %v7938_v12  ;;  %v684_v50 = vand.u32 4294901760, %v683_v54  ;;  %v10965_v40 = vld [vmem:[#allocation34_spill] sm:$0xff] }
  0xab   :  { %1392 = vmatprep.mubr.f32.mxu0 %v10953_v52  ;;  %10955 = vst [vmem:[#allocation162_spill] sm:$0xff] %v7921_v51  ;;  %5838 = vmatpush1.bf16.msra.mxu0 %v10957_v29  ;;  %v7936_v52 = vsub.f32 %v110_v28, %v7913_v37  ;;  %v10963_v29 = vand.u32 4294901760, %v7892_v21  ;;  %v704_v28 = vsub.f32 %v7911_v45, %v10434_v57 }
  0xac   :  { %10956 = vst [vmem:[#allocation163_spill] sm:$0xff] %v7923_v31  ;;  %5839 = vmatprep.subr.bf16.mxu0 %v10702_v55  ;;  %v7946_v48 = vsub.f32 %v114_v49, %v7923_v31 }
  0xad   :  { %661 = vmatmul.mubr.f32.gmra.mrb[52].mxu1 %v660_v41  ;;  %10960 = vst [vmem:[#allocation164_spill] sm:$0xff] %v7936_v52  ;;  %v698_v41 = vsub.f32 %v7892_v21, %v10963_v29  ;;  %v10438_v54 = vand.u32 4294901760, %v7936_v52  ;;  %v7956_v29 = vsub.f32 %v113_v53, %v7938_v12  ;;  %v705_v57 = vand.u32 4294901760, %v704_v28 }
  0xae   :  { %1395 = vmatmul.mubr.f32.gmra.mrb[16].mxu0 %v10958_v43  ;;  %670 = vmatprep.mubr.f32.mxu1 %v669_v46  ;;  %v10435_v43 = vand.u32 4294901760, %v7921_v51  ;;  %10964 = vst [vmem:[#allocation101_spill] sm:$0xff] %v7946_v48  ;;  %v690_v46 = vand.u32 4294901760, %v689_v9  ;;  %v10967_v9 = vld [vmem:[#allocation37_spill] sm:$0xff] }
  0xaf   :  { %1401 = vmatprep.mubr.f32.mxu0 %v10962_v60  ;;  %5841 = vmatpush1.bf16.msra.mxu0 %v10965_v40  ;;  %10966 = vst [vmem:[#allocation166_spill] sm:$0xff] %v7956_v29  ;;  %v699_v49 = vand.u32 4294901760, %v698_v41  ;;  %v10436_v40 = vand.u32 4294901760, %v7946_v48  ;;  %v719_v53 = vsub.f32 %v7936_v52, %v10438_v54 }
  0xb0   :  { %5842 = vmatprep.subr.bf16.mxu0 %v10702_v55 }
  0xb1   :  { %676 = vmatmul.mubr.f32.gmra.mrb[54].mxu1 %v675_v16  ;;  %v713_v16 = vsub.f32 %v7921_v51, %v10435_v43  ;;  %v728_v43 = vsub.f32 %v7946_v48, %v10436_v40 }
  0xb2   :  { %1404 = vmatmul.mubr.f32.gmra.mrb[18].mxu0 %v7270_v47  ;;  %685 = vmatprep.mubr.f32.mxu1 %v684_v50  ;;  %v10437_v50 = vand.u32 4294901760, %v7956_v29 }
  0xb3   :  { %1410 = vmatprep.mubr.f32.mxu0 %v7290_v30  ;;  %5844 = vmatpush1.bf16.msra.mxu0 %v10967_v9  ;;  %v714_v41 = vand.u32 4294901760, %v713_v16  ;;  %v10968_v9 = vld [vmem:[#allocation41_spill] sm:$0xff] }
  0xb4   :  { %5845 = vmatprep.subr.bf16.mxu0 %v10702_v55  ;;  %v734_v28 = vsub.f32 %v7956_v29, %v10437_v50  ;;  %v10969_v16 = vld [vmem:[#allocation45_spill] sm:$0xff]  ;;  %v10971_v50 = vld [vmem:[#allocation62_spill] sm:$0xff] }
  0xb5   :  { %691 = vmatmul.mubr.f32.gmra.mrb[56].mxu1 %v690_v46  ;;  %v720_v46 = vand.u32 4294901760, %v719_v53  ;;  %v7992_v53 = vld [vmem:[%s10151_s1 + $0x118] sm:$0xff] }
  0xb6   :  { %1413 = vmatmul.mubr.f32.gmra.mrb[20].mxu0 %v7304_v56  ;;  %700 = vmatprep.mubr.f32.mxu1 %v699_v49  ;;  %v729_v49 = vand.u32 4294901760, %v728_v43  ;;  %v735_v40 = vand.u32 4294901760, %v734_v28  ;;  %v10970_v43 = vld [vmem:[#allocation51_spill] sm:$0xff]  ;;  %v8003_v28 = vld [vmem:[%s10151_s1 + $0x120] sm:$0xff] }
  0xb7   :  { %1419 = vmatprep.mubr.f32.mxu0 %v7325_v44  ;;  %5847 = vmatpush1.bf16.msra.mxu0 %v10968_v9  ;;  %v10448_v54 = vand.u32 4294901760, %v8003_v28 }
  0xb8   :  { %5848 = vmatprep.subr.bf16.mxu0 %v10702_v55 }
  0xb9   :  { %706 = vmatmul.mubr.f32.gmra.mrb[58].mxu1 %v705_v57  ;;  %v7987_v57 = vld [vmem:[%s10151_s1 + $0x110] sm:$0xff] }
  0xba   :  { %1422 = vmatmul.mubr.f32.gmra.mrb[22].mxu0 %v7344_v42  ;;  %715 = vmatprep.mubr.f32.mxu1 %v714_v41  ;;  %v10442_v41 = vand.u32 4294901760, %v7987_v57 }
  0xbb   :  { %1428 = vmatprep.mubr.f32.mxu0 %v7347_v15  ;;  %5850 = vmatpush1.bf16.msra.mxu0 %v10969_v16 }
  0xbc   :  { %5851 = vmatprep.subr.bf16.mxu0 %v10702_v55 }
  0xbd   :  { %721 = vmatmul.mubr.f32.gmra.mrb[60].mxu1 %v720_v46  ;;  %v10441_v46 = vand.u32 4294901760, %v7992_v53 }
  0xbe   :  { %1431 = vmatmul.mubr.f32.gmra.mrb[24].mxu0 %v7376_v20  ;;  %730 = vmatprep.mubr.f32.mxu1 %v729_v49  ;;  %v8008_v49 = vld [vmem:[%s10151_s1 + $0x128] sm:$0xff] }
  0xbf   :  { %1437 = vmatprep.mubr.f32.mxu0 %v7390_v14  ;;  %5853 = vmatpush1.bf16.msra.mxu0 %v10970_v43  ;;  %v10447_v43 = vand.u32 4294901760, %v8008_v49 }
  0xc0   :  { %5854 = vmatprep.subr.bf16.mxu0 %v10702_v55 }
  0xc1   :  { %736 = vmatmul.mubr.f32.gmra.mrb[62].mxu1 %v735_v40  ;;  %v8017_v40 = vpack.c.bf16 %v10441_v46, %v10442_v41  ;;  %v8032_v46 = vld [vmem:[%s10151_s1 + $0x138] sm:$0xff]  ;;  %v10973_v41 = vld [vmem:[#allocation64_spill] sm:$0xff] }
  0xc2   :  { %1440 = vmatmul.mubr.f32.gmra.mrb[26].mxu0 %v7411_v2  ;;  %1078 = vmatprep.mubr.f32.mxu1 %v7451_v19  ;;  %v8027_v19 = vld [vmem:[%s10151_s1 + $0x130] sm:$0xff]  ;;  %v10453_v16 = vand.u32 4294901760, %v8032_v46 }
  0xc3   :  { %1446 = vmatprep.mubr.f32.mxu0 %v7421_v24  ;;  %5856 = vmatpush1.bf16.msra.mxu0 %v10971_v50  ;;  %10972 = vst [vmem:[#allocation167_spill] sm:$0xff] %v8017_v40  ;;  %v10454_v50 = vand.u32 4294901760, %v8027_v19 }
  0xc4   :  { %5857 = vmatprep.subr.bf16.mxu0 %v10702_v55 }
  0xc5   :  { %1080 = vmatmul.mubr.f32.vlgmr.msra.gmra.mrb[32].mxu1 %v7470_v32  ;;  %v8043_v32 = vpack.c.bf16 %v10447_v43, %v10448_v54  ;;  %v8058_v43 = vld [vmem:[%s10151_s1 + $0x148] sm:$0xff] }
  0xc6   :  { %1449 = vmatmul.mubr.f32.gmra.mrb[28].mxu0 %v7431_v7  ;;  %1085 = vmatprep.mubr.f32.mxu1 %v7472_v13  ;;  %v8053_v13 = vld [vmem:[%s10151_s1 + $0x140] sm:$0xff]  ;;  %v10975_v54 = vld [vmem:[#allocation71_spill] sm:$0xff]  ;;  %v10465_v9 = vand.u32 4294901760, %v8058_v43 }
  0xc7   :  { %1455 = vmatprep.mubr.f32.mxu0 %v7449_v5  ;;  %5962 = vmatpush3.bf16.msra.mxu1 %v7872_v35  ;;  %10974 = vst [vmem:[#allocation168_spill] sm:$0xff] %v8043_v32 }
  0xc8   :  { %5859 = vmatpush1.bf16.msra.mxu0 %v10973_v41  ;;  %5964 = vmatprep.subr.bf16.mxu1 %v8017_v40  ;;  %v10466_v41 = vand.u32 4294901760, %v8053_v13 }
  0xc9   :  { %5860 = vmatprep.subr.bf16.mxu0 %v10702_v55  ;;  %1087 = vmatmul.mubr.f32.gmra.mrb[34].mxu1 %v7504_v4  ;;  %v8069_v4 = vpack.c.bf16 %v10453_v16, %v10454_v50  ;;  %v8084_v16 = vld [vmem:[%s10151_s1 + $0x158] sm:$0xff]  ;;  %v10980_v50 = vand.u32 4294901760, %v7808_v23 }
  0xca   :  { %1458 = vmatmul.mubr.f32.gmra.mrb[30].mxu0 %v7463_v58  ;;  %1092 = vmatprep.mubr.f32.mxu1 %v7513_v27  ;;  %v8076_v27 = vld [vmem:[%s10151_s1 + $0x150] sm:$0xff] }
  0xcb   :  { %1464 = vmatprep.mubr.f32.mxu0 %v7482_v18  ;;  %5966 = vmatpush3.bf16.msra.mxu1 %v8017_v40  ;;  %10976 = vst [vmem:[#allocation169_spill] sm:$0xff] %v8069_v4  ;;  %v10978_v40 = vand.u32 4294901760, %v7803_v17  ;;  %v8111_v35 = vsub.f32 %v7808_v23, %v10980_v50  ;;  %v10982_v23 = vand.u32 4294901760, %v8076_v27  ;;  %v11046_v18 = vld [vmem:[#allocation151_spill] sm:$0xff] }
  0xcc   :  { %5862 = vmatpush1.bf16.msra.mxu0 %v10975_v54  ;;  %5968 = vmatprep.subr.bf16.mxu1 %v8043_v32  ;;  %v10471_v54 = vand.u32 4294901760, %v8084_v16 }
  0xcd   :  { %5863 = vmatprep.subr.bf16.mxu0 %v10702_v55  ;;  %1094 = vmatmul.mubr.f32.gmra.mrb[36].mxu1 %v7533_v33  ;;  %v8095_v33 = vpack.c.bf16 %v10465_v9, %v10466_v41  ;;  %10981 = vst [vmem:[#allocation172_spill] sm:$0xff] %v8111_v35  ;;  %v8118_v9 = vld [vmem:[%s10151_s1 + $0x168] sm:$0xff]  ;;  %v8135_v41 = vld [vmem:[%s10151_s1 + $0x170] sm:$0xff] }
  0xce   :  { %1467 = vmatmul.mubr.f32.gmra.mrb[32].mxu0 %v7499_v0  ;;  %1099 = vmatprep.mubr.f32.mxu1 %v7547_v63  ;;  %v8101_v63 = vld [vmem:[%s10151_s1 + $0x160] sm:$0xff]  ;;  %v8129_v50 = vpack.c.bf16 %v10471_v54, %v10982_v23  ;;  %v8144_v23 = vld [vmem:[%s10151_s1 + $0x178] sm:$0xff] }
  0xcf   :  { %1473 = vmatprep.mubr.f32.mxu0 %v7502_v3  ;;  %5970 = vmatpush3.bf16.msra.mxu1 %v8043_v32  ;;  %10977 = vst [vmem:[#allocation170_spill] sm:$0xff] %v8095_v33  ;;  %v8106_v32 = vsub.f32 %v7803_v17, %v10978_v40  ;;  %v10483_v17 = vand.u32 4294901760, %v8101_v63  ;;  %v10482_v40 = vand.u32 4294901760, %v8118_v9  ;;  %v11041_v3 = vand.u32 4294901760, %v8076_v27 }
  0xd0   :  { %5972 = vmatprep.subr.bf16.mxu1 %v8069_v4  ;;  %10983 = vst [vmem:[#allocation173_spill] sm:$0xff] %v8129_v50 }
  0xd1   :  { %10979 = vst [vmem:[#allocation171_spill] sm:$0xff] %v8106_v32  ;;  %1101 = vmatmul.mubr.f32.gmra.mrb[38].mxu1 %v7554_v38  ;;  %v8148_v54 = vpack.c.bf16 %v8111_v35, %v8106_v32  ;;  %v10987_v38 = vld [vmem:[#allocation132_spill] sm:$0xff] }
  0xd2   :  { %1476 = vmatmul.mubr.f32.gmra.mrb[34].mxu0 %v7531_v8  ;;  %1106 = vmatprep.mubr.f32.mxu1 %v7578_v25  ;;  %v8159_v25 = vpack.c.bf16 %v10482_v40, %v10483_v17  ;;  %v10989_v40 = vand.u32 4294901760, %v7987_v57 }
  0xd3   :  { %1482 = vmatprep.mubr.f32.mxu0 %v7545_v22  ;;  %5974 = vmatpush3.bf16.msra.mxu1 %v8069_v4  ;;  %v10985_v4 = vand.u32 4294901760, %v8106_v32  ;;  %v11031_v22 = vld [vmem:[#allocation152_spill] sm:$0xff] }
  0xd4   :  { %5976 = vmatprep.subr.bf16.mxu1 %v8095_v33  ;;  %10984 = vst [vmem:[#allocation174_spill] sm:$0xff] %v8159_v25  ;;  %v8176_v17 = vsub.f32 %v7987_v57, %v10989_v40  ;;  %v11000_v40 = vld [vmem:[#allocation133_spill] sm:$0xff] }
  0xd5   :  { %1108 = vmatmul.mubr.f32.gmra.mrb[40].mxu1 %v7588_v61 }
  0xd6   :  { %1485 = vmatmul.mubr.f32.gmra.mrb[36].mxu0 %v7566_v10  ;;  %1113 = vmatprep.mubr.f32.mxu1 %v7606_v34  ;;  %v3167_v34 = vsub.f32 %v8106_v32, %v10985_v4  ;;  %v10988_v10 = vld [vmem:[#allocation43_spill] sm:$0xff]  ;;  %10990 = vst [vmem:[#allocation175_spill] sm:$0xff] %v8176_v17  ;;  %v10991_v4 = vand.u32 4294901760, %v7992_v53 }
  0xd7   :  { %1491 = vmatprep.mubr.f32.mxu0 %v7576_v11  ;;  %5978 = vmatpush3.bf16.msra.mxu1 %v8095_v33  ;;  %v10986_v11 = vand.u32 4294901760, %v8111_v35 }
  0xd8   :  { %5980 = vmatprep.subr.bf16.mxu1 %v8129_v50  ;;  %v8181_v61 = vsub.f32 %v7992_v53, %v10991_v4  ;;  %v10999_v53 = vld [vmem:[#allocation136_spill] sm:$0xff]  ;;  %v11003_v4 = vld [vmem:[#allocation134_spill] sm:$0xff] }
  0xd9   :  { %v3174_v33 = vsub.f32 %v8111_v35, %v10986_v11  ;;  %1115 = vmatmul.mubr.f32.gmra.mrb[42].mxu1 %v7625_v1  ;;  %v10993_v11 = vand.u32 4294901760, %v8135_v41  ;;  %v3168_v35 = vand.u32 4294901760, %v3167_v34  ;;  %v11001_v34 = vld [vmem:[#allocation137_spill] sm:$0xff] }
  0xda   :  { %1494 = vmatmul.mubr.f32.gmra.mrb[38].mxu0 %v7586_v26  ;;  %1120 = vmatprep.mubr.f32.mxu1 %v10987_v38  ;;  %10992 = vst [vmem:[#allocation176_spill] sm:$0xff] %v8181_v61  ;;  %v10994_v38 = vand.u32 4294901760, %v8144_v23  ;;  %v8194_v57 = vpack.c.bf16 %v8181_v61, %v8176_v17 }
  0xdb   :  { %1500 = vmatprep.mubr.f32.mxu0 %v10988_v10  ;;  %5982 = vmatpush3.bf16.msra.mxu1 %v8129_v50  ;;  %v3175_v32 = vand.u32 4294901760, %v3174_v33  ;;  %v10996_v50 = vld [vmem:[#allocation135_spill] sm:$0xff]  ;;  %v10997_v10 = vld [vmem:[#allocation130_spill] sm:$0xff]  ;;  %v11002_v33 = vld [vmem:[#allocation140_spill] sm:$0xff] }
  0xdc   :  { %5984 = vmatprep.subr.bf16.mxu1 %v8159_v25  ;;  %v8188_v1 = vpack.c.bf16 %v10994_v38, %v10993_v11  ;;  %10998 = vst [vmem:[#allocation178_spill] sm:$0xff] %v8194_v57  ;;  %v11004_v11 = vand.u32 4294901760, %v8003_v28  ;;  %v49_v57 = vld [vmem:[%s10152_s0 + $0xe8] sm:$0xff] }
  0xdd   :  { %1122 = vmatmul.mubr.f32.gmra.mrb[44].mxu1 %v10996_v50  ;;  %v8200_v38 = vpack.c.bf16 %v3175_v32, %v3168_v35  ;;  %v11006_v50 = vand.u32 4294901760, %v8008_v49 }
  0xde   :  { %10995 = vst [vmem:[#allocation177_spill] sm:$0xff] %v8188_v1  ;;  %1503 = vmatmul.mubr.f32.gmra.mrb[40].mxu0 %v10997_v10  ;;  %1127 = vmatprep.mubr.f32.mxu1 %v10999_v53  ;;  %v8210_v53 = vsub.f32 %v8003_v28, %v11004_v11  ;;  %v11011_v28 = vld [vmem:[#allocation63_spill] sm:$0xff]  ;;  %v11012_v11 = vld [vmem:[#allocation141_spill] sm:$0xff]  ;;  %v11029_v10 = vand.u32 4294901760, %v8058_v43 }
  0xdf   :  { %1509 = vmatprep.mubr.f32.mxu0 %v11000_v40  ;;  %5986 = vmatpush3.bf16.msra.mxu1 %v8159_v25  ;;  %v8215_v32 = vsub.f32 %v8008_v49, %v11006_v50  ;;  %v11013_v49 = vld [vmem:[#allocation146_spill] sm:$0xff]  ;;  %v11014_v50 = vld [vmem:[#allocation53_spill] sm:$0xff] }
  0xe0   :  { %5988 = vmatprep.subr.bf16.mxu1 %v8188_v1  ;;  %11005 = vst [vmem:[#allocation179_spill] sm:$0xff] %v8210_v53  ;;  %v8279_v26 = vsub.f32 %v8058_v43, %v11029_v10 }
  0xe1   :  { %1129 = vmatmul.mubr.f32.gmra.mrb[46].mxu1 %v11001_v34  ;;  %11007 = vst [vmem:[#allocation180_spill] sm:$0xff] %v8215_v32  ;;  %v8222_v35 = vpack.c.bf16 %v8215_v32, %v8210_v53  ;;  %v11010_v34 = vld [vmem:[#allocation139_spill] sm:$0xff] }
  0xe2   :  { %1512 = vmatmul.mubr.f32.gmra.mrb[42].mxu0 %v7654_v6  ;;  %1134 = vmatprep.mubr.f32.mxu1 %v11002_v33  ;;  %v11009_v33 = vld [vmem:[#allocation143_spill] sm:$0xff]  ;;  %11030 = vst [vmem:[#allocation187_spill] sm:$0xff] %v8279_v26 }
  0xe3   :  { %1518 = vmatprep.mubr.f32.mxu0 %v11003_v4  ;;  %5990 = vmatpush3.bf16.msra.mxu1 %v8188_v1  ;;  %11008 = vst [vmem:[#allocation181_spill] sm:$0xff] %v8222_v35  ;;  %v11015_v1 = vand.u32 4294901760, %v8027_v19  ;;  %v11025_v4 = vld [vmem:[#allocation70_spill] sm:$0xff]  ;;  %v11045_v35 = vld [vmem:[#allocation155_spill] sm:$0xff] }
  0xe4   :  { %5992 = vmatprep.subr.bf16.mxu1 %v8200_v38 }
  0xe5   :  { %1136 = vmatmul.mubr.f32.gmra.mrb[48].mxu1 %v7710_v39  ;;  %v22_v39 = vld [vmem:[%s10152_s0 + $0x10] sm:$0xff]  ;;  %v8236_v25 = vsub.f32 %v8027_v19, %v11015_v1  ;;  %v11023_v1 = vld [vmem:[#allocation145_spill] sm:$0xff] }
  0xe6   :  { %1521 = vmatmul.mubr.f32.gmra.mrb[44].mxu0 %v7688_v62  ;;  %1141 = vmatprep.mubr.f32.mxu1 %v11009_v33  ;;  %v11017_v33 = vand.u32 4294901760, %v8032_v46  ;;  %v11022_v62 = vld [vmem:[#allocation148_spill] sm:$0xff]  ;;  %v8254_v19 = vand.u32 4294901760, %v22_v39 }
  0xe7   :  { %1527 = vmatprep.mubr.f32.mxu0 %v11010_v34  ;;  %11016 = vst [vmem:[#allocation182_spill] sm:$0xff] %v8236_v25 }
  0xe8   :  { %v8241_v34 = vsub.f32 %v8032_v46, %v11017_v33  ;;  %v28_v46 = vld [vmem:[%s10152_s0 + $0x40] sm:$0xff]  ;;  %v31_v33 = vld [vmem:[%s10152_s0 + $0x58] sm:$0xff] }
  0xe9   :  { %1143 = vmatmul.mubr.f32.gmra.mrb[50].mxu1 %v11011_v28  ;;  %v11019_v28 = vld [vmem:[#allocation147_spill] sm:$0xff]  ;;  %v8266_v6 = vand.u32 4294901760, %v28_v46  ;;  %v8286_v8 = vand.u32 4294901760, %v31_v33 }
  0xea   :  { %1530 = vmatmul.mubr.f32.gmra.mrb[46].mxu0 %v11012_v11  ;;  %1148 = vmatprep.mubr.f32.mxu1 %v11013_v49  ;;  %11018 = vst [vmem:[#allocation183_spill] sm:$0xff] %v8241_v34  ;;  %v11020_v11 = vld [vmem:[#allocation144_spill] sm:$0xff]  ;;  %v25_v49 = vld [vmem:[%s10152_s0 + $0x28] sm:$0xff] }
  0xeb   :  { %1536 = vmatprep.mubr.f32.mxu0 %v11014_v50  ;;  %v8250_v50 = vpack.c.bf16 %v8241_v34, %v8236_v25  ;;  %11026 = vst [vmem:[#allocation185_spill] sm:$0xff] %v8266_v6  ;;  %11034 = vst [vmem:[#allocation189_spill] sm:$0xff] %v8286_v8 }
  0xed   :  { %1150 = vmatmul.mubr.f32.gmra.mrb[52].mxu1 %v11019_v28  ;;  %11021 = vst [vmem:[#allocation184_spill] sm:$0xff] %v8250_v50  ;;  %v8262_v28 = vand.u32 4294901760, %v25_v49  ;;  %v37_v50 = vld [vmem:[%s10152_s0 + $0x88] sm:$0xff] }
  0xee   :  { %1539 = vmatmul.mubr.f32.gmra.mrb[48].mxu0 %v11020_v11  ;;  %1155 = vmatprep.mubr.f32.mxu1 %v11022_v62  ;;  %v11024_v11 = vld [vmem:[#allocation150_spill] sm:$0xff]  ;;  %v34_v62 = vld [vmem:[%s10152_s0 + $0x70] sm:$0xff] }
  0xef   :  { %1545 = vmatprep.mubr.f32.mxu0 %v11023_v1  ;;  %v11027_v1 = vand.u32 4294901760, %v8053_v13  ;;  %v8296_v10 = vsub.f32 %v25_v49, %v8262_v28  ;;  %v8298_v43 = vand.u32 4294901760, %v34_v62  ;;  %v11043_v49 = vand.u32 4294901760, %v8084_v16 }
  0xf1   :  { %1157 = vmatmul.mubr.f32.gmra.mrb[54].mxu1 %v11024_v11  ;;  %v8274_v40 = vsub.f32 %v8053_v13, %v11027_v1  ;;  %v11032_v11 = vld [vmem:[#allocation149_spill] sm:$0xff]  ;;  %11036 = vst [vmem:[#allocation191_spill] sm:$0xff] %v8296_v10  ;;  %11037 = vst [vmem:[#allocation192_spill] sm:$0xff] %v8298_v43  ;;  %v11038_v1 = vld [vmem:[#allocation154_spill] sm:$0xff]  ;;  %v8316_v0 = vsub.f32 %v8084_v16, %v11043_v49  ;;  %v8336_v16 = vsub.f32 %v34_v62, %v8298_v43 }
  0xf2   :  { %1548 = vmatmul.mubr.f32.gmra.mrb[50].mxu0 %v11025_v4  ;;  %1162 = vmatprep.mubr.f32.mxu1 %v11031_v22  ;;  %v8284_v4 = vsub.f32 %v22_v39, %v8254_v19  ;;  %v40_v39 = vld [vmem:[%s10152_s0 + $0xa0] sm:$0xff]  ;;  %v11039_v22 = vld [vmem:[#allocation72_spill] sm:$0xff]  ;;  %v11052_v49 = vld [vmem:[#allocation3_spill] sm:$0xff]  ;;  %v11059_v43 = vand.u32 4294901760, %v8118_v9 }
  0xf3   :  { %11028 = vst [vmem:[#allocation186_spill] sm:$0xff] %v8274_v40  ;;  %1554 = vmatprep.mubr.f32.mxu0 %v11032_v11  ;;  %v8293_v13 = vpack.c.bf16 %v8279_v26, %v8274_v40  ;;  %v8306_v11 = vsub.f32 %v28_v46, %v8266_v6  ;;  %11044 = vst [vmem:[#allocation195_spill] sm:$0xff] %v8316_v0  ;;  %v8324_v46 = vand.u32 4294901760, %v37_v50  ;;  %v8326_v58 = vand.u32 4294901760, %v40_v39  ;;  %v11056_v62 = vld [vmem:[#allocation153_spill] sm:$0xff]  ;;  %v11061_v6 = vld [vmem:[#allocation159_spill] sm:$0xff] }
  0xf4   :  { %11033 = vst [vmem:[#allocation188_spill] sm:$0xff] %v8284_v4  ;;  %11051 = vst [vmem:[#allocation200_spill] sm:$0xff] %v8336_v16  ;;  %v8364_v5 = vsub.f32 %v8118_v9, %v11059_v43  ;;  %v8382_v43 = vand.u32 4294901760, %v49_v57 }
  0xf5   :  { %11035 = vst [vmem:[#allocation190_spill] sm:$0xff] %v8293_v13  ;;  %1164 = vmatmul.mubr.f32.gmra.mrb[56].mxu1 %v11038_v1  ;;  %11040 = vst [vmem:[#allocation193_spill] sm:$0xff] %v8306_v11  ;;  %v8311_v13 = vsub.f32 %v8076_v27, %v11041_v3  ;;  %v43_v27 = vld [vmem:[%s10152_s0 + $0xb8] sm:$0xff]  ;;  %v11053_v1 = vand.u32 4294901760, %v11052_v49  ;;  %v11057_v49 = vand.u32 4294901760, %v8101_v63 }
  0xf6   :  { %1557 = vmatmul.mubr.f32.gmra.mrb[52].mxu0 %v11039_v22  ;;  %1169 = vmatprep.mubr.f32.mxu1 %v11045_v35  ;;  %v8322_v22 = vsub.f32 %v31_v33, %v8286_v8  ;;  %11048 = vst [vmem:[#allocation197_spill] sm:$0xff] %v8324_v46  ;;  %11049 = vst [vmem:[#allocation198_spill] sm:$0xff] %v8326_v58  ;;  %v11054_v35 = vld [vmem:[#allocation4_spill] sm:$0xff] }
  0xf7   :  { %11042 = vst [vmem:[#allocation194_spill] sm:$0xff] %v8311_v13  ;;  %1563 = vmatprep.mubr.f32.mxu0 %v11046_v18  ;;  %v8333_v3 = vpack.c.bf16 %v8316_v0, %v8311_v13  ;;  %v11055_v33 = vand.u32 4294901760, %v11054_v35  ;;  %v46_v8 = vld [vmem:[%s10152_s0 + $0xd0] sm:$0xff]  ;;  %11060 = vst [vmem:[#allocation4_spill] sm:$0xff] %v8364_v5 }
  0xf8   :  { %11047 = vst [vmem:[#allocation196_spill] sm:$0xff] %v8322_v22  ;;  %v8380_v9 = vand.u32 4294901760, %v46_v8  ;;  %11066 = vst [vmem:[#allocation203_spill] sm:$0xff] %v8382_v43 }
  0xf9   :  { %11050 = vst [vmem:[#allocation199_spill] sm:$0xff] %v8333_v3  ;;  %v8342_v18 = vpack.c.bf16 %v11055_v33, %v11053_v1  ;;  %1171 = vmatmul.mubr.f32.gmra.mrb[58].mxu1 %v7887_v59  ;;  %v8359_v33 = vsub.f32 %v8101_v63, %v11057_v49  ;;  %v11062_v3 = vld [vmem:[#allocation79_spill] sm:$0xff]  ;;  %v11063_v59 = vand.u32 4294901760, %v8284_v4  ;;  %v8375_v63 = vand.u32 4294901760, %v43_v27 }
  0xfa   :  { %1566 = vmatmul.mubr.f32.gmra.mrb[54].mxu0 %v11056_v62  ;;  %1176 = vmatprep.mubr.f32.mxu1 %v11061_v6  ;;  %v8373_v62 = vsub.f32 %v37_v50, %v8324_v46  ;;  %v8378_v49 = vsub.f32 %v40_v39, %v8326_v58  ;;  %v11069_v50 = vand.u32 4294901760, %v8181_v61  ;;  %v11070_v58 = vand.u32 4294901760, %v8296_v10  ;;  %v58_v46 = vld [vmem:[%s10152_s0 + $0x130] sm:$0xff] }
  0xfb   :  { %11058 = vst [vmem:[#allocation3_spill] sm:$0xff] %v8359_v33  ;;  %1572 = vmatprep.mubr.f32.mxu0 %v11062_v3  ;;  %v2846_v35 = vsub.f32 %v8284_v4, %v11063_v59  ;;  %v8386_v6 = vpack.c.bf16 %v8364_v5, %v8359_v33  ;;  %v11068_v59 = vand.u32 4294901760, %v8176_v17 }
  0xfc   :  { %11064 = vst [vmem:[#allocation201_spill] sm:$0xff] %v8373_v62  ;;  %11065 = vst [vmem:[#allocation202_spill] sm:$0xff] %v8378_v49  ;;  %v3188_v4 = vsub.f32 %v8181_v61, %v11069_v50  ;;  %v11073_v50 = vand.u32 4294901760, %v8144_v23  ;;  %v8419_v61 = vsub.f32 %v43_v27, %v8375_v63 }
  0xfd   :  { %11067 = vst [vmem:[#allocation204_spill] sm:$0xff] %v8386_v6  ;;  %v3181_v1 = vsub.f32 %v8176_v17, %v11068_v59  ;;  %1178 = vmatmul.mubr.f32.gmra.mrb[60].mxu1 %v7913_v37  ;;  %v2856_v6 = vsub.f32 %v8296_v10, %v11070_v58  ;;  %v11071_v59 = vand.u32 4294901760, %v8135_v41  ;;  %v2847_v39 = vand.u32 4294901760, %v2846_v35 }
  0xfe   :  { %1575 = vmatmul.mubr.f32.gmra.mrb[56].mxu0 %v7876_v36  ;;  %v8410_v3 = vsub.f32 %v8144_v23, %v11073_v50  ;;  %1183 = vmatprep.mubr.f32.mxu1 %v7923_v31  ;;  %v11075_v37 = vand.u32 4294901760, %v8306_v11  ;;  %11076 = vst [vmem:[#allocation207_spill] sm:$0xff] %v8419_v61  ;;  %v11077_v23 = vand.u32 4294901760, %v8322_v22  ;;  %v8428_v50 = vsub.f32 %v46_v8, %v8380_v9 }
  0xff   :  { %v8405_v17 = vsub.f32 %v8135_v41, %v11071_v59  ;;  %1581 = vmatprep.mubr.f32.mxu0 %v7892_v21  ;;  %v52_v41 = vld [vmem:[%s10152_s0 + $0x100] sm:$0xff]  ;;  %v8431_v35 = vsub.f32 %v49_v57, %v8382_v43  ;;  %v3182_v31 = vand.u32 4294901760, %v3181_v1  ;;  %v11080_v8 = vand.u32 4294901760, %v8210_v53 }
 0x100   :  { %11074 = vst [vmem:[#allocation206_spill] sm:$0xff] %v8410_v3  ;;  %v2866_v58 = vsub.f32 %v8306_v11, %v11075_v37  ;;  %v2876_v59 = vsub.f32 %v8322_v22, %v11077_v23  ;;  %11078 = vst [vmem:[#allocation208_spill] sm:$0xff] %v8428_v50  ;;  %v55_v37 = vld [vmem:[%s10152_s0 + $0x118] sm:$0xff]  ;;  %v3189_v23 = vand.u32 4294901760, %v3188_v4  ;;  %v11081_v57 = vand.u32 4294901760, %v8215_v32 }
 0x101   :  { %11072 = vst [vmem:[#allocation205_spill] sm:$0xff] %v8405_v17  ;;  %11079 = vst [vmem:[#allocation209_spill] sm:$0xff] %v8431_v35  ;;  %v8438_v27 = vpack.c.bf16 %v8410_v3, %v8405_v17  ;;  %v3195_v22 = vsub.f32 %v8210_v53, %v11080_v8  ;;  %1185 = vmatmul.mubr.f32.gmra.mrb[62].mxu1 %v7938_v12  ;;  %v2857_v10 = vand.u32 4294901760, %v2856_v6  ;;  %v11082_v21 = vand.u32 4294901760, %v8336_v16 }
 0x102   :  { %v3202_v11 = vsub.f32 %v8215_v32, %v11081_v57  ;;  %1584 = vmatmul.mubr.f32.gmra.mrb[58].mxu0 %v7911_v45  ;;  %v8455_v4 = vand.u32 4294901760, %v52_v41  ;;  %5223 = vmatprep.mubr.f32.mxu1 %v2847_v39  ;;  %v2867_v8 = vand.u32 4294901760, %v2866_v58  ;;  %v11084_v53 = vand.u32 4294901760, %v8373_v62  ;;  %v61_v39 = vld [vmem:[%s10152_s0 + $0x148] sm:$0xff] }
 0x103   :  { %v2886_v36 = vsub.f32 %v8336_v16, %v11082_v21  ;;  %1590 = vmatprep.mubr.f32.mxu0 %v7921_v51  ;;  %v8462_v32 = vand.u32 4294901760, %v55_v37  ;;  %v8465_v45 = vand.u32 4294901760, %v58_v46  ;;  %v5995_v58 = vpack.c.bf16 %v3189_v23, %v3182_v31 }
 0x104   :  { %11083 = vst [vmem:[#allocation210_spill] sm:$0xff] %v8455_v4  ;;  %v2896_v57 = vsub.f32 %v8373_v62, %v11084_v53  ;;  %v3196_v53 = vand.u32 4294901760, %v3195_v22  ;;  %v3203_v62 = vand.u32 4294901760, %v3202_v11  ;;  %v2877_v12 = vand.u32 4294901760, %v2876_v59 }
 0x105   :  { %11085 = vst [vmem:[#allocation211_spill] sm:$0xff] %v8462_v32  ;;  %11086 = vst [vmem:[#allocation212_spill] sm:$0xff] %v8465_v45  ;;  %5224 = vmatmul.mubr.f32.vlgmr.msra.gmra.mrb[64].mxu1 %v2857_v10  ;;  %v2887_v6 = vand.u32 4294901760, %v2886_v36  ;;  %v11087_v51 = vand.u32 4294901760, %v8378_v49  ;;  %v8478_v1 = vsub.f32 %v52_v41, %v8455_v4  ;;  %v11089_v31 = vand.u32 4294901760, %v8419_v61  ;;  %v64_v36 = vld [vmem:[%s10152_s0 + $0x160] sm:$0xff] }
 0x106   :  { %1593 = vmatmul.mubr.f32.gmra.mrb[60].mxu0 %v7936_v52  ;;  %5226 = vmatprep.mubr.f32.mxu1 %v2867_v8  ;;  %v2897_v16 = vand.u32 4294901760, %v2896_v57  ;;  %v8493_v10 = vsub.f32 %v55_v37, %v8462_v32  ;;  %v8495_v41 = vand.u32 4294901760, %v61_v39  ;;  %v11092_v59 = vand.u32 4294901760, %v8236_v25 }
 0x107   :  { %v2906_v21 = vsub.f32 %v8378_v49, %v11087_v51  ;;  %11088 = vst [vmem:[#allocation213_spill] sm:$0xff] %v8478_v1  ;;  %1599 = vmatprep.mubr.f32.mxu0 %v7946_v48  ;;  %v8484_v22 = vsub.f32 %v8419_v61, %v11089_v31  ;;  %5994 = vmatpush3.bf16.msra.mxu1 %v8200_v38  ;;  %v11093_v8 = vand.u32 4294901760, %v8241_v34  ;;  %v11094_v31 = vand.u32 4294901760, %v8428_v50 }
 0x108   :  { %11090 = vst [vmem:[#allocation214_spill] sm:$0xff] %v8493_v10  ;;  %11091 = vst [vmem:[#allocation215_spill] sm:$0xff] %v8495_v41  ;;  %v3209_v23 = vsub.f32 %v8236_v25, %v11092_v59  ;;  %v11095_v51 = vand.u32 4294901760, %v8431_v35  ;;  %v8512_v37 = vsub.f32 %v58_v46, %v8465_v45  ;;  %5996 = vmatprep.subr.bf16.mxu1 %v5995_v58  ;;  %v11097_v25 = vld [vmem:[#allocation5_spill] sm:$0xff] }
 0x109   :  { %v3216_v57 = vsub.f32 %v8241_v34, %v11093_v8  ;;  %v2926_v11 = vsub.f32 %v8428_v50, %v11094_v31  ;;  %v5999_v61 = vpack.c.bf16 %v3203_v62, %v3196_v53  ;;  %5227 = vmatmul.mubr.f32.gmra.mrb[66].mxu1 %v2877_v12  ;;  %v2907_v59 = vand.u32 4294901760, %v2906_v21  ;;  %v11099_v34 = vld [vmem:[#allocation7_spill] sm:$0xff]  ;;  %v67_v46 = vld [vmem:[%s10152_s0 + $0x178] sm:$0xff]  ;;  %v70_v12 = vld [vmem:[%s10152_s0 + $0x190] sm:$0xff] }
 0x10a   :  { %v8509_v38 = vsub.f32 %v8431_v35, %v11095_v51  ;;  %11096 = vst [vmem:[#allocation216_spill] sm:$0xff] %v8512_v37  ;;  %1602 = vmatmul.mubr.f32.gmra.mrb[62].mxu0 %v7956_v29  ;;  %v11098_v8 = vand.u32 4294901760, %v11097_v25  ;;  %v11100_v49 = vand.u32 4294901760, %v11099_v34  ;;  %v8520_v50 = vand.u32 4294901760, %v64_v36  ;;  %v11102_v51 = vld [vmem:[#allocation50_spill] sm:$0xff]  ;;  %5229 = vmatprep.mubr.f32.mxu1 %v2887_v6 }
 0x10b   :  { %v11103_v35 = vand.u32 4294901760, %v11102_v51  ;;  %v11104_v25 = vand.u32 4294901760, %v8274_v40  ;;  %v11105_v62 = vand.u32 4294901760, %v8279_v26  ;;  %v2917_v6 = vand.u32 4294901760, %v8484_v22  ;;  %5998 = vmatpush3.bf16.msra.mxu1 %v5995_v58 }
 0x10c   :  { %v5867_v48 = vpack.c.bf16 %v11100_v49, %v11098_v8  ;;  %11101 = vst [vmem:[#allocation5_spill] sm:$0xff] %v8520_v50  ;;  %v3210_v8 = vand.u32 4294901760, %v3209_v23  ;;  %v3217_v51 = vand.u32 4294901760, %v3216_v57  ;;  %v2927_v31 = vand.u32 4294901760, %v2926_v11  ;;  %6000 = vmatprep.subr.bf16.mxu1 %v5999_v61  ;;  %v11113_v57 = vld [vmem:[#allocation65_spill] sm:$0xff] }
 0x10d   :  { %1706 = vmatprep.mubr.f32.mxu0 %v11103_v35  ;;  %v3223_v34 = vsub.f32 %v8274_v40, %v11104_v25  ;;  %v3230_v49 = vsub.f32 %v8279_v26, %v11105_v62  ;;  %v10563_v35 = vand.u32 4294901760, %v8316_v0  ;;  %v2937_v29 = vand.u32 4294901760, %v8509_v38  ;;  %v11107_v62 = vld [vmem:[#allocation59_spill] sm:$0xff]  ;;  %5230 = vmatmul.mubr.f32.gmra.mrb[68].mxu1 %v2897_v16  ;;  %v11120_v26 = vld [vmem:[#allocation9_spill] sm:$0xff] }
 0x10e   :  { %v8543_v40 = vsub.f32 %v61_v39, %v8495_v41  ;;  %v11108_v21 = vand.u32 4294901760, %v11107_v62  ;;  %v11109_v22 = vand.u32 4294901760, %v8478_v1  ;;  %v8551_v58 = vsub.f32 %v64_v36, %v8520_v50  ;;  %v73_v39 = vld [vmem:[%s10152_s0 + $0x1a8] sm:$0xff]  ;;  %5232 = vmatprep.mubr.f32.mxu1 %v2907_v59 }
 0x10f   :  { %v8553_v11 = vand.u32 4294901760, %v67_v46  ;;  %v8555_v23 = vand.u32 4294901760, %v70_v12  ;;  %v11114_v38 = vand.u32 4294901760, %v11113_v57  ;;  %v3224_v16 = vand.u32 4294901760, %v3223_v34  ;;  %v76_v34 = vld [vmem:[%s10152_s0 + $0x1c0] sm:$0xff]  ;;  %6002 = vmatpush3.bf16.msra.mxu1 %v5999_v61  ;;  %v79_v61 = vld [vmem:[%s10152_s0 + $0x1d8] sm:$0xff] }
 0x110   :  { %11106 = vst [vmem:[#allocation7_spill] sm:$0xff] %v8543_v40  ;;  %1710 = vmatmul.mubr.f32.vlgmr.msra.gmra.mrb[0].mxu0 %v11108_v21  ;;  %v2946_v53 = vsub.f32 %v8478_v1, %v11109_v22  ;;  %11110 = vst [vmem:[#allocation50_spill] sm:$0xff] %v8551_v58  ;;  %v3231_v21 = vand.u32 4294901760, %v3230_v49  ;;  %v11115_v62 = vand.u32 4294901760, %v8311_v13  ;;  %v3244_v22 = vsub.f32 %v8316_v0, %v10563_v35  ;;  %v11118_v0 = vld [vmem:[#allocation8_spill] sm:$0xff] }
 0x111   :  { %11111 = vst [vmem:[#allocation59_spill] sm:$0xff] %v8553_v11  ;;  %11112 = vst [vmem:[#allocation217_spill] sm:$0xff] %v8555_v23  ;;  %5865 = vmatpush1.bf16.msra.mxu0 %v8342_v18  ;;  %1717 = vmatprep.mubr.f32.mxu0 %v11114_v38  ;;  %v11116_v25 = vand.u32 4294901760, %v8493_v10  ;;  %v6003_v49 = vpack.c.bf16 %v3217_v51, %v3210_v8  ;;  %v8588_v1 = vand.u32 4294901760, %v73_v39  ;;  %v11123_v8 = vld [vmem:[#allocation66_spill] sm:$0xff]  ;;  %v10575_v57 = vand.u32 4294901760, %v8551_v58 }
 0x112   :  { %v3237_v36 = vsub.f32 %v8311_v13, %v11115_v62  ;;  %5866 = vmatprep.subr.bf16.mxu0 %v10702_v55  ;;  %v11117_v62 = vand.u32 4294901760, %v8512_v37  ;;  %v11119_v13 = vand.u32 4294901760, %v11118_v0  ;;  %v11124_v51 = vand.u32 4294901760, %v11123_v8  ;;  %5233 = vmatmul.mubr.f32.gmra.mrb[70].mxu1 %v2917_v6  ;;  %v11127_v0 = vld [vmem:[#allocation67_spill] sm:$0xff] }
 0x113   :  { %v2956_v18 = vsub.f32 %v8493_v10, %v11116_v25  ;;  %v11121_v25 = vand.u32 4294901760, %v11120_v26  ;;  %11122 = vst [vmem:[#allocation65_spill] sm:$0xff] %v8588_v1  ;;  %v2947_v38 = vand.u32 4294901760, %v2946_v53  ;;  %v8597_v59 = vsub.f32 %v70_v12, %v8555_v23  ;;  %5235 = vmatprep.mubr.f32.mxu1 %v2927_v31  ;;  %6004 = vmatprep.subr.bf16.mxu1 %v6003_v49  ;;  %v11138_v8 = vld [vmem:[#allocation11_spill] sm:$0xff] }
 0x114   :  { %v8581_v35 = vsub.f32 %v8512_v37, %v11117_v62  ;;  %1721 = vmatmul.mubr.f32.gmra.mrb[2].mxu0 %v11124_v51  ;;  %v8594_v62 = vsub.f32 %v67_v46, %v8553_v11  ;;  %v11128_v37 = vand.u32 4294901760, %v11127_v0  ;;  %v8601_v26 = vand.u32 4294901760, %v76_v34  ;;  %v82_v46 = vld [vmem:[%s10152_s0 + $0x1f0] sm:$0xff]  ;;  %6006 = vmatpush3.bf16.msra.mxu1 %v6003_v49  ;;  %v11134_v0 = vld [vmem:[#allocation73_spill] sm:$0xff]  ;;  %v11141_v49 = vld [vmem:[#allocation74_spill] sm:$0xff] }
 0x115   :  { %v5870_v10 = vpack.c.bf16 %v11121_v25, %v11119_v13  ;;  %11126 = vst [vmem:[#allocation9_spill] sm:$0xff] %v8597_v59  ;;  %v6007_v13 = vpack.c.bf16 %v3231_v21, %v3224_v16  ;;  %v3238_v6 = vand.u32 4294901760, %v3237_v36  ;;  %v3245_v53 = vand.u32 4294901760, %v3244_v22  ;;  %5868 = vmatpush1.bf16.msra.mxu0 %v5867_v48 }
 0x116   :  { %11125 = vst [vmem:[#allocation8_spill] sm:$0xff] %v8594_v62  ;;  %1728 = vmatprep.mubr.f32.mxu0 %v11128_v37  ;;  %11129 = vst [vmem:[#allocation66_spill] sm:$0xff] %v8601_v26  ;;  %v11130_v12 = vand.u32 4294901760, %v8359_v33  ;;  %v11131_v31 = vand.u32 4294901760, %v8364_v5  ;;  %v2957_v21 = vand.u32 4294901760, %v2956_v18  ;;  %v2967_v48 = vand.u32 4294901760, %v8581_v35  ;;  %5869 = vmatprep.subr.bf16.mxu0 %v10702_v55 }
 0x117   :  { %v11132_v36 = vand.u32 4294901760, %v8543_v40  ;;  %v8623_v51 = vsub.f32 %v73_v39, %v8588_v1  ;;  %5236 = vmatmul.mubr.f32.gmra.mrb[72].mxu1 %v2937_v29  ;;  %v2986_v18 = vsub.f32 %v8551_v58, %v10575_v57  ;;  %v85_v39 = vld [vmem:[%s10152_s0 + $0x208] sm:$0xff]  ;;  %v8646_v57 = vand.u32 4294901760, %v82_v46  ;;  %6008 = vmatprep.subr.bf16.mxu1 %v6007_v13 }
 0x118   :  { %v3251_v37 = vsub.f32 %v8359_v33, %v11130_v12  ;;  %v3258_v25 = vsub.f32 %v8364_v5, %v11131_v31  ;;  %v11135_v12 = vand.u32 4294901760, %v11134_v0  ;;  %v11136_v31 = vld [vmem:[#allocation10_spill] sm:$0xff]  ;;  %v11139_v5 = vand.u32 4294901760, %v11138_v8  ;;  %5238 = vmatprep.mubr.f32.mxu1 %v2947_v38  ;;  %v8658_v35 = vpop.f32.mrb[0].mxu1  ;;  %6010 = vmatpush3.bf16.msra.mxu1 %v6007_v13  ;;  %v91_v13 = vld [vmem:[%s10152_s0 + $0x238] sm:$0xff] }
 0x119   :  { %v2976_v22 = vsub.f32 %v8543_v40, %v11132_v36  ;;  %11133 = vst [vmem:[#allocation67_spill] sm:$0xff] %v8623_v51  ;;  %v11137_v16 = vand.u32 4294901760, %v11136_v31  ;;  %v8635_v36 = vand.u32 4294901760, %v79_v61  ;;  %v11142_v0 = vand.u32 4294901760, %v11141_v49  ;;  %11144 = vst [vmem:[#allocation11_spill] sm:$0xff] %v8646_v57  ;;  %5871 = vmatpush1.bf16.msra.mxu0 %v5870_v10  ;;  %v11149_v10 = vld [vmem:[#allocation78_spill] sm:$0xff] }
 0x11a   :  { %1732 = vmatmul.mubr.f32.gmra.mrb[4].mxu0 %v11135_v12  ;;  %v8644_v12 = vsub.f32 %v76_v34, %v8601_v26  ;;  %v6011_v8 = vpack.c.bf16 %v3245_v53, %v3238_v6  ;;  %v3259_v31 = vand.u32 4294901760, %v3258_v25  ;;  %v11145_v49 = vand.u32 4294901760, %v8405_v17  ;;  %5872 = vmatprep.subr.bf16.mxu0 %v10702_v55  ;;  %11147 = vst [vmem:[#allocation74_spill] sm:$0xff] %v8658_v35  ;;  %v11154_v35 = vld [vmem:[#allocation80_spill] sm:$0xff] }
 0x11b   :  { %v5873_v33 = vpack.c.bf16 %v11139_v5, %v11137_v16  ;;  %11140 = vst [vmem:[#allocation73_spill] sm:$0xff] %v8635_v36  ;;  %1739 = vmatprep.mubr.f32.mxu0 %v11142_v0  ;;  %v88_v5 = vld [vmem:[%s10152_s0 + $0x220] sm:$0xff]  ;;  %v3252_v16 = vand.u32 4294901760, %v3251_v37  ;;  %v11146_v0 = vand.u32 4294901760, %v8410_v3  ;;  %v2977_v29 = vand.u32 4294901760, %v2976_v22  ;;  %5239 = vmatmul.mubr.f32.gmra.mrb[74].mxu1 %v2957_v21  ;;  %v274_v22 = vpop.f32.mrb[1].mxu1 }
 0x11c   :  { %11143 = vst [vmem:[#allocation10_spill] sm:$0xff] %v8644_v12  ;;  %v3265_v38 = vsub.f32 %v8405_v17, %v11145_v49  ;;  %v8660_v58 = vand.u32 4294901760, %v85_v39  ;;  %v11150_v6 = vand.u32 4294901760, %v11149_v10  ;;  %v11151_v53 = vand.u32 4294901760, %v8594_v62  ;;  %5241 = vmatprep.mubr.f32.mxu1 %v2967_v48  ;;  %v11158_v22 = vld [vmem:[#allocation14_spill] sm:$0xff]  ;;  %v11160_v17 = vld [vmem:[#allocation15_spill] sm:$0xff]  ;;  %6012 = vmatprep.subr.bf16.mxu1 %v6011_v8 }
 0x11d   :  { %v3272_v34 = vsub.f32 %v8410_v3, %v11146_v0  ;;  %v8669_v49 = vsub.f32 %v79_v61, %v8635_v36  ;;  %v8671_v0 = vand.u32 4294901760, %v88_v5  ;;  %v11155_v10 = vand.u32 4294901760, %v11154_v35  ;;  %5874 = vmatpush1.bf16.msra.mxu0 %v5873_v33  ;;  %v94_v48 = vld [vmem:[%s10152_s0 + $0x250] sm:$0xff]  ;;  %6014 = vmatpush3.bf16.msra.mxu1 %v6011_v8 }
 0x11e   :  { %11148 = vst [vmem:[#allocation218_spill] sm:$0xff] %v8660_v58  ;;  %1743 = vmatmul.mubr.f32.gmra.mrb[6].mxu0 %v11150_v6  ;;  %v2996_v37 = vsub.f32 %v8594_v62, %v11151_v53  ;;  %v2987_v21 = vand.u32 4294901760, %v2986_v18  ;;  %v11156_v6 = vand.u32 4294901760, %v8597_v59  ;;  %v8683_v61 = vsub.f32 %v82_v46, %v8646_v57  ;;  %5875 = vmatprep.subr.bf16.mxu0 %v10702_v55 }
 0x11f   :  { %11152 = vst [vmem:[#allocation78_spill] sm:$0xff] %v8669_v49  ;;  %11153 = vst [vmem:[#allocation219_spill] sm:$0xff] %v8671_v0  ;;  %1750 = vmatprep.mubr.f32.mxu0 %v11155_v10  ;;  %v11159_v3 = vand.u32 4294901760, %v11158_v22  ;;  %v11161_v62 = vand.u32 4294901760, %v11160_v17  ;;  %v6015_v18 = vpack.c.bf16 %v3259_v31, %v3252_v16  ;;  %v3266_v35 = vand.u32 4294901760, %v3265_v38  ;;  %v11165_v17 = vld [vmem:[#allocation83_spill] sm:$0xff]  ;;  %5242 = vmatmul.mubr.f32.gmra.mrb[76].mxu1 %v2977_v29 }
 0x120   :  { %v3006_v53 = vsub.f32 %v8597_v59, %v11156_v6  ;;  %11157 = vst [vmem:[#allocation80_spill] sm:$0xff] %v8683_v61  ;;  %v3273_v10 = vand.u32 4294901760, %v3272_v34  ;;  %v8692_v6 = vpop.f32.mrb[2].mxu1  ;;  %v8696_v46 = vsub.f32 %v85_v39, %v8660_v58  ;;  %v8698_v33 = vand.u32 4294901760, %v91_v13  ;;  %v11169_v39 = vld [vmem:[#allocation85_spill] sm:$0xff]  ;;  %5244 = vmatprep.mubr.f32.mxu1 %v2987_v21  ;;  %v11175_v31 = vld [vmem:[#allocation18_spill] sm:$0xff] }
 0x121   :  { %v5876_v40 = vpack.c.bf16 %v11161_v62, %v11159_v3  ;;  %11162 = vst [vmem:[#allocation14_spill] sm:$0xff] %v8692_v6  ;;  %v11166_v3 = vand.u32 4294901760, %v11165_v17  ;;  %v2997_v62 = vand.u32 4294901760, %v2996_v37  ;;  %v11167_v22 = vand.u32 4294901760, %v8623_v51  ;;  %v289_v38 = vpop.f32.mrb[3].mxu1  ;;  %v100_v21 = vld [vmem:[%s10152_s0 + $0x280] sm:$0xff]  ;;  %6016 = vmatprep.subr.bf16.mxu1 %v6015_v18 }
 0x122   :  { %11163 = vst [vmem:[#allocation15_spill] sm:$0xff] %v8696_v46  ;;  %11164 = vst [vmem:[#allocation220_spill] sm:$0xff] %v8698_v33  ;;  %v8707_v34 = vsub.f32 %v88_v5, %v8671_v0  ;;  %v11170_v25 = vand.u32 4294901760, %v11169_v39  ;;  %v3007_v8 = vand.u32 4294901760, %v3006_v53  ;;  %v11171_v17 = vand.u32 4294901760, %v8644_v12  ;;  %v11173_v5 = vld [vmem:[#allocation17_spill] sm:$0xff]  ;;  %6018 = vmatpush3.bf16.msra.mxu1 %v6015_v18 }
 0x123   :  { %1754 = vmatmul.mubr.f32.gmra.mrb[8].mxu0 %v11166_v3  ;;  %v3016_v16 = vsub.f32 %v8623_v51, %v11167_v22  ;;  %v8715_v3 = vand.u32 4294901760, %v94_v48  ;;  %v97_v22 = vld [vmem:[%s10152_s0 + $0x268] sm:$0xff]  ;;  %v11174_v38 = vand.u32 4294901760, %v11173_v5  ;;  %v11176_v39 = vand.u32 4294901760, %v11175_v31  ;;  %v8728_v37 = vpop.f32.mrb[4].mxu1  ;;  %5245 = vmatmul.mubr.f32.gmra.mrb[78].mxu1 %v2997_v62 }
 0x124   :  { %11168 = vst [vmem:[#allocation83_spill] sm:$0xff] %v8707_v34  ;;  %1761 = vmatprep.mubr.f32.mxu0 %v11170_v25  ;;  %v3026_v29 = vsub.f32 %v8644_v12, %v11171_v17  ;;  %5877 = vmatpush1.bf16.msra.mxu0 %v5876_v40  ;;  %v6019_v53 = vpack.c.bf16 %v3273_v10, %v3266_v35  ;;  %11177 = vst [vmem:[#allocation17_spill] sm:$0xff] %v8728_v37  ;;  %v11179_v40 = vld [vmem:[#allocation87_spill] sm:$0xff]  ;;  %v304_v10 = vpop.f32.mrb[5].mxu1  ;;  %v8740_v17 = vand.u32 4294901760, %v97_v22  ;;  %v11183_v37 = vld [vmem:[#allocation90_spill] sm:$0xff] }
 0x125   :  { %11172 = vst [vmem:[#allocation85_spill] sm:$0xff] %v8715_v3  ;;  %v5879_v25 = vpack.c.bf16 %v11176_v39, %v11174_v38  ;;  %v8731_v6 = vsub.f32 %v91_v13, %v8698_v33  ;;  %5878 = vmatprep.subr.bf16.mxu0 %v10702_v55  ;;  %v11180_v5 = vand.u32 4294901760, %v11179_v40  ;;  %v3017_v31 = vand.u32 4294901760, %v3016_v16  ;;  %5247 = vmatprep.mubr.f32.mxu1 %v3007_v8  ;;  %v11188_v8 = vld [vmem:[#allocation19_spill] sm:$0xff]  ;;  %v11199_v35 = vld [vmem:[#allocation92_spill] sm:$0xff] }
 0x126   :  { %v11181_v38 = vand.u32 4294901760, %v8669_v49  ;;  %11182 = vst [vmem:[#allocation87_spill] sm:$0xff] %v8740_v17  ;;  %v11184_v13 = vand.u32 4294901760, %v11183_v37  ;;  %v3027_v12 = vand.u32 4294901760, %v3026_v29  ;;  %v11185_v18 = vand.u32 4294901760, %v8683_v61  ;;  %v106_v37 = vld [vmem:[%s10152_s0 + $0x2b0] sm:$0xff]  ;;  %6020 = vmatprep.subr.bf16.mxu1 %v6019_v53 }
 0x127   :  { %11178 = vst [vmem:[#allocation18_spill] sm:$0xff] %v8731_v6  ;;  %1765 = vmatmul.mubr.f32.gmra.mrb[10].mxu0 %v11180_v5  ;;  %v8748_v62 = vsub.f32 %v94_v48, %v8715_v3  ;;  %v8750_v16 = vand.u32 4294901760, %v100_v21  ;;  %v103_v5 = vld [vmem:[%s10152_s0 + $0x298] sm:$0xff]  ;;  %v11189_v29 = vand.u32 4294901760, %v11188_v8  ;;  %v11192_v48 = vand.u32 4294901760, %v8696_v46  ;;  %6022 = vmatpush3.bf16.msra.mxu1 %v6019_v53 }
 0x128   :  { %v3036_v39 = vsub.f32 %v8669_v49, %v11181_v38  ;;  %1772 = vmatprep.mubr.f32.mxu0 %v11184_v13  ;;  %v3046_v40 = vsub.f32 %v8683_v61, %v11185_v18  ;;  %5880 = vmatpush1.bf16.msra.mxu0 %v5879_v25  ;;  %v11190_v38 = vld [vmem:[#allocation20_spill] sm:$0xff]  ;;  %v8766_v61 = vpop.f32.mrb[6].mxu1  ;;  %v11194_v25 = vld [vmem:[#allocation91_spill] sm:$0xff] }
 0x129   :  { %11186 = vst [vmem:[#allocation90_spill] sm:$0xff] %v8748_v62  ;;  %11187 = vst [vmem:[#allocation221_spill] sm:$0xff] %v8750_v16  ;;  %v11191_v10 = vand.u32 4294901760, %v11190_v38  ;;  %v3056_v18 = vsub.f32 %v8696_v46, %v11192_v48  ;;  %5881 = vmatprep.subr.bf16.mxu0 %v10702_v55  ;;  %v11195_v49 = vand.u32 4294901760, %v11194_v25  ;;  %5248 = vmatmul.mubr.f32.gmra.mrb[80].mxu1 %v3017_v31  ;;  %v11196_v38 = vand.u32 4294901760, %v8707_v34  ;;  %v319_v48 = vpop.f32.mrb[7].mxu1 }
 0x12a   :  { %11193 = vst [vmem:[#allocation19_spill] sm:$0xff] %v8766_v61  ;;  %v3037_v8 = vand.u32 4294901760, %v3036_v39  ;;  %v8777_v46 = vand.u32 4294901760, %v103_v5  ;;  %v11200_v61 = vand.u32 4294901760, %v11199_v35  ;;  %5250 = vmatprep.mubr.f32.mxu1 %v3027_v12  ;;  %v3047_v53 = vand.u32 4294901760, %v3046_v40  ;;  %v112_v39 = vld [vmem:[%s10152_s0 + $0x2e0] sm:$0xff]  ;;  %6024 = vmatprep.subr.bf16.mxu1 %v8148_v54 }
 0x12b   :  { %v5882_v13 = vpack.c.bf16 %v11191_v10, %v11189_v29  ;;  %1776 = vmatmul.mubr.f32.gmra.mrb[12].mxu0 %v11195_v49  ;;  %v3066_v29 = vsub.f32 %v8707_v34, %v11196_v38  ;;  %v8775_v10 = vsub.f32 %v97_v22, %v8740_v17  ;;  %v8783_v49 = vsub.f32 %v100_v21, %v8750_v16  ;;  %v109_v22 = vld [vmem:[%s10152_s0 + $0x2c8] sm:$0xff]  ;;  %v11204_v12 = vld [vmem:[#allocation24_spill] sm:$0xff]  ;;  %v8801_v34 = vpop.f32.mrb[8].mxu1 }
 0x12c   :  { %11198 = vst [vmem:[#allocation91_spill] sm:$0xff] %v8777_v46  ;;  %1783 = vmatprep.mubr.f32.mxu0 %v11200_v61  ;;  %v8785_v31 = vand.u32 4294901760, %v106_v37  ;;  %v11202_v35 = vld [vmem:[#allocation23_spill] sm:$0xff]  ;;  %v11205_v40 = vand.u32 4294901760, %v11204_v12  ;;  %v3057_v21 = vand.u32 4294901760, %v3056_v18  ;;  %v11206_v48 = vand.u32 4294901760, %v8731_v6 }
 0x12d   :  { %11197 = vst [vmem:[#allocation20_spill] sm:$0xff] %v8775_v10  ;;  %5883 = vmatpush1.bf16.msra.mxu0 %v5882_v13  ;;  %v11203_v61 = vand.u32 4294901760, %v11202_v35  ;;  %11207 = vst [vmem:[#allocation23_spill] sm:$0xff] %v8801_v34  ;;  %v11208_v13 = vld [vmem:[#allocation95_spill] sm:$0xff]  ;;  %5251 = vmatmul.mubr.f32.gmra.mrb[82].mxu1 %v3037_v8  ;;  %v3067_v59 = vand.u32 4294901760, %v3066_v29  ;;  %v334_v12 = vpop.f32.mrb[9].mxu1 }
 0x12e   :  { %11201 = vst [vmem:[#allocation92_spill] sm:$0xff] %v8785_v31  ;;  %v3076_v25 = vsub.f32 %v8731_v6, %v11206_v48  ;;  %5884 = vmatprep.subr.bf16.mxu0 %v10702_v55  ;;  %v11209_v51 = vand.u32 4294901760, %v11208_v13  ;;  %v8810_v18 = vand.u32 4294901760, %v109_v22  ;;  %5253 = vmatprep.mubr.f32.mxu1 %v3047_v53  ;;  %v11213_v48 = vand.u32 4294901760, %v8748_v62  ;;  %v11215_v13 = vld [vmem:[#allocation27_spill] sm:$0xff]  ;;  %v8830_v6 = vpop.f32.mrb[10].mxu1 }
 0x12f   :  { %v5885_v38 = vpack.c.bf16 %v11205_v40, %v11203_v61  ;;  %v8808_v61 = vsub.f32 %v103_v5, %v8777_v46  ;;  %v11211_v40 = vld [vmem:[#allocation97_spill] sm:$0xff]  ;;  %v8819_v8 = vsub.f32 %v106_v37, %v8785_v31  ;;  %v8821_v29 = vand.u32 4294901760, %v112_v39 }
 0x130   :  { %1787 = vmatmul.mubr.f32.gmra.mrb[14].mxu0 %v11209_v51  ;;  %11210 = vst [vmem:[#allocation24_spill] sm:$0xff] %v8810_v18  ;;  %v11212_v52 = vand.u32 4294901760, %v11211_v40  ;;  %v3086_v34 = vsub.f32 %v8748_v62, %v11213_v48  ;;  %v115_v5 = vld [vmem:[%s10152_s0 + $0x2f8] sm:$0xff]  ;;  %v11216_v12 = vand.u32 4294901760, %v11215_v13  ;;  %v3077_v35 = vand.u32 4294901760, %v3076_v25  ;;  %11219 = vst [vmem:[#allocation97_spill] sm:$0xff] %v8830_v6 }
 0x131   :  { %11214 = vst [vmem:[#allocation95_spill] sm:$0xff] %v8821_v29  ;;  %5886 = vmatpush1.bf16.msra.mxu0 %v5885_v38  ;;  %v11220_v48 = vld [vmem:[#allocation100_spill] sm:$0xff]  ;;  %5254 = vmatmul.mubr.f32.gmra.mrb[84].mxu1 %v3057_v21  ;;  %v11222_v51 = vand.u32 4294901760, %v8775_v10  ;;  %v8840_v13 = vsub.f32 %v109_v22, %v8810_v18  ;;  %v11224_v25 = vand.u32 4294901760, %v10962_v60  ;;  %v11226_v22 = vld [vmem:[#allocation30_spill] sm:$0xff]  ;;  %v11231_v60 = vand.u32 4294901760, %v7270_v47 }
 0x132   :  { %1794 = vmatprep.mubr.f32.mxu0 %v11212_v52  ;;  %v11217_v52 = vld [vmem:[#allocation28_spill] sm:$0xff]  ;;  %5887 = vmatprep.subr.bf16.mxu0 %v10702_v55  ;;  %v11221_v37 = vand.u32 4294901760, %v11220_v48  ;;  %v11225_v48 = vand.u32 4294901760, %v8783_v49  ;;  %v11227_v38 = vand.u32 4294901760, %v11226_v22 }
 0x133   :  { %v11218_v53 = vand.u32 4294901760, %v11217_v52  ;;  %v3096_v62 = vsub.f32 %v8775_v10, %v11222_v51  ;;  %v349_v52 = vpop.f32.mrb[11].mxu1  ;;  %5256 = vmatprep.mubr.f32.mxu1 %v3067_v59  ;;  %v8851_v51 = vsub.f32 %v112_v39, %v8821_v29 }
 0x134   :  { %1798 = vmatmul.mubr.f32.gmra.mrb[16].mxu0 %v11221_v37  ;;  %v3106_v21 = vsub.f32 %v8783_v49, %v11225_v48  ;;  %v10610_v37 = vand.u32 4294901760, %v8819_v8  ;;  %v11228_v52 = vld [vmem:[#allocation32_spill] sm:$0xff]  ;;  %v8857_v18 = vpop.f32.mrb[12].mxu1 }
 0x135   :  { %v5888_v40 = vpack.c.bf16 %v11218_v53, %v11216_v12  ;;  %v8842_v12 = vand.u32 4294901760, %v115_v5  ;;  %1805 = vmatprep.mubr.f32.mxu0 %v11224_v25  ;;  %v3087_v53 = vand.u32 4294901760, %v3086_v34  ;;  %v11229_v6 = vand.u32 4294901760, %v11228_v52  ;;  %11230 = vst [vmem:[#allocation28_spill] sm:$0xff] %v8857_v18  ;;  %5257 = vmatmul.mubr.f32.gmra.mrb[86].mxu1 %v3077_v35  ;;  %v364_v48 = vpop.f32.mrb[13].mxu1  ;;  %v11234_v35 = vld [vmem:[#allocation33_spill] sm:$0xff] }
 0x136   :  { %v3097_v59 = vand.u32 4294901760, %v3096_v62  ;;  %v11232_v34 = vand.u32 4294901760, %v8808_v61  ;;  %v3126_v47 = vsub.f32 %v8819_v8, %v10610_v37  ;;  %v10607_v62 = vand.u32 4294901760, %v8851_v51  ;;  %v11236_v52 = vld [vmem:[#allocation35_spill] sm:$0xff]  ;;  %v11368_v37 = vld [vmem:[#allocation57_spill] sm:$0xff]  ;;  %v11381_v18 = vld [vmem:[#allocation170_spill] sm:$0xff] }
 0x137   :  { %11223 = vst [vmem:[#allocation27_spill] sm:$0xff] %v8842_v12  ;;  %5889 = vmatpush1.bf16.msra.mxu0 %v5888_v40  ;;  %v5891_v10 = vpack.c.bf16 %v11229_v6, %v11227_v38  ;;  %v10609_v40 = vand.u32 4294901760, %v8840_v13  ;;  %v8867_v25 = vsub.f32 %v115_v5, %v8842_v12  ;;  %v11233_v6 = vand.u32 4294901760, %v7290_v30  ;;  %5259 = vmatprep.mubr.f32.mxu1 %v3087_v53  ;;  %v8879_v5 = vpop.f32.mrb[14].mxu1 }
 0x138   :  { %5890 = vmatprep.subr.bf16.mxu0 %v10702_v55  ;;  %1809 = vmatmul.mubr.f32.gmra.mrb[18].mxu0 %v11231_v60  ;;  %v3116_v39 = vsub.f32 %v8808_v61, %v11232_v34  ;;  %v3107_v38 = vand.u32 4294901760, %v3106_v21  ;;  %v11235_v22 = vand.u32 4294901760, %v11234_v35  ;;  %v11237_v60 = vand.u32 4294901760, %v11236_v52  ;;  %11238 = vst [vmem:[#allocation100_spill] sm:$0xff] %v8879_v5  ;;  %v379_v48 = vpop.f32.mrb[15].mxu1  ;;  %v11380_v5 = vld [vmem:[#allocation12_spill] sm:$0xff] }
 0x139   :  { %1816 = vmatprep.mubr.f32.mxu0 %v11233_v6  ;;  %v11239_v30 = vand.u32 4294901760, %v7304_v56  ;;  %5260 = vmatmul.mubr.f32.gmra.mrb[88].mxu1 %v3097_v59  ;;  %v3136_v21 = vsub.f32 %v8840_v13, %v10609_v40  ;;  %v11240_v6 = vand.u32 4294901760, %v7325_v44  ;;  %v3127_v35 = vand.u32 4294901760, %v3126_v47  ;;  %v11241_v56 = vld [vmem:[#allocation38_spill] sm:$0xff] }
 0x13a   :  { %v5894_v34 = vpack.c.bf16 %v11237_v60, %v11235_v22  ;;  %v3117_v53 = vand.u32 4294901760, %v3116_v39  ;;  %5262 = vmatprep.mubr.f32.mxu1 %v3107_v38  ;;  %v3146_v22 = vsub.f32 %v8851_v51, %v10607_v62  ;;  %v11242_v59 = vand.u32 4294901760, %v11241_v56  ;;  %v11243_v39 = vld [vmem:[#allocation40_spill] sm:$0xff]  ;;  %v11248_v56 = vld [vmem:[#allocation42_spill] sm:$0xff] }
 0x13b   :  { %5892 = vmatpush1.bf16.msra.mxu0 %v5891_v10  ;;  %v10608_v10 = vand.u32 4294901760, %v8867_v25  ;;  %v11244_v52 = vand.u32 4294901760, %v11243_v39  ;;  %v11246_v48 = vand.u32 4294901760, %v7344_v42  ;;  %v3137_v44 = vand.u32 4294901760, %v3136_v21  ;;  %v11250_v39 = vld [vmem:[#allocation44_spill] sm:$0xff]  ;;  %v11367_v40 = vld [vmem:[#allocation2_spill] sm:$0xff] }
 0x13c   :  { %5893 = vmatprep.subr.bf16.mxu0 %v10702_v55  ;;  %1820 = vmatmul.mubr.f32.gmra.mrb[20].mxu0 %v11239_v30  ;;  %v8897_v30 = vpop.f32.mrb[16].mxu1 }
 0x13d   :  { %1827 = vmatprep.mubr.f32.mxu0 %v11240_v6  ;;  %v5897_v60 = vpack.c.bf16 %v11244_v52, %v11242_v59  ;;  %11245 = vst [vmem:[#allocation30_spill] sm:$0xff] %v8897_v30  ;;  %5263 = vmatmul.mubr.f32.gmra.mrb[90].mxu1 %v3117_v53  ;;  %v3156_v38 = vsub.f32 %v8867_v25, %v10608_v10  ;;  %v394_v47 = vpop.f32.mrb[17].mxu1  ;;  %v3147_v6 = vand.u32 4294901760, %v3146_v22  ;;  %v11249_v59 = vand.u32 4294901760, %v11248_v56  ;;  %v11379_v30 = vld [vmem:[#allocation213_spill] sm:$0xff] }
 0x13e   :  { %5265 = vmatprep.mubr.f32.mxu1 %v3127_v35  ;;  %v11251_v52 = vand.u32 4294901760, %v11250_v39  ;;  %v8911_v42 = vpop.f32.mrb[18].mxu1  ;;  %v11253_v53 = vand.u32 4294901760, %v7376_v20  ;;  %v11255_v35 = vld [vmem:[#allocation46_spill] sm:$0xff]  ;;  %v11260_v20 = vand.u32 4294901760, %v7411_v2  ;;  %v11267_v2 = vand.u32 4294901760, %v7431_v7 }
 0x13f   :  { %5895 = vmatpush1.bf16.msra.mxu0 %v5894_v34  ;;  %v11247_v34 = vand.u32 4294901760, %v7347_v15  ;;  %11252 = vst [vmem:[#allocation32_spill] sm:$0xff] %v8911_v42  ;;  %v3157_v21 = vand.u32 4294901760, %v3156_v38  ;;  %v11254_v15 = vand.u32 4294901760, %v7390_v14  ;;  %v11256_v22 = vand.u32 4294901760, %v11255_v35  ;;  %v11262_v14 = vld [vmem:[#allocation54_spill] sm:$0xff] }
 0x140   :  { %5896 = vmatprep.subr.bf16.mxu0 %v10702_v55  ;;  %1831 = vmatmul.mubr.f32.gmra.mrb[22].mxu0 %v11246_v48  ;;  %v5900_v62 = vpack.c.bf16 %v11251_v52, %v11249_v59  ;;  %v409_v48 = vpop.f32.mrb[19].mxu1  ;;  %v11261_v38 = vand.u32 4294901760, %v7421_v24  ;;  %v11268_v24 = vld [vmem:[#allocation111_spill] sm:$0xff]  ;;  %v11276_v7 = vld [vmem:[#allocation178_spill] sm:$0xff]  ;;  %v11378_v42 = vld [vmem:[#allocation69_spill] sm:$0xff] }
 0x141   :  { %1838 = vmatprep.mubr.f32.mxu0 %v11247_v34  ;;  %5266 = vmatmul.mubr.f32.gmra.mrb[92].mxu1 %v3137_v44  ;;  %v8922_v56 = vpop.f32.mrb[20].mxu1  ;;  %v11270_v48 = vld [vmem:[#allocation185_spill] sm:$0xff] }
 0x142   :  { %5268 = vmatprep.mubr.f32.mxu1 %v3147_v6  ;;  %11259 = vst [vmem:[#allocation33_spill] sm:$0xff] %v8922_v56  ;;  %v424_v44 = vpop.f32.mrb[21].mxu1  ;;  %v11264_v6 = vld [vmem:[#allocation55_spill] sm:$0xff]  ;;  %v11377_v56 = vld [vmem:[#allocation209_spill] sm:$0xff] }
 0x143   :  { %5898 = vmatpush1.bf16.msra.mxu0 %v5897_v60  ;;  %v11257_v60 = vld [vmem:[#allocation47_spill] sm:$0xff]  ;;  %v11265_v59 = vand.u32 4294901760, %v11264_v6  ;;  %v11282_v6 = vld [vmem:[#allocation192_spill] sm:$0xff] }
 0x144   :  { %5899 = vmatprep.subr.bf16.mxu0 %v10702_v55  ;;  %1842 = vmatmul.mubr.f32.gmra.mrb[24].mxu0 %v11253_v53  ;;  %v11258_v47 = vand.u32 4294901760, %v11257_v60  ;;  %v8934_v52 = vpop.f32.mrb[22].mxu1 }
 0x145   :  { %1849 = vmatprep.mubr.f32.mxu0 %v11254_v15  ;;  %5269 = vmatmul.mubr.f32.gmra.mrb[94].mxu1 %v3157_v21  ;;  %11266 = vst [vmem:[#allocation35_spill] sm:$0xff] %v8934_v52  ;;  %v439_v53 = vpop.f32.mrb[23].mxu1  ;;  %v11269_v21 = vand.u32 4294901760, %v11268_v24  ;;  %v11271_v15 = vld [vmem:[#allocation56_spill] sm:$0xff]  ;;  %v11287_v24 = vld [vmem:[#allocation197_spill] sm:$0xff] }
 0x146   :  { %v5903_v34 = vpack.c.bf16 %v11258_v47, %v11256_v22  ;;  %5303 = vmatprep.mubr.f32.mxu1 %v8254_v19  ;;  %v11272_v35 = vand.u32 4294901760, %v11271_v15  ;;  %v11273_v22 = vld [vmem:[#allocation58_spill] sm:$0xff]  ;;  %v11288_v15 = vld [vmem:[#allocation117_spill] sm:$0xff] }
 0x147   :  { %5901 = vmatpush1.bf16.msra.mxu0 %v5900_v62  ;;  %v11263_v62 = vand.u32 4294901760, %v11262_v14  ;;  %v11274_v60 = vand.u32 4294901760, %v11273_v22  ;;  %v11290_v22 = vld [vmem:[#allocation198_spill] sm:$0xff]  ;;  %v11375_v52 = vld [vmem:[#allocation169_spill] sm:$0xff] }
 0x148   :  { %5902 = vmatprep.subr.bf16.mxu0 %v10702_v55  ;;  %1853 = vmatmul.mubr.f32.gmra.mrb[26].mxu0 %v11260_v20  ;;  %v11277_v20 = vld [vmem:[#allocation113_spill] sm:$0xff] }
 0x149   :  { %1860 = vmatprep.mubr.f32.mxu0 %v11261_v38  ;;  %v5906_v39 = vpack.c.bf16 %v11265_v59, %v11263_v62  ;;  %5304 = vmatmul.mubr.f32.vlgmr.msra.gmra.mrb[96].mxu1 %v8262_v28  ;;  %v5909_v47 = vpack.c.bf16 %v11274_v60, %v11272_v35  ;;  %v11278_v44 = vand.u32 4294901760, %v11277_v20  ;;  %v11279_v38 = vld [vmem:[#allocation189_spill] sm:$0xff]  ;;  %v11280_v62 = vld [vmem:[#allocation115_spill] sm:$0xff]  ;;  %v11289_v35 = vand.u32 4294901760, %v11288_v15 }
 0x14a   :  { %5306 = vmatprep.mubr.f32.mxu1 %v11270_v48  ;;  %6026 = vmatpush3.bf16.msra.mxu1 %v8148_v54  ;;  %v11281_v54 = vand.u32 4294901760, %v11280_v62  ;;  %v11301_v15 = vld [vmem:[#allocation125_spill] sm:$0xff] }
 0x14b   :  { %5904 = vmatpush1.bf16.msra.mxu0 %v5903_v34  ;;  %v8948_v34 = vpop.f32.mrb[24].mxu1  ;;  %6028 = vmatprep.subr.bf16.mxu1 %v11276_v7 }
 0x14c   :  { %5905 = vmatprep.subr.bf16.mxu0 %v10702_v55  ;;  %1864 = vmatmul.mubr.f32.gmra.mrb[28].mxu0 %v11267_v2  ;;  %11275 = vst [vmem:[#allocation38_spill] sm:$0xff] %v8948_v34  ;;  %v454_v14 = vpop.f32.mrb[25].mxu1  ;;  %v11285_v2 = vld [vmem:[#allocation116_spill] sm:$0xff]  ;;  %v11374_v34 = vld [vmem:[#allocation6_spill] sm:$0xff] }
 0x14d   :  { %1871 = vmatprep.mubr.f32.mxu0 %v11269_v21  ;;  %5307 = vmatmul.mubr.f32.gmra.mrb[98].mxu1 %v11279_v38  ;;  %v8959_v59 = vpop.f32.mrb[26].mxu1  ;;  %v11286_v53 = vand.u32 4294901760, %v11285_v2  ;;  %v11295_v14 = vld [vmem:[#allocation121_spill] sm:$0xff]  ;;  %v11299_v2 = vld [vmem:[#allocation124_spill] sm:$0xff] }
 0x14e   :  { %5309 = vmatprep.mubr.f32.mxu1 %v11282_v6  ;;  %6030 = vmatpush3.bf16.msra.mxu1 %v11276_v7  ;;  %11283 = vst [vmem:[#allocation40_spill] sm:$0xff] %v8959_v59  ;;  %v469_v21 = vpop.f32.mrb[27].mxu1  ;;  %v11293_v7 = vld [vmem:[#allocation39_spill] sm:$0xff]  ;;  %v11296_v62 = vand.u32 4294901760, %v11295_v14  ;;  %v11373_v59 = vld [vmem:[#allocation208_spill] sm:$0xff] }
 0x14f   :  { %5907 = vmatpush1.bf16.msra.mxu0 %v5906_v39  ;;  %v11284_v39 = vld [vmem:[#allocation181_spill] sm:$0xff]  ;;  %v11294_v20 = vand.u32 4294901760, %v11293_v7  ;;  %v11303_v7 = vld [vmem:[#allocation199_spill] sm:$0xff] }
 0x150   :  { %5908 = vmatprep.subr.bf16.mxu0 %v10702_v55  ;;  %1875 = vmatmul.mubr.f32.gmra.mrb[30].mxu0 %v11278_v44  ;;  %v8970_v60 = vpop.f32.mrb[28].mxu1 }
 0x151   :  { %1882 = vmatprep.mubr.f32.mxu0 %v11281_v54  ;;  %6032 = vmatprep.subr.bf16.mxu1 %v11284_v39  ;;  %11291 = vst [vmem:[#allocation42_spill] sm:$0xff] %v8970_v60  ;;  %v484_v44 = vpop.f32.mrb[29].mxu1  ;;  %v11372_v60 = vld [vmem:[#allocation61_spill] sm:$0xff] }
 0x152   :  { %5310 = vmatmul.mubr.f32.gmra.mrb[100].mxu1 %v11287_v24  ;;  %v11306_v44 = vld [vmem:[#allocation43_spill] sm:$0xff] }
 0x153   :  { %5910 = vmatpush1.bf16.msra.mxu0 %v5909_v47  ;;  %5312 = vmatprep.mubr.f32.mxu1 %v11290_v22  ;;  %v11292_v47 = vld [vmem:[#allocation184_spill] sm:$0xff]  ;;  %v11307_v14 = vand.u32 4294901760, %v11306_v44  ;;  %v11318_v44 = vld [vmem:[#allocation138_spill] sm:$0xff] }
 0x154   :  { %5911 = vmatprep.subr.bf16.mxu0 %v10702_v55  ;;  %1886 = vmatmul.mubr.f32.gmra.mrb[32].mxu0 %v11286_v53  ;;  %v8980_v54 = vpop.f32.mrb[30].mxu1  ;;  %v11300_v53 = vand.u32 4294901760, %v11299_v2  ;;  %v11309_v2 = vld [vmem:[#allocation130_spill] sm:$0xff] }
 0x155   :  { %1893 = vmatprep.mubr.f32.mxu0 %v11289_v35  ;;  %6034 = vmatpush3.bf16.msra.mxu1 %v11284_v39  ;;  %11297 = vst [vmem:[#allocation44_spill] sm:$0xff] %v8980_v54  ;;  %v11298_v39 = vld [vmem:[#allocation190_spill] sm:$0xff]  ;;  %v499_v21 = vpop.f32.mrb[31].mxu1  ;;  %v11302_v35 = vand.u32 4294901760, %v11301_v15  ;;  %v11313_v15 = vld [vmem:[#allocation49_spill] sm:$0xff]  ;;  %v11371_v54 = vld [vmem:[#allocation207_spill] sm:$0xff] }
 0x156   :  { %6036 = vmatprep.subr.bf16.mxu1 %v11292_v47  ;;  %5313 = vmatmul.mubr.f32.gmra.mrb[102].mxu1 %v8375_v63 }
 0x157   :  { %5315 = vmatprep.mubr.f32.mxu1 %v8380_v9 }
 0x158   :  { %1897 = vmatmul.mubr.f32.gmra.mrb[34].mxu0 %v11294_v20 }
 0x159   :  { %1904 = vmatprep.mubr.f32.mxu0 %v11296_v62  ;;  %6038 = vmatpush3.bf16.msra.mxu1 %v11292_v47  ;;  %v11304_v47 = vld [vmem:[#allocation127_spill] sm:$0xff]  ;;  %v11308_v62 = vld [vmem:[#allocation204_spill] sm:$0xff] }
 0x15a   :  { %6040 = vmatprep.subr.bf16.mxu1 %v11298_v39  ;;  %5316 = vmatmul.mubr.f32.gmra.mrb[104].mxu1 %v8382_v43  ;;  %v11305_v20 = vand.u32 4294901760, %v11304_v47  ;;  %v11452_v43 = vld [vmem:[#allocation176_spill] sm:$0xff] }
 0x15b   :  { %5318 = vmatprep.mubr.f32.mxu1 %v8455_v4  ;;  %v11437_v4 = vld [vmem:[#allocation104_spill] sm:$0xff] }
 0x15c   :  { %1908 = vmatmul.mubr.f32.gmra.mrb[36].mxu0 %v11300_v53  ;;  %v11310_v53 = vand.u32 4294901760, %v11309_v2 }
 0x15d   :  { %1915 = vmatprep.mubr.f32.mxu0 %v11302_v35  ;;  %6042 = vmatpush3.bf16.msra.mxu1 %v11298_v39  ;;  %v11311_v39 = vld [vmem:[#allocation133_spill] sm:$0xff]  ;;  %v11314_v35 = vand.u32 4294901760, %v11313_v15 }
 0x15e   :  { %6044 = vmatprep.subr.bf16.mxu1 %v11303_v7  ;;  %5319 = vmatmul.mubr.f32.gmra.mrb[106].mxu1 %v8462_v32  ;;  %v11312_v21 = vand.u32 4294901760, %v11311_v39  ;;  %v11426_v32 = vld [vmem:[#allocation99_spill] sm:$0xff] }
 0x15f   :  { %5321 = vmatprep.mubr.f32.mxu1 %v8465_v45  ;;  %v11420_v45 = vld [vmem:[#allocation96_spill] sm:$0xff] }
 0x160   :  { %1919 = vmatmul.mubr.f32.gmra.mrb[38].mxu0 %v11305_v20  ;;  %v11317_v20 = vld [vmem:[#allocation156_spill] sm:$0xff] }
 0x161   :  { %1926 = vmatprep.mubr.f32.mxu0 %v11307_v14  ;;  %6046 = vmatpush3.bf16.msra.mxu1 %v11303_v7  ;;  %v11315_v7 = vld [vmem:[#allocation134_spill] sm:$0xff]  ;;  %v11319_v14 = vand.u32 4294901760, %v11318_v44 }
 0x162   :  { %6048 = vmatprep.subr.bf16.mxu1 %v11308_v62  ;;  %5322 = vmatmul.mubr.f32.gmra.mrb[108].mxu1 %v8495_v41  ;;  %v11316_v47 = vand.u32 4294901760, %v11315_v7  ;;  %v11328_v7 = vld [vmem:[#allocation145_spill] sm:$0xff]  ;;  %v11330_v44 = vld [vmem:[#allocation70_spill] sm:$0xff] }
 0x163   :  { %5324 = vmatprep.mubr.f32.mxu1 %v8520_v50 }
 0x164   :  { %1930 = vmatmul.mubr.f32.gmra.mrb[40].mxu0 %v11310_v53  ;;  %v11322_v53 = vld [vmem:[#allocation141_spill] sm:$0xff] }
 0x165   :  { %1937 = vmatprep.mubr.f32.mxu0 %v11312_v21  ;;  %6050 = vmatpush3.bf16.msra.mxu1 %v11308_v62  ;;  %v11320_v62 = vld [vmem:[#allocation139_spill] sm:$0xff]  ;;  %v11323_v39 = vand.u32 4294901760, %v11322_v53  ;;  %v11324_v21 = vld [vmem:[#allocation53_spill] sm:$0xff]  ;;  %v11334_v53 = vld [vmem:[#allocation72_spill] sm:$0xff] }
 0x166   :  { %6052 = vmatprep.subr.bf16.mxu1 %v8438_v27  ;;  %5325 = vmatmul.mubr.f32.gmra.mrb[110].mxu1 %v8553_v11  ;;  %v11321_v2 = vand.u32 4294901760, %v11320_v62  ;;  %v11325_v15 = vand.u32 4294901760, %v11324_v21  ;;  %v11332_v62 = vld [vmem:[#allocation149_spill] sm:$0xff]  ;;  %v11336_v21 = vld [vmem:[#allocation151_spill] sm:$0xff] }
 0x167   :  { %5327 = vmatprep.mubr.f32.mxu1 %v8555_v23  ;;  %v11401_v23 = vld [vmem:[#allocation21_spill] sm:$0xff]  ;;  %v11403_v11 = vld [vmem:[#allocation171_spill] sm:$0xff] }
 0x168   :  { %1941 = vmatmul.mubr.f32.gmra.mrb[42].mxu0 %v11314_v35  ;;  %v11404_v50 = vand.u32 4294901760, %v11403_v11  ;;  %v11412_v11 = vld [vmem:[#allocation25_spill] sm:$0xff] }
 0x169   :  { %1948 = vmatprep.mubr.f32.mxu0 %v11316_v47  ;;  %6054 = vmatpush3.bf16.msra.mxu1 %v8438_v27  ;;  %v11326_v27 = vld [vmem:[#allocation144_spill] sm:$0xff]  ;;  %v11329_v47 = vand.u32 4294901760, %v11328_v7  ;;  %v11340_v7 = vld [vmem:[#allocation79_spill] sm:$0xff] }
 0x16a   :  { %6056 = vmatprep.subr.bf16.mxu1 %v11317_v20  ;;  %5328 = vmatmul.mubr.f32.gmra.mrb[112].mxu1 %v8588_v1  ;;  %v11327_v35 = vand.u32 4294901760, %v11326_v27  ;;  %v11338_v27 = vld [vmem:[#allocation153_spill] sm:$0xff] }
 0x16b   :  { %5330 = vmatprep.mubr.f32.mxu1 %v8601_v26  ;;  %v11399_v26 = vld [vmem:[#allocation86_spill] sm:$0xff]  ;;  %v11400_v1 = vld [vmem:[#allocation9_spill] sm:$0xff] }
 0x16c   :  { %1952 = vmatmul.mubr.f32.gmra.mrb[44].mxu0 %v11319_v14  ;;  %v11331_v14 = vand.u32 4294901760, %v11330_v44  ;;  %v11342_v44 = vld [vmem:[#allocation157_spill] sm:$0xff] }
 0x16d   :  { %1959 = vmatprep.mubr.f32.mxu0 %v11321_v2  ;;  %v11333_v2 = vand.u32 4294901760, %v11332_v62  ;;  %v11344_v62 = vld [vmem:[#allocation24_spill] sm:$0xff] }
 0x16e   :  { %5331 = vmatmul.mubr.f32.gmra.mrb[114].mxu1 %v8635_v36  ;;  %v11398_v36 = vld [vmem:[#allocation8_spill] sm:$0xff] }
 0x16f   :  { %5333 = vmatprep.mubr.f32.mxu1 %v8646_v57 }
 0x170   :  { %1963 = vmatmul.mubr.f32.gmra.mrb[46].mxu0 %v11323_v39  ;;  %v11335_v39 = vand.u32 4294901760, %v11334_v53 }
 0x171   :  { %1970 = vmatprep.mubr.f32.mxu0 %v11325_v15  ;;  %v11337_v15 = vand.u32 4294901760, %v11336_v21 }
 0x172   :  { %5334 = vmatmul.mubr.f32.gmra.mrb[116].mxu1 %v8660_v58  ;;  %v11394_v58 = vld [vmem:[#allocation16_spill] sm:$0xff] }
 0x173   :  { %5336 = vmatprep.mubr.f32.mxu1 %v8671_v0  ;;  %v11393_v0 = vld [vmem:[#allocation50_spill] sm:$0xff] }
 0x174   :  { %1974 = vmatmul.mubr.f32.gmra.mrb[48].mxu0 %v11327_v35  ;;  %v11339_v35 = vand.u32 4294901760, %v11338_v27 }
 0x175   :  { %1981 = vmatprep.mubr.f32.mxu0 %v11329_v47  ;;  %v11341_v47 = vand.u32 4294901760, %v11340_v7  ;;  %v11352_v7 = vld [vmem:[#allocation164_spill] sm:$0xff] }
 0x176   :  { %5337 = vmatmul.mubr.f32.gmra.mrb[118].mxu1 %v8698_v33  ;;  %v11392_v33 = vld [vmem:[#allocation81_spill] sm:$0xff] }
 0x177   :  { %5339 = vmatprep.mubr.f32.mxu1 %v8715_v3  ;;  %v11391_v3 = vld [vmem:[#allocation7_spill] sm:$0xff] }
 0x178   :  { %1985 = vmatmul.mubr.f32.gmra.mrb[50].mxu0 %v11331_v14  ;;  %v11343_v14 = vand.u32 4294901760, %v11342_v44  ;;  %v11354_v44 = vld [vmem:[#allocation191_spill] sm:$0xff] }
 0x179   :  { %1992 = vmatprep.mubr.f32.mxu0 %v11333_v2  ;;  %v11345_v2 = vld [vmem:[#allocation158_spill] sm:$0xff] }
 0x17a   :  { %5340 = vmatmul.mubr.f32.gmra.mrb[120].mxu1 %v8740_v17  ;;  %v11346_v53 = vand.u32 4294901760, %v11345_v2 }
 0x17b   :  { %5342 = vmatprep.mubr.f32.mxu1 %v8750_v16  ;;  %v11387_v16 = vld [vmem:[#allocation13_spill] sm:$0xff] }
 0x17c   :  { %1996 = vmatmul.mubr.f32.gmra.mrb[52].mxu0 %v11335_v39  ;;  %v11347_v39 = vld [vmem:[#allocation160_spill] sm:$0xff] }
 0x17d   :  { %2003 = vmatprep.mubr.f32.mxu0 %v11337_v15  ;;  %v11348_v21 = vand.u32 4294901760, %v11347_v39  ;;  %v11349_v15 = vld [vmem:[#allocation162_spill] sm:$0xff]  ;;  %v11358_v39 = vld [vmem:[#allocation167_spill] sm:$0xff] }
 0x17e   :  { %5343 = vmatmul.mubr.f32.gmra.mrb[122].mxu1 %v8777_v46  ;;  %v11350_v27 = vand.u32 4294901760, %v11349_v15  ;;  %v11361_v15 = vld [vmem:[#allocation196_spill] sm:$0xff] }
 0x17f   :  { %5345 = vmatprep.mubr.f32.mxu1 %v8785_v31  ;;  %v11385_v31 = vld [vmem:[#allocation76_spill] sm:$0xff] }
 0x180   :  { %2007 = vmatmul.mubr.f32.gmra.mrb[54].mxu0 %v11339_v35  ;;  %v11351_v35 = vld [vmem:[#allocation188_spill] sm:$0xff] }
 0x181   :  { %2014 = vmatprep.mubr.f32.mxu0 %v11341_v47  ;;  %v11353_v47 = vand.u32 4294901760, %v11352_v7  ;;  %v11363_v7 = vld [vmem:[#allocation200_spill] sm:$0xff] }
 0x182   :  { %5346 = vmatmul.mubr.f32.gmra.mrb[124].mxu1 %v11344_v62  ;;  %v11384_v62 = vld [vmem:[#allocation214_spill] sm:$0xff]  ;;  %v11386_v46 = vld [vmem:[#allocation216_spill] sm:$0xff] }
 0x183   :  { %5348 = vmatprep.mubr.f32.mxu1 %v8821_v29  ;;  %v11383_v29 = vld [vmem:[#allocation75_spill] sm:$0xff] }
 0x184   :  { %2018 = vmatmul.mubr.f32.gmra.mrb[56].mxu0 %v11343_v14  ;;  %v11355_v14 = vld [vmem:[#allocation101_spill] sm:$0xff] }
 0x185   :  { %2025 = vmatprep.mubr.f32.mxu0 %v11346_v53  ;;  %v11356_v2 = vand.u32 4294901760, %v11355_v14  ;;  %v11357_v53 = vld [vmem:[#allocation193_spill] sm:$0xff]  ;;  %v11365_v14 = vld [vmem:[#allocation52_spill] sm:$0xff] }
 0x186   :  { %5349 = vmatmul.mubr.f32.gmra.mrb[126].mxu1 %v8842_v12 }
 0x187   :  { %5383 = vmatprep.mubr.f32.mxu1 %v11351_v35 }
 0x188   :  { %2029 = vmatmul.mubr.f32.gmra.mrb[58].mxu0 %v11348_v21  ;;  %v11359_v21 = vld [vmem:[#allocation166_spill] sm:$0xff] }
 0x189   :  { %2036 = vmatprep.mubr.f32.mxu0 %v11350_v27  ;;  %v11360_v10 = vand.u32 4294901760, %v11359_v21  ;;  %v11362_v27 = vld [vmem:[#allocation48_spill] sm:$0xff]  ;;  %v11369_v21 = vld [vmem:[#allocation202_spill] sm:$0xff] }
 0x18a   :  { %5384 = vmatmul.mubr.f32.vlgmr.msra.gmra.mrb[128].mxu1 %v11354_v44 }
 0x18b   :  { %5386 = vmatprep.mubr.f32.mxu1 %v11357_v53  ;;  %6058 = vmatpush3.bf16.msra.mxu1 %v11317_v20 }
 0x18c   :  { %2040 = vmatmul.mubr.f32.gmra.mrb[60].mxu0 %v11353_v47  ;;  %6060 = vmatprep.subr.bf16.mxu1 %v11358_v39  ;;  %v11364_v47 = vld [vmem:[#allocation168_spill] sm:$0xff] }
 0x18d   :  { %2047 = vmatprep.mubr.f32.mxu0 %v11356_v2  ;;  %v11366_v2 = vld [vmem:[#allocation201_spill] sm:$0xff] }
 0x18e   :  { %5387 = vmatmul.mubr.f32.gmra.mrb[130].mxu1 %v11361_v15 }
 0x18f   :  { %5389 = vmatprep.mubr.f32.mxu1 %v11363_v7  ;;  %6062 = vmatpush3.bf16.msra.mxu1 %v11358_v39 }
 0x190   :  { %2051 = vmatmul.mubr.f32.gmra.mrb[62].mxu0 %v11360_v10  ;;  %6064 = vmatprep.subr.bf16.mxu1 %v11364_v47  ;;  %v11370_v10 = vld [vmem:[#allocation60_spill] sm:$0xff] }
 0x191   :  { %2217 = vmatprep.mubr.f32.mxu0 %v11362_v27 }
 0x192   :  { %5390 = vmatmul.mubr.f32.gmra.mrb[132].mxu1 %v11366_v2 }
 0x193   :  { %5392 = vmatprep.mubr.f32.mxu1 %v11369_v21  ;;  %6066 = vmatpush3.bf16.msra.mxu1 %v11364_v47 }
 0x194   :  { %2219 = vmatmul.mubr.f32.vlgmr.msra.gmra.mrb[0].mxu0 %v11365_v14  ;;  %6068 = vmatprep.subr.bf16.mxu1 %v11375_v52 }
 0x195   :  { %5913 = vmatpush1.bf16.msra.mxu0 %v11367_v40  ;;  %2224 = vmatprep.mubr.f32.mxu0 %v11368_v37  ;;  %v11376_v40 = vld [vmem:[#allocation68_spill] sm:$0xff] }
 0x196   :  { %5914 = vmatprep.subr.bf16.mxu0 %v10702_v55  ;;  %5393 = vmatmul.mubr.f32.gmra.mrb[134].mxu1 %v11371_v54 }
 0x197   :  { %5395 = vmatprep.mubr.f32.mxu1 %v11373_v59  ;;  %6070 = vmatpush3.bf16.msra.mxu1 %v11375_v52 }
 0x198   :  { %2226 = vmatmul.mubr.f32.gmra.mrb[2].mxu0 %v11370_v10  ;;  %6072 = vmatprep.subr.bf16.mxu1 %v11381_v18  ;;  %v9099_v12 = vpop.f32.mrb[32].mxu1 }
 0x199   :  { %2231 = vmatprep.mubr.f32.mxu0 %v11372_v60  ;;  %5916 = vmatpush1.bf16.msra.mxu0 %v11374_v34  ;;  %11382 = vst [vmem:[#allocation46_spill] sm:$0xff] %v9099_v12  ;;  %v1083_v34 = vpop.f32.mrb[33].mxu1 }
 0x19a   :  { %5917 = vmatprep.subr.bf16.mxu0 %v10702_v55  ;;  %5396 = vmatmul.mubr.f32.gmra.mrb[136].mxu1 %v11377_v56  ;;  %v11390_v34 = vld [vmem:[#allocation77_spill] sm:$0xff] }
 0x19b   :  { %5398 = vmatprep.mubr.f32.mxu1 %v11379_v30  ;;  %6074 = vmatpush3.bf16.msra.mxu1 %v11381_v18  ;;  %v11455_v18 = vand.u32 4294901760, %v11354_v44  ;;  %v11464_v44 = vld [vmem:[#allocation110_spill] sm:$0xff] }
 0x19c   :  { %2233 = vmatmul.mubr.f32.gmra.mrb[4].mxu0 %v11376_v40  ;;  %v9109_v17 = vpop.f32.mrb[34].mxu1 }
 0x19d   :  { %2238 = vmatprep.mubr.f32.mxu0 %v11378_v42  ;;  %5919 = vmatpush1.bf16.msra.mxu0 %v11380_v5  ;;  %v11388_v5 = vld [vmem:[#allocation173_spill] sm:$0xff]  ;;  %11389 = vst [vmem:[#allocation47_spill] sm:$0xff] %v9109_v17  ;;  %v1090_v12 = vpop.f32.mrb[35].mxu1  ;;  %v11450_v42 = vld [vmem:[#allocation175_spill] sm:$0xff] }
 0x19e   :  { %5920 = vmatprep.subr.bf16.mxu0 %v10702_v55  ;;  %5399 = vmatmul.mubr.f32.gmra.mrb[138].mxu1 %v11384_v62  ;;  %v11397_v12 = vld [vmem:[#allocation84_spill] sm:$0xff] }
 0x19f   :  { %5401 = vmatprep.mubr.f32.mxu1 %v11386_v46  ;;  %6076 = vmatprep.subr.bf16.mxu1 %v11388_v5 }
 0x1a0   :  { %2240 = vmatmul.mubr.f32.gmra.mrb[6].mxu0 %v11383_v29  ;;  %6078 = vmatpush3.bf16.msra.mxu1 %v11388_v5  ;;  %v9119_v57 = vpop.f32.mrb[36].mxu1  ;;  %v11430_v29 = vld [vmem:[#allocation37_spill] sm:$0xff]  ;;  %v11432_v5 = vld [vmem:[#allocation103_spill] sm:$0xff] }
 0x1a1   :  { %2245 = vmatprep.mubr.f32.mxu0 %v11385_v31  ;;  %5922 = vmatpush1.bf16.msra.mxu0 %v11387_v16  ;;  %v11395_v16 = vld [vmem:[#allocation174_spill] sm:$0xff]  ;;  %11396 = vst [vmem:[#allocation54_spill] sm:$0xff] %v9119_v57  ;;  %v1097_v17 = vpop.f32.mrb[37].mxu1  ;;  %v11405_v57 = vld [vmem:[#allocation172_spill] sm:$0xff] }
 0x1a2   :  { %5923 = vmatprep.subr.bf16.mxu0 %v10702_v55  ;;  %5402 = vmatmul.mubr.f32.gmra.mrb[140].mxu1 %v11391_v3  ;;  %v11424_v31 = vld [vmem:[#allocation34_spill] sm:$0xff] }
 0x1a3   :  { %5404 = vmatprep.mubr.f32.mxu1 %v11393_v0  ;;  %6080 = vmatprep.subr.bf16.mxu1 %v11395_v16 }
 0x1a4   :  { %2247 = vmatmul.mubr.f32.gmra.mrb[8].mxu0 %v11390_v34  ;;  %6082 = vmatpush3.bf16.msra.mxu1 %v11395_v16  ;;  %v9135_v34 = vpop.f32.mrb[38].mxu1  ;;  %v11411_v16 = vld [vmem:[#allocation10_spill] sm:$0xff] }
 0x1a5   :  { %2252 = vmatprep.mubr.f32.mxu0 %v11392_v33  ;;  %5925 = vmatpush1.bf16.msra.mxu0 %v11394_v58  ;;  %v11402_v58 = vld [vmem:[#allocation177_spill] sm:$0xff]  ;;  %v11406_v33 = vand.u32 4294901760, %v11405_v57  ;;  %11407 = vst [vmem:[#allocation55_spill] sm:$0xff] %v9135_v34  ;;  %v1104_v17 = vpop.f32.mrb[39].mxu1  ;;  %v11416_v34 = vld [vmem:[#allocation94_spill] sm:$0xff] }
 0x1a6   :  { %5926 = vmatprep.subr.bf16.mxu0 %v10702_v55  ;;  %5405 = vmatmul.mubr.f32.gmra.mrb[142].mxu1 %v11398_v36  ;;  %v11415_v17 = vld [vmem:[#allocation78_spill] sm:$0xff] }
 0x1a7   :  { %5407 = vmatprep.mubr.f32.mxu1 %v11400_v1  ;;  %6084 = vmatprep.subr.bf16.mxu1 %v11402_v58  ;;  %v9133_v41 = vpack.c.bf16 %v11406_v33, %v11404_v50  ;;  %v11414_v33 = vld [vmem:[#allocation93_spill] sm:$0xff] }
 0x1a8   :  { %2254 = vmatmul.mubr.f32.gmra.mrb[10].mxu0 %v11397_v12  ;;  %6086 = vmatpush3.bf16.msra.mxu1 %v11402_v58  ;;  %v11409_v12 = vld [vmem:[#allocation67_spill] sm:$0xff]  ;;  %v9145_v50 = vpop.f32.mrb[40].mxu1 }
 0x1a9   :  { %2259 = vmatprep.mubr.f32.mxu0 %v11399_v26  ;;  %5928 = vmatpush1.bf16.msra.mxu0 %v11401_v23  ;;  %v11408_v26 = vld [vmem:[#allocation88_spill] sm:$0xff]  ;;  %v11410_v23 = vld [vmem:[#allocation89_spill] sm:$0xff]  ;;  %11413 = vst [vmem:[#allocation111_spill] sm:$0xff] %v9145_v50  ;;  %v1111_v57 = vpop.f32.mrb[41].mxu1  ;;  %v11421_v50 = vld [vmem:[#allocation15_spill] sm:$0xff] }
 0x1aa   :  { %5929 = vmatprep.subr.bf16.mxu0 %v10702_v55  ;;  %5408 = vmatmul.mubr.f32.gmra.mrb[144].mxu1 %v11409_v12  ;;  %v11422_v57 = vld [vmem:[#allocation98_spill] sm:$0xff] }
 0x1ab   :  { %5410 = vmatprep.mubr.f32.mxu1 %v11411_v16  ;;  %6088 = vmatprep.subr.bf16.mxu1 %v9133_v41 }
 0x1ac   :  { %2261 = vmatmul.mubr.f32.gmra.mrb[12].mxu0 %v11408_v26  ;;  %v11417_v26 = vld [vmem:[#allocation80_spill] sm:$0xff]  ;;  %v9153_v58 = vpop.f32.mrb[42].mxu1 }
 0x1ad   :  { %2266 = vmatprep.mubr.f32.mxu0 %v11410_v23  ;;  %5931 = vmatpush1.bf16.msra.mxu0 %v11412_v11  ;;  %v11418_v23 = vld [vmem:[#allocation29_spill] sm:$0xff]  ;;  %11419 = vst [vmem:[#allocation185_spill] sm:$0xff] %v9153_v58  ;;  %v1118_v11 = vpop.f32.mrb[43].mxu1  ;;  %v11427_v58 = vld [vmem:[#allocation18_spill] sm:$0xff] }
 0x1ae   :  { %5932 = vmatprep.subr.bf16.mxu0 %v10702_v55  ;;  %5411 = vmatmul.mubr.f32.gmra.mrb[146].mxu1 %v11415_v17  ;;  %v11428_v11 = vld [vmem:[#allocation102_spill] sm:$0xff] }
 0x1af   :  { %5413 = vmatprep.mubr.f32.mxu1 %v11417_v26 }
 0x1b0   :  { %2268 = vmatmul.mubr.f32.gmra.mrb[14].mxu0 %v11414_v33  ;;  %v11423_v33 = vld [vmem:[#allocation83_spill] sm:$0xff] }
 0x1b1   :  { %2273 = vmatprep.mubr.f32.mxu0 %v11416_v34  ;;  %5934 = vmatpush1.bf16.msra.mxu0 %v11418_v23  ;;  %v9161_v34 = vpop.f32.mrb[44].mxu1 }
 0x1b2   :  { %5935 = vmatprep.subr.bf16.mxu0 %v10702_v55  ;;  %5414 = vmatmul.mubr.f32.gmra.mrb[148].mxu1 %v11421_v50  ;;  %11425 = vst [vmem:[#allocation56_spill] sm:$0xff] %v9161_v34  ;;  %v1125_v23 = vpop.f32.mrb[45].mxu1  ;;  %v11433_v34 = vld [vmem:[#allocation20_spill] sm:$0xff] }
 0x1b3   :  { %5416 = vmatprep.mubr.f32.mxu1 %v11423_v33  ;;  %v11434_v23 = vld [vmem:[#allocation22_spill] sm:$0xff] }
 0x1b4   :  { %2275 = vmatmul.mubr.f32.gmra.mrb[16].mxu0 %v11420_v45  ;;  %v11429_v45 = vld [vmem:[#allocation90_spill] sm:$0xff] }
 0x1b5   :  { %2280 = vmatprep.mubr.f32.mxu0 %v11422_v57  ;;  %5937 = vmatpush1.bf16.msra.mxu0 %v11424_v31  ;;  %v9169_v57 = vpop.f32.mrb[46].mxu1 }
 0x1b6   :  { %5938 = vmatprep.subr.bf16.mxu0 %v10702_v55  ;;  %5417 = vmatmul.mubr.f32.gmra.mrb[150].mxu1 %v11427_v58  ;;  %11431 = vst [vmem:[#allocation58_spill] sm:$0xff] %v9169_v57  ;;  %v1132_v31 = vpop.f32.mrb[47].mxu1  ;;  %v11439_v57 = vld [vmem:[#allocation45_spill] sm:$0xff] }
 0x1b7   :  { %5419 = vmatprep.mubr.f32.mxu1 %v11429_v45  ;;  %v11438_v31 = vld [vmem:[#allocation105_spill] sm:$0xff] }
 0x1b8   :  { %2282 = vmatmul.mubr.f32.gmra.mrb[18].mxu0 %v11426_v32  ;;  %v11435_v32 = vld [vmem:[#allocation41_spill] sm:$0xff] }
 0x1b9   :  { %2287 = vmatprep.mubr.f32.mxu0 %v11428_v11  ;;  %5940 = vmatpush1.bf16.msra.mxu0 %v11430_v29  ;;  %v9177_v11 = vpop.f32.mrb[48].mxu1 }
 0x1ba   :  { %5941 = vmatprep.subr.bf16.mxu0 %v10702_v55  ;;  %5420 = vmatmul.mubr.f32.gmra.mrb[152].mxu1 %v11433_v34  ;;  %11436 = vst [vmem:[#allocation178_spill] sm:$0xff] %v9177_v11  ;;  %v1139_v29 = vpop.f32.mrb[49].mxu1  ;;  %v11443_v11 = vld [vmem:[#allocation51_spill] sm:$0xff] }
 0x1bb   :  { %5422 = vmatprep.mubr.f32.mxu1 %v8783_v49  ;;  %v11442_v29 = vld [vmem:[#allocation106_spill] sm:$0xff] }
 0x1bc   :  { %2289 = vmatmul.mubr.f32.gmra.mrb[20].mxu0 %v11432_v5  ;;  %v11441_v5 = vld [vmem:[#allocation26_spill] sm:$0xff] }
 0x1bd   :  { %2294 = vmatprep.mubr.f32.mxu0 %v11434_v23  ;;  %5943 = vmatpush1.bf16.msra.mxu0 %v11435_v32  ;;  %v9185_v23 = vpop.f32.mrb[50].mxu1 }
 0x1be   :  { %5944 = vmatprep.subr.bf16.mxu0 %v10702_v55  ;;  %5423 = vmatmul.mubr.f32.gmra.mrb[154].mxu1 %v8808_v61  ;;  %11440 = vst [vmem:[#allocation113_spill] sm:$0xff] %v9185_v23  ;;  %v1146_v32 = vpop.f32.mrb[51].mxu1  ;;  %v11447_v23 = vand.u32 4294901760, %v11351_v35  ;;  %v11457_v35 = vand.u32 4294901760, %v11357_v53  ;;  %v11465_v53 = vand.u32 4294901760, %v11361_v15  ;;  %v11475_v15 = vand.u32 4294901760, %v11366_v2 }
 0x1bf   :  { %5425 = vmatprep.mubr.f32.mxu1 %v8819_v8  ;;  %v11446_v32 = vld [vmem:[#allocation108_spill] sm:$0xff]  ;;  %v11484_v2 = vand.u32 4294901760, %v11371_v54  ;;  %v11493_v54 = vand.u32 4294901760, %v11377_v56 }
 0x1c0   :  { %2296 = vmatmul.mubr.f32.gmra.mrb[22].mxu0 %v11437_v4  ;;  %v11445_v4 = vld [vmem:[#allocation107_spill] sm:$0xff] }
 0x1c1   :  { %2301 = vmatprep.mubr.f32.mxu0 %v11438_v31  ;;  %5946 = vmatpush1.bf16.msra.mxu0 %v11439_v57  ;;  %v9193_v31 = vpop.f32.mrb[52].mxu1 }
 0x1c2   :  { %5947 = vmatprep.subr.bf16.mxu0 %v10702_v55  ;;  %5426 = vmatmul.mubr.f32.gmra.mrb[156].mxu1 %v8840_v13  ;;  %11444 = vst [vmem:[#allocation189_spill] sm:$0xff] %v9193_v31  ;;  %v1153_v57 = vpop.f32.mrb[53].mxu1  ;;  %v11453_v31 = vand.u32 4294901760, %v11452_v43  ;;  %v11460_v43 = vld [vmem:[#allocation179_spill] sm:$0xff] }
 0x1c3   :  { %5428 = vmatprep.mubr.f32.mxu1 %v8851_v51 }
 0x1c4   :  { %2303 = vmatmul.mubr.f32.gmra.mrb[24].mxu0 %v11441_v5  ;;  %v11448_v5 = vld [vmem:[#allocation62_spill] sm:$0xff] }
 0x1c5   :  { %2308 = vmatprep.mubr.f32.mxu0 %v11442_v29  ;;  %5949 = vmatpush1.bf16.msra.mxu0 %v11443_v11  ;;  %v9202_v29 = vpop.f32.mrb[54].mxu1  ;;  %v11451_v11 = vand.u32 4294901760, %v11450_v42 }
 0x1c6   :  { %5950 = vmatprep.subr.bf16.mxu0 %v10702_v55  ;;  %5429 = vmatmul.mubr.f32.gmra.mrb[158].mxu1 %v8867_v25  ;;  %11449 = vst [vmem:[#allocation115_spill] sm:$0xff] %v9202_v29  ;;  %v1160_v57 = vpop.f32.mrb[55].mxu1  ;;  %v11474_v29 = vld [vmem:[#allocation36_spill] sm:$0xff] }
 0x1c7   :  { %5463 = vmatprep.mubr.f32.mxu1 %v11447_v23  ;;  %v6091_v40 = vpack.c.bf16 %v11453_v31, %v11451_v11  ;;  %v11461_v23 = vand.u32 4294901760, %v11460_v43  ;;  %v11462_v31 = vld [vmem:[#allocation180_spill] sm:$0xff] }
 0x1c8   :  { %2310 = vmatmul.mubr.f32.gmra.mrb[26].mxu0 %v11445_v4  ;;  %v11454_v4 = vld [vmem:[#allocation109_spill] sm:$0xff]  ;;  %v9217_v42 = vpop.f32.mrb[56].mxu1  ;;  %v11463_v11 = vand.u32 4294901760, %v11462_v31 }
 0x1c9   :  { %2315 = vmatprep.mubr.f32.mxu0 %v11446_v32  ;;  %5952 = vmatpush1.bf16.msra.mxu0 %v11448_v5  ;;  %v11456_v32 = vld [vmem:[#allocation31_spill] sm:$0xff]  ;;  %v11458_v5 = vld [vmem:[#allocation64_spill] sm:$0xff]  ;;  %11459 = vst [vmem:[#allocation192_spill] sm:$0xff] %v9217_v42 }
 0x1ca   :  { %5953 = vmatprep.subr.bf16.mxu0 %v10702_v55  ;;  %5464 = vmatmul.mubr.f32.vlgmr.msra.gmra.mrb[160].mxu1 %v11455_v18  ;;  %v6095_v57 = vpack.c.bf16 %v11463_v11, %v11461_v23  ;;  %v1167_v18 = vpop.f32.mrb[57].mxu1  ;;  %v11470_v23 = vld [vmem:[#allocation182_spill] sm:$0xff] }
 0x1cb   :  { %5466 = vmatprep.mubr.f32.mxu1 %v11457_v35  ;;  %6090 = vmatpush3.bf16.msra.mxu1 %v9133_v41  ;;  %v11466_v35 = vld [vmem:[#allocation112_spill] sm:$0xff]  ;;  %v11467_v41 = vand.u32 4294901760, %v11363_v7  ;;  %v11471_v31 = vand.u32 4294901760, %v11470_v23  ;;  %v11477_v7 = vand.u32 4294901760, %v11369_v21  ;;  %v11481_v23 = vld [vmem:[#allocation187_spill] sm:$0xff]  ;;  %v11486_v21 = vand.u32 4294901760, %v11373_v59 }
 0x1cc   :  { %2317 = vmatmul.mubr.f32.gmra.mrb[28].mxu0 %v11454_v4  ;;  %6092 = vmatprep.subr.bf16.mxu1 %v6091_v40  ;;  %v9231_v43 = vpop.f32.mrb[58].mxu1  ;;  %v11495_v59 = vand.u32 4294901760, %v11379_v30  ;;  %v11505_v30 = vand.u32 4294901760, %v11386_v46  ;;  %v11515_v46 = vand.u32 4294901760, %v11393_v0  ;;  %v11523_v0 = vld [vmem:[#allocation135_spill] sm:$0xff] }
 0x1cd   :  { %2322 = vmatprep.mubr.f32.mxu0 %v11456_v32  ;;  %5955 = vmatpush1.bf16.msra.mxu0 %v11458_v5  ;;  %v11468_v5 = vld [vmem:[#allocation71_spill] sm:$0xff]  ;;  %11469 = vst [vmem:[#allocation181_spill] sm:$0xff] %v9231_v43  ;;  %v1174_v42 = vpop.f32.mrb[59].mxu1  ;;  %v11511_v43 = vld [vmem:[#allocation128_spill] sm:$0xff] }
 0x1ce   :  { %5956 = vmatprep.subr.bf16.mxu0 %v10702_v55  ;;  %5467 = vmatmul.mubr.f32.gmra.mrb[162].mxu1 %v11465_v53  ;;  %v11472_v55 = vld [vmem:[#allocation183_spill] sm:$0xff]  ;;  %v11476_v53 = vld [vmem:[#allocation114_spill] sm:$0xff] }
 0x1cf   :  { %5469 = vmatprep.mubr.f32.mxu1 %v11467_v41  ;;  %6094 = vmatpush3.bf16.msra.mxu1 %v6091_v40  ;;  %v11473_v11 = vand.u32 4294901760, %v11472_v55  ;;  %v11479_v41 = vld [vmem:[#allocation186_spill] sm:$0xff]  ;;  %v11482_v55 = vand.u32 4294901760, %v11481_v23 }
 0x1d0   :  { %2324 = vmatmul.mubr.f32.gmra.mrb[30].mxu0 %v11464_v44  ;;  %6096 = vmatprep.subr.bf16.mxu1 %v6095_v57  ;;  %v9243_v40 = vpop.f32.mrb[60].mxu1 }
 0x1d1   :  { %2329 = vmatprep.mubr.f32.mxu0 %v11466_v35  ;;  %5958 = vmatpush1.bf16.msra.mxu0 %v11468_v5  ;;  %v6099_v18 = vpack.c.bf16 %v11473_v11, %v11471_v31  ;;  %11478 = vst [vmem:[#allocation116_spill] sm:$0xff] %v9243_v40  ;;  %v11480_v5 = vand.u32 4294901760, %v11479_v41  ;;  %v1181_v42 = vpop.f32.mrb[61].mxu1  ;;  %v11483_v11 = vld [vmem:[#allocation118_spill] sm:$0xff]  ;;  %v11490_v40 = vld [vmem:[#allocation195_spill] sm:$0xff] }
 0x1d2   :  { %5470 = vmatmul.mubr.f32.gmra.mrb[164].mxu1 %v11475_v15  ;;  %v11485_v15 = vld [vmem:[#allocation119_spill] sm:$0xff]  ;;  %v11491_v23 = vand.u32 4294901760, %v11490_v40  ;;  %v11492_v42 = vld [vmem:[#allocation120_spill] sm:$0xff] }
 0x1d3   :  { %5472 = vmatprep.mubr.f32.mxu1 %v11477_v7  ;;  %6098 = vmatpush3.bf16.msra.mxu1 %v6095_v57  ;;  %v6103_v31 = vpack.c.bf16 %v11482_v55, %v11480_v5  ;;  %v11488_v7 = vld [vmem:[#allocation194_spill] sm:$0xff] }
 0x1d4   :  { %2331 = vmatmul.mubr.f32.gmra.mrb[32].mxu0 %v11474_v29  ;;  %6100 = vmatprep.subr.bf16.mxu1 %v6099_v18  ;;  %v9255_v57 = vpop.f32.mrb[62].mxu1  ;;  %v11489_v41 = vand.u32 4294901760, %v11488_v7 }
 0x1d5   :  { %2336 = vmatprep.mubr.f32.mxu0 %v11476_v53  ;;  %11487 = vst [vmem:[#allocation197_spill] sm:$0xff] %v9255_v57  ;;  %v1188_v55 = vpop.f32.mrb[63].mxu1  ;;  %v11499_v57 = vld [vmem:[#allocation4_spill] sm:$0xff] }
 0x1d6   :  { %5473 = vmatmul.mubr.f32.gmra.mrb[166].mxu1 %v11484_v2  ;;  %v6107_v5 = vpack.c.bf16 %v11491_v23, %v11489_v41  ;;  %v11494_v2 = vld [vmem:[#allocation122_spill] sm:$0xff]  ;;  %v11500_v40 = vand.u32 4294901760, %v11499_v57  ;;  %v11501_v23 = vld [vmem:[#allocation123_spill] sm:$0xff]  ;;  %v11502_v55 = vand.u32 4294901760, %v11384_v62  ;;  %v11512_v62 = vand.u32 4294901760, %v11391_v3  ;;  %v11520_v3 = vld [vmem:[#allocation132_spill] sm:$0xff] }
 0x1d7   :  { %5475 = vmatprep.mubr.f32.mxu1 %v11486_v21  ;;  %6102 = vmatpush3.bf16.msra.mxu1 %v6099_v18  ;;  %v11497_v21 = vld [vmem:[#allocation3_spill] sm:$0xff]  ;;  %v11509_v57 = vld [vmem:[#allocation206_spill] sm:$0xff] }
 0x1d8   :  { %2338 = vmatmul.mubr.f32.gmra.mrb[34].mxu0 %v11483_v11  ;;  %6104 = vmatprep.subr.bf16.mxu1 %v6103_v31  ;;  %v9267_v18 = vpop.f32.mrb[64].mxu1  ;;  %v11498_v7 = vand.u32 4294901760, %v11497_v21 }
 0x1d9   :  { %2343 = vmatprep.mubr.f32.mxu0 %v11485_v15  ;;  %11496 = vst [vmem:[#allocation117_spill] sm:$0xff] %v9267_v18  ;;  %v9276_v56 = vpop.f32.mrb[65].mxu1  ;;  %v11514_v18 = vld [vmem:[#allocation129_spill] sm:$0xff] }
 0x1da   :  { %5476 = vmatmul.mubr.f32.gmra.mrb[168].mxu1 %v11493_v54  ;;  %v6111_v41 = vpack.c.bf16 %v11500_v40, %v11498_v7  ;;  %11503 = vst [vmem:[#allocation198_spill] sm:$0xff] %v9276_v56  ;;  %v11504_v54 = vld [vmem:[#allocation126_spill] sm:$0xff]  ;;  %v11510_v7 = vand.u32 4294901760, %v11509_v57  ;;  %v11521_v57 = vand.u32 4294901760, %v11400_v1  ;;  %v11529_v1 = vld [vmem:[#allocation137_spill] sm:$0xff]  ;;  %v11621_v56 = vld [vmem:[#allocation96_spill] sm:$0xff] }
 0x1db   :  { %5478 = vmatprep.mubr.f32.mxu1 %v11495_v59  ;;  %6106 = vmatpush3.bf16.msra.mxu1 %v6103_v31  ;;  %v11507_v59 = vld [vmem:[#allocation205_spill] sm:$0xff] }
 0x1dc   :  { %2345 = vmatmul.mubr.f32.gmra.mrb[36].mxu0 %v11492_v42  ;;  %6108 = vmatprep.subr.bf16.mxu1 %v6107_v5  ;;  %v9281_v31 = vpop.f32.mrb[66].mxu1  ;;  %v11508_v21 = vand.u32 4294901760, %v11507_v59  ;;  %v11518_v59 = vand.u32 4294901760, %v11398_v36  ;;  %v11526_v36 = vld [vmem:[#allocation136_spill] sm:$0xff] }
 0x1dd   :  { %2350 = vmatprep.mubr.f32.mxu0 %v11494_v2  ;;  %11506 = vst [vmem:[#allocation184_spill] sm:$0xff] %v9281_v31  ;;  %v11607_v31 = vld [vmem:[#allocation217_spill] sm:$0xff] }
 0x1de   :  { %5479 = vmatmul.mubr.f32.gmra.mrb[170].mxu1 %v11502_v55  ;;  %v6115_v40 = vpack.c.bf16 %v11510_v7, %v11508_v21  ;;  %v9290_v55 = vpop.f32.mrb[67].mxu1 }
 0x1df   :  { %5481 = vmatprep.mubr.f32.mxu1 %v11505_v30  ;;  %6110 = vmatpush3.bf16.msra.mxu1 %v6107_v5  ;;  %11513 = vst [vmem:[#allocation39_spill] sm:$0xff] %v9290_v55  ;;  %v11517_v30 = vld [vmem:[#allocation131_spill] sm:$0xff]  ;;  %v11612_v55 = vld [vmem:[#allocation89_spill] sm:$0xff] }
 0x1e0   :  { %2352 = vmatmul.mubr.f32.gmra.mrb[38].mxu0 %v11501_v23  ;;  %6112 = vmatprep.subr.bf16.mxu1 %v6111_v41  ;;  %v9295_v5 = vpop.f32.mrb[68].mxu1 }
 0x1e1   :  { %2357 = vmatprep.mubr.f32.mxu0 %v11504_v54  ;;  %11516 = vst [vmem:[#allocation121_spill] sm:$0xff] %v9295_v5  ;;  %v9300_v21 = vpop.f32.mrb[69].mxu1  ;;  %v11602_v5 = vld [vmem:[#allocation177_spill] sm:$0xff] }
 0x1e2   :  { %5482 = vmatmul.mubr.f32.gmra.mrb[172].mxu1 %v11512_v62  ;;  %11519 = vst [vmem:[#allocation190_spill] sm:$0xff] %v9300_v21  ;;  %v11604_v21 = vld [vmem:[#allocation59_spill] sm:$0xff] }
 0x1e3   :  { %5484 = vmatprep.mubr.f32.mxu1 %v11515_v46  ;;  %6114 = vmatpush3.bf16.msra.mxu1 %v6111_v41  ;;  %v11524_v41 = vand.u32 4294901760, %v11409_v12  ;;  %v11527_v46 = vand.u32 4294901760, %v11411_v16  ;;  %v11533_v12 = vand.u32 4294901760, %v11417_v26  ;;  %v11536_v16 = vand.u32 4294901760, %v11421_v50 }
 0x1e4   :  { %2359 = vmatmul.mubr.f32.gmra.mrb[40].mxu0 %v11511_v43  ;;  %6116 = vmatprep.subr.bf16.mxu1 %v6115_v40  ;;  %v11542_v26 = vand.u32 4294901760, %v11427_v58  ;;  %v11545_v50 = vand.u32 4294901760, %v11429_v45  ;;  %v11551_v58 = vand.u32 4294901760, %v8783_v49  ;;  %v11554_v45 = vand.u32 4294901760, %v8808_v61 }
 0x1e5   :  { %2364 = vmatprep.mubr.f32.mxu0 %v11514_v18  ;;  %v9305_v7 = vpop.f32.mrb[70].mxu1  ;;  %v11560_v49 = vand.u32 4294901760, %v8840_v13  ;;  %v11563_v61 = vand.u32 4294901760, %v8851_v51 }
 0x1e6   :  { %5485 = vmatmul.mubr.f32.gmra.mrb[174].mxu1 %v11518_v59  ;;  %11522 = vst [vmem:[#allocation124_spill] sm:$0xff] %v9305_v7  ;;  %v9311_v62 = vpop.f32.mrb[71].mxu1  ;;  %v11532_v7 = vld [vmem:[#allocation140_spill] sm:$0xff] }
 0x1e7   :  { %5487 = vmatprep.mubr.f32.mxu1 %v11521_v57  ;;  %6118 = vmatpush3.bf16.msra.mxu1 %v6115_v40  ;;  %11525 = vst [vmem:[#allocation125_spill] sm:$0xff] %v9311_v62  ;;  %v11530_v40 = vand.u32 4294901760, %v11415_v17  ;;  %v11535_v62 = vld [vmem:[#allocation142_spill] sm:$0xff]  ;;  %v11539_v17 = vand.u32 4294901760, %v11423_v33  ;;  %v11548_v33 = vand.u32 4294901760, %v11433_v34  ;;  %v11557_v34 = vand.u32 4294901760, %v8819_v8 }
 0x1e8   :  { %2366 = vmatmul.mubr.f32.gmra.mrb[42].mxu0 %v11517_v30  ;;  %6120 = vmatprep.subr.bf16.mxu1 %v11317_v20  ;;  %v11566_v8 = vand.u32 4294901760, %v8867_v25 }
 0x1e9   :  { %2371 = vmatprep.mubr.f32.mxu0 %v11520_v3 }
 0x1ea   :  { %5488 = vmatmul.mubr.f32.gmra.mrb[176].mxu1 %v11524_v41  ;;  %v9316_v59 = vpop.f32.mrb[72].mxu1 }
 0x1eb   :  { %5490 = vmatprep.mubr.f32.mxu1 %v11527_v46  ;;  %11528 = vst [vmem:[#allocation199_spill] sm:$0xff] %v9316_v59  ;;  %v9321_v57 = vpop.f32.mrb[73].mxu1  ;;  %v11538_v59 = vld [vmem:[#allocation143_spill] sm:$0xff] }
 0x1ec   :  { %2373 = vmatmul.mubr.f32.gmra.mrb[44].mxu0 %v11523_v0  ;;  %11531 = vst [vmem:[#allocation127_spill] sm:$0xff] %v9321_v57  ;;  %v11541_v57 = vld [vmem:[#allocation63_spill] sm:$0xff] }
 0x1ed   :  { %2378 = vmatprep.mubr.f32.mxu0 %v11526_v36 }
 0x1ee   :  { %5491 = vmatmul.mubr.f32.gmra.mrb[178].mxu1 %v11530_v40  ;;  %v9326_v41 = vpop.f32.mrb[74].mxu1 }
 0x1ef   :  { %5493 = vmatprep.mubr.f32.mxu1 %v11533_v12  ;;  %11534 = vst [vmem:[#allocation43_spill] sm:$0xff] %v9326_v41  ;;  %v9331_v46 = vpop.f32.mrb[75].mxu1  ;;  %v11544_v41 = vld [vmem:[#allocation146_spill] sm:$0xff] }
 0x1f0   :  { %2380 = vmatmul.mubr.f32.gmra.mrb[46].mxu0 %v11529_v1  ;;  %11537 = vst [vmem:[#allocation204_spill] sm:$0xff] %v9331_v46  ;;  %v11547_v46 = vld [vmem:[#allocation147_spill] sm:$0xff] }
 0x1f1   :  { %2385 = vmatprep.mubr.f32.mxu0 %v11532_v7 }
 0x1f2   :  { %5494 = vmatmul.mubr.f32.gmra.mrb[180].mxu1 %v11536_v16  ;;  %v9336_v40 = vpop.f32.mrb[76].mxu1 }
 0x1f3   :  { %5496 = vmatprep.mubr.f32.mxu1 %v11539_v17  ;;  %11540 = vst [vmem:[#allocation130_spill] sm:$0xff] %v9336_v40  ;;  %v9341_v12 = vpop.f32.mrb[77].mxu1  ;;  %v11550_v40 = vld [vmem:[#allocation148_spill] sm:$0xff] }
 0x1f4   :  { %2387 = vmatmul.mubr.f32.gmra.mrb[48].mxu0 %v11535_v62  ;;  %11543 = vst [vmem:[#allocation133_spill] sm:$0xff] %v9341_v12  ;;  %v11553_v12 = vld [vmem:[#allocation150_spill] sm:$0xff] }
 0x1f5   :  { %2392 = vmatprep.mubr.f32.mxu0 %v11538_v59 }
 0x1f6   :  { %5497 = vmatmul.mubr.f32.gmra.mrb[182].mxu1 %v11542_v26  ;;  %v9346_v16 = vpop.f32.mrb[78].mxu1 }
 0x1f7   :  { %5499 = vmatprep.mubr.f32.mxu1 %v11545_v50  ;;  %11546 = vst [vmem:[#allocation49_spill] sm:$0xff] %v9346_v16  ;;  %v9351_v17 = vpop.f32.mrb[79].mxu1  ;;  %v11556_v16 = vld [vmem:[#allocation152_spill] sm:$0xff] }
 0x1f8   :  { %2394 = vmatmul.mubr.f32.gmra.mrb[50].mxu0 %v11541_v57  ;;  %11549 = vst [vmem:[#allocation134_spill] sm:$0xff] %v9351_v17  ;;  %v11559_v17 = vld [vmem:[#allocation154_spill] sm:$0xff] }
 0x1f9   :  { %2399 = vmatprep.mubr.f32.mxu0 %v11544_v41 }
 0x1fa   :  { %5500 = vmatmul.mubr.f32.gmra.mrb[184].mxu1 %v11548_v33 }
 0x1fb   :  { %5502 = vmatprep.mubr.f32.mxu1 %v11551_v58 }
 0x1fc   :  { %2401 = vmatmul.mubr.f32.gmra.mrb[52].mxu0 %v11547_v46  ;;  %v9356_v26 = vpop.f32.mrb[80].mxu1 }
 0x1fd   :  { %2406 = vmatprep.mubr.f32.mxu0 %v11550_v40  ;;  %11552 = vst [vmem:[#allocation156_spill] sm:$0xff] %v9356_v26  ;;  %v9361_v50 = vpop.f32.mrb[81].mxu1  ;;  %v11562_v26 = vld [vmem:[#allocation155_spill] sm:$0xff] }
 0x1fe   :  { %5503 = vmatmul.mubr.f32.gmra.mrb[186].mxu1 %v11554_v45  ;;  %11555 = vst [vmem:[#allocation138_spill] sm:$0xff] %v9361_v50  ;;  %v11565_v50 = vld [vmem:[#allocation82_spill] sm:$0xff] }
 0x1ff   :  { %5505 = vmatprep.mubr.f32.mxu1 %v11557_v34 }
 0x200   :  { %2408 = vmatmul.mubr.f32.gmra.mrb[54].mxu0 %v11553_v12  ;;  %v9366_v33 = vpop.f32.mrb[82].mxu1  ;;  %v11647_v12 = vld [vmem:[#allocation106_spill] sm:$0xff] }
 0x201   :  { %2413 = vmatprep.mubr.f32.mxu0 %v11556_v16  ;;  %11558 = vst [vmem:[#allocation139_spill] sm:$0xff] %v9366_v33  ;;  %v9371_v58 = vpop.f32.mrb[83].mxu1  ;;  %v11568_v33 = vld [vmem:[#allocation159_spill] sm:$0xff]  ;;  %v11645_v16 = vld [vmem:[#allocation26_spill] sm:$0xff] }
 0x202   :  { %5506 = vmatmul.mubr.f32.gmra.mrb[188].mxu1 %v11560_v49  ;;  %11561 = vst [vmem:[#allocation141_spill] sm:$0xff] %v9371_v58  ;;  %v11570_v49 = vld [vmem:[#allocation161_spill] sm:$0xff] }
 0x203   :  { %5508 = vmatprep.mubr.f32.mxu1 %v11563_v61  ;;  %v11572_v61 = vld [vmem:[#allocation163_spill] sm:$0xff]  ;;  %v11600_v58 = vld [vmem:[#allocation5_spill] sm:$0xff] }
 0x204   :  { %2415 = vmatmul.mubr.f32.gmra.mrb[56].mxu0 %v11559_v17  ;;  %v9376_v45 = vpop.f32.mrb[84].mxu1  ;;  %v11642_v17 = vld [vmem:[#allocation105_spill] sm:$0xff] }
 0x205   :  { %2420 = vmatprep.mubr.f32.mxu0 %v11562_v26  ;;  %11564 = vst [vmem:[#allocation53_spill] sm:$0xff] %v9376_v45  ;;  %v9381_v34 = vpop.f32.mrb[85].mxu1  ;;  %v11597_v45 = vld [vmem:[#allocation215_spill] sm:$0xff]  ;;  %v11639_v26 = vld [vmem:[#allocation104_spill] sm:$0xff] }
 0x206   :  { %5509 = vmatmul.mubr.f32.gmra.mrb[190].mxu1 %v11566_v8  ;;  %11567 = vst [vmem:[#allocation144_spill] sm:$0xff] %v9381_v34  ;;  %v11574_v8 = vld [vmem:[#allocation165_spill] sm:$0xff] }
 0x207   :  { %5543 = vmatprep.mubr.f32.mxu1 %v8254_v19 }
 0x208   :  { %2422 = vmatmul.mubr.f32.gmra.mrb[58].mxu0 %v11565_v50  ;;  %v9385_v13 = vpop.f32.mrb[86].mxu1  ;;  %v11636_v50 = vld [vmem:[#allocation22_spill] sm:$0xff] }
 0x209   :  { %2427 = vmatprep.mubr.f32.mxu0 %v11568_v33  ;;  %11569 = vst [vmem:[#allocation145_spill] sm:$0xff] %v9385_v13  ;;  %v9389_v51 = vpop.f32.mrb[87].mxu1  ;;  %v11633_v33 = vld [vmem:[#allocation103_spill] sm:$0xff] }
 0x20a   :  { %5544 = vmatmul.mubr.f32.vlgmr.msra.gmra.mrb[192].mxu1 %v8262_v28  ;;  %11571 = vst [vmem:[#allocation70_spill] sm:$0xff] %v9389_v51 }
 0x20b   :  { %5546 = vmatprep.mubr.f32.mxu1 %v11270_v48  ;;  %6122 = vmatpush3.bf16.msra.mxu1 %v11317_v20 }
 0x20c   :  { %2429 = vmatmul.mubr.f32.gmra.mrb[60].mxu0 %v11570_v49  ;;  %v9394_v25 = vpop.f32.mrb[88].mxu1  ;;  %6124 = vmatprep.subr.bf16.mxu1 %v11358_v39  ;;  %v11630_v49 = vld [vmem:[#allocation102_spill] sm:$0xff] }
 0x20d   :  { %2434 = vmatprep.mubr.f32.mxu0 %v11572_v61  ;;  %11573 = vst [vmem:[#allocation149_spill] sm:$0xff] %v9394_v25  ;;  %v9399_v13 = vpop.f32.mrb[89].mxu1  ;;  %v11627_v61 = vld [vmem:[#allocation99_spill] sm:$0xff] }
 0x20e   :  { %5547 = vmatmul.mubr.f32.gmra.mrb[194].mxu1 %v11279_v38  ;;  %11575 = vst [vmem:[#allocation72_spill] sm:$0xff] %v9399_v13  ;;  %v11593_v13 = vld [vmem:[#allocation212_spill] sm:$0xff] }
 0x20f   :  { %5549 = vmatprep.mubr.f32.mxu1 %v11282_v6  ;;  %6126 = vmatpush3.bf16.msra.mxu1 %v11358_v39 }
 0x210   :  { %2436 = vmatmul.mubr.f32.gmra.mrb[62].mxu0 %v11574_v8  ;;  %v9404_v51 = vpop.f32.mrb[90].mxu1  ;;  %6128 = vmatprep.subr.bf16.mxu1 %v11364_v47  ;;  %v11624_v8 = vld [vmem:[#allocation98_spill] sm:$0xff] }
 0x211   :  { %2538 = vmatprep.mubr.f32.mxu0 %v11362_v27  ;;  %11576 = vst [vmem:[#allocation151_spill] sm:$0xff] %v9404_v51  ;;  %v9409_v20 = vpop.f32.mrb[91].mxu1 }
 0x212   :  { %5550 = vmatmul.mubr.f32.gmra.mrb[196].mxu1 %v11287_v24  ;;  %11577 = vst [vmem:[#allocation153_spill] sm:$0xff] %v9409_v20  ;;  %v11586_v20 = vld [vmem:[#allocation210_spill] sm:$0xff] }
 0x213   :  { %5552 = vmatprep.mubr.f32.mxu1 %v11290_v22  ;;  %6130 = vmatpush3.bf16.msra.mxu1 %v11364_v47  ;;  %v11582_v47 = vld [vmem:[#allocation68_spill] sm:$0xff] }
 0x214   :  { %2540 = vmatmul.mubr.f32.vlgmr.msra.gmra.mrb[0].mxu0 %v11365_v14  ;;  %v9414_v27 = vpop.f32.mrb[92].mxu1  ;;  %6132 = vmatprep.subr.bf16.mxu1 %v11375_v52  ;;  %v11581_v14 = vld [vmem:[#allocation170_spill] sm:$0xff] }
 0x215   :  { %2545 = vmatprep.mubr.f32.mxu0 %v11368_v37  ;;  %11578 = vst [vmem:[#allocation79_spill] sm:$0xff] %v9414_v27  ;;  %v9419_v39 = vpop.f32.mrb[93].mxu1  ;;  %v11583_v27 = vld [vmem:[#allocation203_spill] sm:$0xff] }
 0x216   :  { %5553 = vmatmul.mubr.f32.gmra.mrb[198].mxu1 %v8375_v63  ;;  %11579 = vst [vmem:[#allocation157_spill] sm:$0xff] %v9419_v39  ;;  %v11588_v39 = vld [vmem:[#allocation173_spill] sm:$0xff] }
 0x217   :  { %5555 = vmatprep.mubr.f32.mxu1 %v8380_v9  ;;  %6134 = vmatpush3.bf16.msra.mxu1 %v11375_v52  ;;  %v11589_v52 = vld [vmem:[#allocation75_spill] sm:$0xff] }
 0x218   :  { %2547 = vmatmul.mubr.f32.gmra.mrb[2].mxu0 %v11370_v10  ;;  %v9424_v37 = vpop.f32.mrb[94].mxu1  ;;  %6136 = vmatprep.subr.bf16.mxu1 %v11581_v14  ;;  %v11585_v10 = vld [vmem:[#allocation69_spill] sm:$0xff] }
 0x219   :  { %2552 = vmatprep.mubr.f32.mxu0 %v11372_v60  ;;  %11580 = vst [vmem:[#allocation158_spill] sm:$0xff] %v9424_v37  ;;  %v9429_v51 = vpop.f32.mrb[95].mxu1  ;;  %v11590_v37 = vld [vmem:[#allocation211_spill] sm:$0xff] }
 0x21a   :  { %5556 = vmatmul.mubr.f32.gmra.mrb[200].mxu1 %v11583_v27  ;;  %11584 = vst [vmem:[#allocation160_spill] sm:$0xff] %v9429_v51  ;;  %v11595_v51 = vld [vmem:[#allocation174_spill] sm:$0xff] }
 0x21b   :  { %5558 = vmatprep.mubr.f32.mxu1 %v11586_v20  ;;  %6138 = vmatpush3.bf16.msra.mxu1 %v11581_v14  ;;  %v11596_v14 = vld [vmem:[#allocation77_spill] sm:$0xff] }
 0x21c   :  { %2554 = vmatmul.mubr.f32.gmra.mrb[4].mxu0 %v11582_v47  ;;  %v9434_v60 = vpop.f32.mrb[96].mxu1  ;;  %6140 = vmatprep.subr.bf16.mxu1 %v11588_v39  ;;  %v11592_v47 = vld [vmem:[#allocation76_spill] sm:$0xff] }
 0x21d   :  { %2559 = vmatprep.mubr.f32.mxu0 %v11585_v10  ;;  %11587 = vst [vmem:[#allocation162_spill] sm:$0xff] %v9434_v60  ;;  %v9439_v25 = vpop.f32.mrb[97].mxu1 }
 0x21e   :  { %5559 = vmatmul.mubr.f32.gmra.mrb[202].mxu1 %v11590_v37  ;;  %11591 = vst [vmem:[#allocation188_spill] sm:$0xff] %v9439_v25 }
 0x21f   :  { %5561 = vmatprep.mubr.f32.mxu1 %v11593_v13  ;;  %6142 = vmatpush3.bf16.msra.mxu1 %v11588_v39  ;;  %v11603_v39 = vld [vmem:[#allocation84_spill] sm:$0xff] }
 0x220   :  { %2561 = vmatmul.mubr.f32.gmra.mrb[6].mxu0 %v11589_v52  ;;  %v9444_v10 = vpop.f32.mrb[98].mxu1  ;;  %6144 = vmatprep.subr.bf16.mxu1 %v11595_v51  ;;  %v11599_v52 = vld [vmem:[#allocation81_spill] sm:$0xff] }
 0x221   :  { %2566 = vmatprep.mubr.f32.mxu0 %v11592_v47  ;;  %11594 = vst [vmem:[#allocation164_spill] sm:$0xff] %v9444_v10  ;;  %v9449_v34 = vpop.f32.mrb[99].mxu1 }
 0x222   :  { %5562 = vmatmul.mubr.f32.gmra.mrb[204].mxu1 %v11597_v45  ;;  %11598 = vst [vmem:[#allocation191_spill] sm:$0xff] %v9449_v34  ;;  %v11609_v34 = vld [vmem:[#allocation88_spill] sm:$0xff] }
 0x223   :  { %5564 = vmatprep.mubr.f32.mxu1 %v11600_v58  ;;  %6146 = vmatpush3.bf16.msra.mxu1 %v11595_v51  ;;  %v11610_v51 = vld [vmem:[#allocation65_spill] sm:$0xff] }
 0x224   :  { %2568 = vmatmul.mubr.f32.gmra.mrb[8].mxu0 %v11596_v14  ;;  %6148 = vmatprep.subr.bf16.mxu1 %v11602_v5  ;;  %v11606_v14 = vld [vmem:[#allocation86_spill] sm:$0xff] }
 0x225   :  { %2573 = vmatprep.mubr.f32.mxu0 %v11599_v52  ;;  %v9454_v47 = vpop.f32.mrb[100].mxu1 }
 0x226   :  { %11601 = vst [vmem:[#allocation101_spill] sm:$0xff] %v9454_v47  ;;  %5565 = vmatmul.mubr.f32.gmra.mrb[206].mxu1 %v11604_v21  ;;  %v9459_v10 = vpop.f32.mrb[101].mxu1 }
 0x227   :  { %11605 = vst [vmem:[#allocation193_spill] sm:$0xff] %v9459_v10  ;;  %5567 = vmatprep.mubr.f32.mxu1 %v11607_v31  ;;  %6150 = vmatpush3.bf16.msra.mxu1 %v11602_v5  ;;  %v11615_v10 = vld [vmem:[#allocation93_spill] sm:$0xff]  ;;  %v11618_v5 = vld [vmem:[#allocation94_spill] sm:$0xff] }
 0x228   :  { %2575 = vmatmul.mubr.f32.gmra.mrb[10].mxu0 %v11603_v39  ;;  %v11613_v39 = vld [vmem:[#allocation66_spill] sm:$0xff] }
 0x229   :  { %2580 = vmatprep.mubr.f32.mxu0 %v11606_v14  ;;  %v9464_v52 = vpop.f32.mrb[102].mxu1  ;;  %v11616_v14 = vld [vmem:[#allocation73_spill] sm:$0xff] }
 0x22a   :  { %11608 = vst [vmem:[#allocation167_spill] sm:$0xff] %v9464_v52  ;;  %5568 = vmatmul.mubr.f32.gmra.mrb[208].mxu1 %v11610_v51  ;;  %v9468_v47 = vpop.f32.mrb[103].mxu1  ;;  %v11619_v52 = vld [vmem:[#allocation11_spill] sm:$0xff] }
 0x22b   :  { %11611 = vst [vmem:[#allocation166_spill] sm:$0xff] %v9468_v47  ;;  %5570 = vmatprep.mubr.f32.mxu1 %v11613_v39  ;;  %v11622_v47 = vld [vmem:[#allocation218_spill] sm:$0xff] }
 0x22c   :  { %2582 = vmatmul.mubr.f32.gmra.mrb[12].mxu0 %v11609_v34 }
 0x22d   :  { %2587 = vmatprep.mubr.f32.mxu0 %v11612_v55  ;;  %v9472_v60 = vpop.f32.mrb[104].mxu1 }
 0x22e   :  { %11614 = vst [vmem:[#allocation196_spill] sm:$0xff] %v9472_v60  ;;  %5571 = vmatmul.mubr.f32.gmra.mrb[210].mxu1 %v11616_v14  ;;  %v9476_v25 = vpop.f32.mrb[105].mxu1  ;;  %v11625_v60 = vld [vmem:[#allocation219_spill] sm:$0xff] }
 0x22f   :  { %11617 = vst [vmem:[#allocation48_spill] sm:$0xff] %v9476_v25  ;;  %5573 = vmatprep.mubr.f32.mxu1 %v11619_v52  ;;  %v11628_v25 = vld [vmem:[#allocation220_spill] sm:$0xff] }
 0x230   :  { %2589 = vmatmul.mubr.f32.gmra.mrb[14].mxu0 %v11615_v10 }
 0x231   :  { %2594 = vmatprep.mubr.f32.mxu0 %v11618_v5  ;;  %v9480_v34 = vpop.f32.mrb[106].mxu1 }
 0x232   :  { %11620 = vst [vmem:[#allocation200_spill] sm:$0xff] %v9480_v34  ;;  %5574 = vmatmul.mubr.f32.gmra.mrb[212].mxu1 %v11622_v47  ;;  %v9484_v55 = vpop.f32.mrb[107].mxu1  ;;  %v11631_v34 = vld [vmem:[#allocation85_spill] sm:$0xff] }
 0x233   :  { %11623 = vst [vmem:[#allocation168_spill] sm:$0xff] %v9484_v55  ;;  %5576 = vmatprep.mubr.f32.mxu1 %v11625_v60  ;;  %v11634_v55 = vld [vmem:[#allocation87_spill] sm:$0xff] }
 0x234   :  { %2596 = vmatmul.mubr.f32.gmra.mrb[16].mxu0 %v11621_v56 }
 0x235   :  { %2601 = vmatprep.mubr.f32.mxu0 %v11624_v8  ;;  %v9488_v10 = vpop.f32.mrb[108].mxu1 }
 0x236   :  { %11626 = vst [vmem:[#allocation52_spill] sm:$0xff] %v9488_v10  ;;  %5577 = vmatmul.mubr.f32.gmra.mrb[214].mxu1 %v11628_v25  ;;  %v9492_v5 = vpop.f32.mrb[109].mxu1  ;;  %v11637_v10 = vld [vmem:[#allocation221_spill] sm:$0xff] }
 0x237   :  { %11629 = vst [vmem:[#allocation201_spill] sm:$0xff] %v9492_v5  ;;  %5579 = vmatprep.mubr.f32.mxu1 %v11631_v34  ;;  %v11640_v5 = vld [vmem:[#allocation91_spill] sm:$0xff] }
 0x238   :  { %2603 = vmatmul.mubr.f32.gmra.mrb[18].mxu0 %v11627_v61 }
 0x239   :  { %2608 = vmatprep.mubr.f32.mxu0 %v11630_v49  ;;  %v9496_v56 = vpop.f32.mrb[110].mxu1 }
 0x23a   :  { %11632 = vst [vmem:[#allocation2_spill] sm:$0xff] %v9496_v56  ;;  %5580 = vmatmul.mubr.f32.gmra.mrb[216].mxu1 %v11634_v55  ;;  %v9500_v8 = vpop.f32.mrb[111].mxu1  ;;  %v11643_v56 = vld [vmem:[#allocation92_spill] sm:$0xff] }
 0x23b   :  { %11635 = vst [vmem:[#allocation57_spill] sm:$0xff] %v9500_v8  ;;  %5582 = vmatprep.mubr.f32.mxu1 %v11637_v10  ;;  %v11646_v8 = vld [vmem:[#allocation24_spill] sm:$0xff] }
 0x23c   :  { %2610 = vmatmul.mubr.f32.gmra.mrb[20].mxu0 %v11633_v33 }
 0x23d   :  { %2615 = vmatprep.mubr.f32.mxu0 %v11636_v50  ;;  %v9504_v61 = vpop.f32.mrb[112].mxu1 }
 0x23e   :  { %11638 = vst [vmem:[#allocation202_spill] sm:$0xff] %v9504_v61  ;;  %5583 = vmatmul.mubr.f32.gmra.mrb[218].mxu1 %v11640_v5  ;;  %v9508_v49 = vpop.f32.mrb[113].mxu1  ;;  %v11648_v61 = vld [vmem:[#allocation95_spill] sm:$0xff] }
 0x23f   :  { %11641 = vst [vmem:[#allocation60_spill] sm:$0xff] %v9508_v49  ;;  %5585 = vmatprep.mubr.f32.mxu1 %v11643_v56  ;;  %v11650_v5 = vld [vmem:[#allocation107_spill] sm:$0xff]  ;;  %v11653_v56 = vld [vmem:[#allocation108_spill] sm:$0xff] }
 0x240   :  { %2617 = vmatmul.mubr.f32.gmra.mrb[22].mxu0 %v11639_v26  ;;  %v11651_v49 = vld [vmem:[#allocation27_spill] sm:$0xff] }
 0x241   :  { %2622 = vmatprep.mubr.f32.mxu0 %v11642_v17  ;;  %v9512_v33 = vpop.f32.mrb[114].mxu1 }
 0x242   :  { %11644 = vst [vmem:[#allocation207_spill] sm:$0xff] %v9512_v33  ;;  %5586 = vmatmul.mubr.f32.gmra.mrb[220].mxu1 %v11646_v8  ;;  %v9516_v50 = vpop.f32.mrb[115].mxu1 }
 0x243   :  { %5588 = vmatprep.mubr.f32.mxu1 %v11648_v61 }
 0x244   :  { %2624 = vmatmul.mubr.f32.gmra.mrb[24].mxu0 %v11645_v16 }
 0x245   :  { %2629 = vmatprep.mubr.f32.mxu0 %v11647_v12  ;;  %v9520_v26 = vpop.f32.mrb[116].mxu1 }
 0x246   :  { %11649 = vst [vmem:[#allocation61_spill] sm:$0xff] %v9520_v26  ;;  %5589 = vmatmul.mubr.f32.gmra.mrb[222].mxu1 %v11651_v49  ;;  %v9524_v17 = vpop.f32.mrb[117].mxu1 }
 0x247   :  { %11652 = vst [vmem:[#allocation208_spill] sm:$0xff] %v9524_v17  ;;  %5623 = vmatprep.mubr.f32.mxu1 %v8254_v19 }
 0x248   :  { %2631 = vmatmul.mubr.f32.gmra.mrb[26].mxu0 %v11650_v5 }
 0x249   :  { %2636 = vmatprep.mubr.f32.mxu0 %v11653_v56  ;;  %v9528_v16 = vpop.f32.mrb[118].mxu1 }
 0x24a   :  { %11654 = vst [vmem:[#allocation6_spill] sm:$0xff] %v9528_v16  ;;  %5624 = vmatmul.mubr.f32.vlgmr.msra.gmra.mrb[224].mxu1 %v8262_v28  ;;  %v9532_v12 = vpop.f32.mrb[119].mxu1 }
 0x24b   :  { %11655 = vst [vmem:[#allocation169_spill] sm:$0xff] %v9532_v12  ;;  %5626 = vmatprep.mubr.f32.mxu1 %v11270_v48 }
 0x24c   :  { %2638 = vmatmul.mubr.f32.gmra.mrb[28].mxu0 %v11454_v4 }
 0x24d   :  { %2643 = vmatprep.mubr.f32.mxu0 %v11456_v32  ;;  %v9536_v5 = vpop.f32.mrb[120].mxu1 }
 0x24e   :  { %11656 = vst [vmem:[#allocation209_spill] sm:$0xff] %v9536_v5  ;;  %5627 = vmatmul.mubr.f32.gmra.mrb[226].mxu1 %v11279_v38  ;;  %v9540_v56 = vpop.f32.mrb[121].mxu1 }
 0x24f   :  { %11657 = vst [vmem:[#allocation213_spill] sm:$0xff] %v9540_v56  ;;  %5629 = vmatprep.mubr.f32.mxu1 %v11282_v6 }
 0x250   :  { %2645 = vmatmul.mubr.f32.gmra.mrb[30].mxu0 %v11464_v44  ;;  %v6475_v44 = vmov 0  }
 0x251   :  { %2650 = vmatprep.mubr.f32.mxu0 %v11466_v35  ;;  %v9544_v19 = vpop.f32.mrb[122].mxu1  ;;  %6473 = vset.pattern.permute.xlu0 %v6475_v44  ;;  %v4875_v35 = vld [vmem:[%s10153_s4] sm:$0xff] }
 0x252   :  { %11658 = vst [vmem:[#allocation12_spill] sm:$0xff] %v9544_v19  ;;  %5630 = vmatmul.mubr.f32.gmra.mrb[228].mxu1 %v11287_v24  ;;  %v9548_v28 = vpop.f32.mrb[123].mxu1  ;;  %4879 = vperm.xlu0 %6473, %v4875_v35  }
 0x253   :  { %11659 = vst [vmem:[#allocation214_spill] sm:$0xff] %v9548_v28  ;;  %5632 = vmatprep.mubr.f32.mxu1 %v11290_v22 }
 0x254   :  { %2652 = vmatmul.mubr.f32.gmra.mrb[32].mxu0 %v11474_v29 }
 0x255   :  { %2657 = vmatprep.mubr.f32.mxu0 %v11476_v53  ;;  %v9552_v4 = vpop.f32.mrb[124].mxu1 }
 0x256   :  { %11660 = vst [vmem:[#allocation216_spill] sm:$0xff] %v9552_v4  ;;  %5633 = vmatmul.mubr.f32.gmra.mrb[230].mxu1 %v8375_v63  ;;  %v9556_v48 = vpop.f32.mrb[125].mxu1 }
 0x257   :  { %11661 = vst [vmem:[#allocation13_spill] sm:$0xff] %v9556_v48  ;;  %5635 = vmatprep.mubr.f32.mxu1 %v8380_v9 }
 0x258   :  { %2659 = vmatmul.mubr.f32.gmra.mrb[34].mxu0 %v11483_v11 }
 0x259   :  { %2664 = vmatprep.mubr.f32.mxu0 %v11485_v15  ;;  %v9560_v38 = vpop.f32.mrb[126].mxu1 }
 0x25a   :  { %11662 = vst [vmem:[#allocation7_spill] sm:$0xff] %v9560_v38  ;;  %5636 = vmatmul.mubr.f32.gmra.mrb[232].mxu1 %v11583_v27  ;;  %v9564_v6 = vpop.f32.mrb[127].mxu1 }
 0x25b   :  { %11663 = vst [vmem:[#allocation50_spill] sm:$0xff] %v9564_v6  ;;  %5638 = vmatprep.mubr.f32.mxu1 %v11586_v20  ;;  %v11679_v20 = vld [vmem:[#allocation163_spill] sm:$0xff] }
 0x25c   :  { %2666 = vmatmul.mubr.f32.gmra.mrb[36].mxu0 %v11492_v42 }
 0x25d   :  { %2671 = vmatprep.mubr.f32.mxu0 %v11494_v2  ;;  %v9568_v24 = vpop.f32.mrb[128].mxu1 }
 0x25e   :  { %5639 = vmatmul.mubr.f32.gmra.mrb[234].mxu1 %v11590_v37  ;;  %v9572_v63 = vpop.f32.mrb[129].mxu1  ;;  %v11681_v37 = vld [vmem:[#allocation165_spill] sm:$0xff] }
 0x25f   :  { %5641 = vmatprep.mubr.f32.mxu1 %v11593_v13  ;;  %v11677_v13 = vld [vmem:[#allocation161_spill] sm:$0xff] }
 0x260   :  { %2673 = vmatmul.mubr.f32.gmra.mrb[38].mxu0 %v11501_v23 }
 0x261   :  { %2678 = vmatprep.mubr.f32.mxu0 %v11504_v54  ;;  %v9576_v9 = vpop.f32.mrb[130].mxu1 }
 0x262   :  { %5642 = vmatmul.mubr.f32.gmra.mrb[236].mxu1 %v11597_v45  ;;  %v9580_v22 = vpop.f32.mrb[131].mxu1 }
 0x263   :  { %5644 = vmatprep.mubr.f32.mxu1 %v11600_v58  ;;  %v11675_v58 = vld [vmem:[#allocation159_spill] sm:$0xff] }
 0x264   :  { %2680 = vmatmul.mubr.f32.gmra.mrb[40].mxu0 %v11511_v43 }
 0x265   :  { %2685 = vmatprep.mubr.f32.mxu0 %v11514_v18  ;;  %v9584_v29 = vpop.f32.mrb[132].mxu1 }
 0x266   :  { %5645 = vmatmul.mubr.f32.gmra.mrb[238].mxu1 %v11604_v21  ;;  %v9588_v32 = vpop.f32.mrb[133].mxu1  ;;  %v11664_v21 = vld [vmem:[#allocation150_spill] sm:$0xff] }
 0x267   :  { %5647 = vmatprep.mubr.f32.mxu1 %v11607_v31 }
 0x268   :  { %2687 = vmatmul.mubr.f32.gmra.mrb[42].mxu0 %v11517_v30 }
 0x269   :  { %2692 = vmatprep.mubr.f32.mxu0 %v11520_v3  ;;  %v9595_v43 = vpop.f32.mrb[134].mxu1  ;;  %v11665_v3 = vld [vmem:[#allocation91_spill] sm:$0xff] }
 0x26a   :  { %5648 = vmatmul.mubr.f32.gmra.mrb[240].mxu1 %v11610_v51  ;;  %v9599_v53 = vpop.f32.mrb[135].mxu1 }
 0x26b   :  { %5650 = vmatprep.mubr.f32.mxu1 %v11613_v39 }
 0x26c   :  { %2694 = vmatmul.mubr.f32.gmra.mrb[44].mxu0 %v11523_v0  ;;  %v11666_v0 = vld [vmem:[#allocation152_spill] sm:$0xff] }
 0x26d   :  { %2699 = vmatprep.mubr.f32.mxu0 %v11526_v36  ;;  %v9603_v11 = vpop.f32.mrb[136].mxu1 }
 0x26e   :  { %5651 = vmatmul.mubr.f32.gmra.mrb[242].mxu1 %v11616_v14  ;;  %v9607_v15 = vpop.f32.mrb[137].mxu1 }
 0x26f   :  { %5653 = vmatprep.mubr.f32.mxu1 %v11619_v52 }
 0x270   :  { %2701 = vmatmul.mubr.f32.gmra.mrb[46].mxu0 %v11529_v1 }
 0x271   :  { %2706 = vmatprep.mubr.f32.mxu0 %v11532_v7  ;;  %v9611_v42 = vpop.f32.mrb[138].mxu1 }
 0x272   :  { %5654 = vmatmul.mubr.f32.gmra.mrb[244].mxu1 %v11622_v47  ;;  %v9615_v2 = vpop.f32.mrb[139].mxu1 }
 0x273   :  { %5656 = vmatprep.mubr.f32.mxu1 %v11625_v60 }
 0x274   :  { %2708 = vmatmul.mubr.f32.gmra.mrb[48].mxu0 %v11535_v62  ;;  %v11667_v62 = vld [vmem:[#allocation92_spill] sm:$0xff] }
 0x275   :  { %2713 = vmatprep.mubr.f32.mxu0 %v11538_v59  ;;  %v9619_v18 = vpop.f32.mrb[140].mxu1  ;;  %v11669_v59 = vld [vmem:[#allocation154_spill] sm:$0xff] }
 0x276   :  { %5657 = vmatmul.mubr.f32.gmra.mrb[246].mxu1 %v11628_v25  ;;  %v9623_v23 = vpop.f32.mrb[141].mxu1 }
 0x277   :  { %5659 = vmatprep.mubr.f32.mxu1 %v11631_v34 }
 0x278   :  { %2715 = vmatmul.mubr.f32.gmra.mrb[50].mxu0 %v11541_v57  ;;  %v11671_v57 = vld [vmem:[#allocation155_spill] sm:$0xff] }
 0x279   :  { %2720 = vmatprep.mubr.f32.mxu0 %v11544_v41  ;;  %v9627_v54 = vpop.f32.mrb[142].mxu1 }
 0x27a   :  { %5660 = vmatmul.mubr.f32.gmra.mrb[248].mxu1 %v11634_v55  ;;  %v9631_v31 = vpop.f32.mrb[143].mxu1 }
 0x27b   :  { %5662 = vmatprep.mubr.f32.mxu1 %v11637_v10 }
 0x27c   :  { %2722 = vmatmul.mubr.f32.gmra.mrb[52].mxu0 %v11547_v46  ;;  %v11673_v46 = vld [vmem:[#allocation82_spill] sm:$0xff] }
 0x27d   :  { %2727 = vmatprep.mubr.f32.mxu0 %v11550_v40  ;;  %v9635_v30 = vpop.f32.mrb[144].mxu1 }
 0x27e   :  { %5663 = vmatmul.mubr.f32.gmra.mrb[250].mxu1 %v11665_v3  ;;  %v9639_v7 = vpop.f32.mrb[145].mxu1 }
 0x27f   :  { %5665 = vmatprep.mubr.f32.mxu1 %v11667_v62 }
 0x280   :  { %2729 = vmatmul.mubr.f32.gmra.mrb[54].mxu0 %v11664_v21 }
 0x281   :  { %2734 = vmatprep.mubr.f32.mxu0 %v11666_v0  ;;  %v9643_v36 = vpop.f32.mrb[146].mxu1 }
 0x282   :  { %11668 = vst [vmem:[#allocation16_spill] sm:$0xff] %v9643_v36  ;;  %5666 = vmatmul.mubr.f32.gmra.mrb[252].mxu1 %v11646_v8  ;;  %v9647_v1 = vpop.f32.mrb[147].mxu1 }
 0x283   :  { %11670 = vst [vmem:[#allocation8_spill] sm:$0xff] %v9647_v1  ;;  %5668 = vmatprep.mubr.f32.mxu1 %v11648_v61 }
 0x284   :  { %2736 = vmatmul.mubr.f32.gmra.mrb[56].mxu0 %v11669_v59 }
 0x285   :  { %2741 = vmatprep.mubr.f32.mxu0 %v11671_v57  ;;  %v9651_v41 = vpop.f32.mrb[148].mxu1 }
 0x286   :  { %11672 = vst [vmem:[#allocation9_spill] sm:$0xff] %v9651_v41  ;;  %5669 = vmatmul.mubr.f32.gmra.mrb[254].mxu1 %v11651_v49  ;;  %v9655_v40 = vpop.f32.mrb[149].mxu1  ;;  %v11706_v41 = vld [vmem:[#allocation14_spill] sm:$0xff] }
 0x287   :  { %11674 = vst [vmem:[#allocation21_spill] sm:$0xff] %v9655_v40  ;;  %v11707_v40 = vld [vmem:[#allocation117_spill] sm:$0xff] }
 0x288   :  { %2743 = vmatmul.mubr.f32.gmra.mrb[58].mxu0 %v11673_v46 }
 0x289   :  { %2748 = vmatprep.mubr.f32.mxu0 %v11675_v58  ;;  %v9658_v45 = vpop.f32.mrb[150].mxu1 }
 0x28a   :  { %11676 = vst [vmem:[#allocation171_spill] sm:$0xff] %v9658_v45  ;;  %v9661_v25 = vpop.f32.mrb[151].mxu1 }
 0x28b   :  { %11678 = vst [vmem:[#allocation172_spill] sm:$0xff] %v9661_v25 }
 0x28c   :  { %2750 = vmatmul.mubr.f32.gmra.mrb[60].mxu0 %v11677_v13 }
 0x28d   :  { %2755 = vmatprep.mubr.f32.mxu0 %v11679_v20  ;;  %v9664_v27 = vpop.f32.mrb[152].mxu1 }
 0x28e   :  { %11680 = vst [vmem:[#allocation67_spill] sm:$0xff] %v9664_v27  ;;  %v9667_v60 = vpop.f32.mrb[153].mxu1 }
 0x28f   :  { %11682 = vst [vmem:[#allocation10_spill] sm:$0xff] %v9667_v60 }
 0x290   :  { %2757 = vmatmul.mubr.f32.gmra.mrb[62].mxu0 %v11681_v37 }
 0x291   :  { %v9669_v47 = vpop.f32.mrb[154].mxu1 }
 0x292   :  { %11683 = vst [vmem:[#allocation25_spill] sm:$0xff] %v9669_v47  ;;  %v9671_v52 = vpop.f32.mrb[155].mxu1 }
 0x293   :  { %11684 = vst [vmem:[#allocation78_spill] sm:$0xff] %v9671_v52 }
 0x295   :  { %v9673_v51 = vpop.f32.mrb[156].mxu1 }
 0x296   :  { %11685 = vst [vmem:[#allocation80_spill] sm:$0xff] %v9673_v51  ;;  %v9675_v39 = vpop.f32.mrb[157].mxu1 }
 0x297   :  { %11686 = vst [vmem:[#allocation29_spill] sm:$0xff] %v9675_v39 }
 0x299   :  { %v9677_v14 = vpop.f32.mrb[158].mxu1 }
 0x29a   :  { %11687 = vst [vmem:[#allocation15_spill] sm:$0xff] %v9677_v14  ;;  %v9679_v34 = vpop.f32.mrb[159].mxu1 }
 0x29b   :  { %11688 = vst [vmem:[#allocation83_spill] sm:$0xff] %v9679_v34 }
 0x29d   :  { %v9681_v55 = vpop.f32.mrb[160].mxu1 }
 0x29e   :  { %v3906_v10 = vpop.f32.mrb[161].mxu1 }
 0x2a1   :  { %v9683_v8 = vpop.f32.mrb[162].mxu1 }
 0x2a2   :  { %v9685_v61 = vpop.f32.mrb[163].mxu1 }
 0x2a5   :  { %v9687_v49 = vpop.f32.mrb[164].mxu1 }
 0x2a6   :  { %v9689_v44 = vpop.f32.mrb[165].mxu1 }
 0x2a9   :  { %v9691_v35 = vpop.f32.mrb[166].mxu1 }
 0x2aa   :  { %v9693_v21 = vpop.f32.mrb[167].mxu1 }
 0x2ad   :  { %v9695_v3 = vpop.f32.mrb[168].mxu1 }
 0x2ae   :  { %v9697_v0 = vpop.f32.mrb[169].mxu1 }
 0x2b1   :  { %v9699_v62 = vpop.f32.mrb[170].mxu1 }
 0x2b2   :  { %v9701_v59 = vpop.f32.mrb[171].mxu1 }
 0x2b5   :  { %v9703_v57 = vpop.f32.mrb[172].mxu1 }
 0x2b6   :  { %v9705_v46 = vpop.f32.mrb[173].mxu1 }
 0x2b9   :  { %v9707_v58 = vpop.f32.mrb[174].mxu1 }
 0x2ba   :  { %v9709_v13 = vpop.f32.mrb[175].mxu1 }
 0x2bd   :  { %v9711_v20 = vpop.f32.mrb[176].mxu1 }
 0x2be   :  { %v9713_v37 = vpop.f32.mrb[177].mxu1 }
 0x2c1   :  { %v9715_v14 = vpop.f32.mrb[178].mxu1 }
 0x2c2   :  { %11689 = vst [vmem:[#allocation34_spill] sm:$0xff] %v9715_v14  ;;  %v9717_v38 = vpop.f32.mrb[179].mxu1 }
 0x2c3   :  { %11690 = vst [vmem:[#allocation18_spill] sm:$0xff] %v9717_v38 }
 0x2c5   :  { %v9719_v34 = vpop.f32.mrb[180].mxu1 }
 0x2c6   :  { %11691 = vst [vmem:[#allocation90_spill] sm:$0xff] %v9719_v34  ;;  %v9721_v6 = vpop.f32.mrb[181].mxu1 }
 0x2c7   :  { %11692 = vst [vmem:[#allocation37_spill] sm:$0xff] %v9721_v6 }
 0x2c9   :  { %v9723_v51 = vpop.f32.mrb[182].mxu1 }
 0x2ca   :  { %11693 = vst [vmem:[#allocation20_spill] sm:$0xff] %v9723_v51  ;;  %v9725_v4 = vpop.f32.mrb[183].mxu1 }
 0x2cb   :  { %11694 = vst [vmem:[#allocation41_spill] sm:$0xff] %v9725_v4 }
 0x2cd   :  { %v9727_v39 = vpop.f32.mrb[184].mxu1 }
 0x2ce   :  { %11695 = vst [vmem:[#allocation45_spill] sm:$0xff] %v9727_v39  ;;  %v9729_v48 = vpop.f32.mrb[185].mxu1 }
 0x2cf   :  { %11696 = vst [vmem:[#allocation51_spill] sm:$0xff] %v9729_v48  ;;  %v11703_v48 = vld [vmem:[#allocation74_spill] sm:$0xff] }
 0x2d1   :  { %v9731_v47 = vpop.f32.mrb[186].mxu1 }
 0x2d2   :  { %11697 = vst [vmem:[#allocation62_spill] sm:$0xff] %v9731_v47  ;;  %v9733_v19 = vpop.f32.mrb[187].mxu1 }
 0x2d3   :  { %11698 = vst [vmem:[#allocation175_spill] sm:$0xff] %v9733_v19  ;;  %v11704_v19 = vld [vmem:[#allocation198_spill] sm:$0xff] }
 0x2d5   :  { %v9735_v52 = vpop.f32.mrb[188].mxu1 }
 0x2d6   :  { %11699 = vst [vmem:[#allocation176_spill] sm:$0xff] %v9735_v52  ;;  %v9737_v28 = vpop.f32.mrb[189].mxu1 }
 0x2d7   :  { %11700 = vst [vmem:[#allocation109_spill] sm:$0xff] %v9737_v28  ;;  %v11705_v28 = vld [vmem:[#allocation188_spill] sm:$0xff] }
 0x2d9   :  { %v9739_v27 = vpop.f32.mrb[190].mxu1 }
 0x2da   :  { %11701 = vst [vmem:[#allocation31_spill] sm:$0xff] %v9739_v27  ;;  %v9741_v5 = vpop.f32.mrb[191].mxu1 }
 0x2db   :  { %11702 = vst [vmem:[#allocation64_spill] sm:$0xff] %v9741_v5 }
 0x2dd   :  { %v5545_v60 = vpop.f32.mrb[192].mxu1 }
 0x2de   :  { %v4273_v51 = vpop.f32.mrb[193].mxu1 }
 0x2e1   :  { %v5548_v56 = vpop.f32.mrb[194].mxu1 }
 0x2e2   :  { %v4285_v45 = vpop.f32.mrb[195].mxu1 }
 0x2e5   :  { %v9743_v39 = vpop.f32.mrb[196].mxu1 }
 0x2e6   :  { %v4297_v25 = vpop.f32.mrb[197].mxu1 }
 0x2e7   :  { %v2541_v4 = vpop.f32.mrb[0].mxu0 }
 0x2e8   :  { %v6183_v16 = vadd.f32 %v2541_v4, %v11703_v48  ;;  %v2543_v47 = vpop.f32.mrb[1].mxu0  ;;  %v11708_v48 = vld [vmem:[#allocation162_spill] sm:$0xff] }
 0x2e9   :  { %v9747_v12 = vpop.f32.mrb[198].mxu1 }
 0x2ea   :  { %v2850_v34 = vadd.f32 %v6183_v16, %v11704_v19  ;;  %v9751_v26 = vpop.f32.mrb[199].mxu1  ;;  %v11709_v16 = vld [vmem:[#allocation17_spill] sm:$0xff] }
 0x2eb   :  { %v2548_v52 = vpop.f32.mrb[2].mxu0 }
 0x2ec   :  { %v3311_v27 = vadd.f32 %v11705_v28, %v2850_v34  ;;  %v6184_v5 = vadd.f32 %v2548_v52, %v11706_v41  ;;  %v2550_v6 = vpop.f32.mrb[3].mxu0  ;;  %v11710_v28 = vld [vmem:[#allocation39_spill] sm:$0xff] }
 0x2ed   :  { %v9755_v4 = vpop.f32.mrb[200].mxu1 }
 0x2ee   :  { %v2860_v14 = vadd.f32 %v6184_v5, %v11707_v40  ;;  %v3601_v17 = vadd.f32 %v9572_v63, %v3311_v27  ;;  %v9759_v1 = vpop.f32.mrb[201].mxu1  ;;  %v11711_v63 = vld [vmem:[#allocation191_spill] sm:$0xff] }
 0x2ef   :  { %v2555_v36 = vpop.f32.mrb[4].mxu0 }
 0x2f0   :  { %v3317_v47 = vadd.f32 %v11708_v48, %v2860_v14  ;;  %v6185_v19 = vadd.f32 %v2555_v36, %v11709_v16  ;;  %v2557_v38 = vpop.f32.mrb[5].mxu0  ;;  %v3907_v33 = vadd.f32 %v3906_v10, %v3601_v17  ;;  %v11712_v14 = vld [vmem:[#allocation19_spill] sm:$0xff]  ;;  %v11713_v10 = vld [vmem:[#allocation184_spill] sm:$0xff] }
 0x2f1   :  { %v9765_v40 = vpop.f32.mrb[202].mxu1 }
 0x2f2   :  { %v2870_v41 = vadd.f32 %v6185_v19, %v11710_v28  ;;  %v3608_v6 = vadd.f32 %v9568_v24, %v3317_v47  ;;  %v9763_v52 = vadd.f32 %v4273_v51, %v3907_v33  ;;  %v9770_v38 = vpop.f32.mrb[203].mxu1  ;;  %v11714_v47 = vld [vmem:[#allocation164_spill] sm:$0xff] }
 0x2f3   :  { %v2562_v5 = vpop.f32.mrb[6].mxu0 }
 0x2f4   :  { %v3323_v27 = vadd.f32 %v11711_v63, %v2870_v41  ;;  %v3915_v34 = vadd.f32 %v9681_v55, %v3608_v6  ;;  %v6186_v48 = vadd.f32 %v2562_v5, %v11712_v14  ;;  %v2564_v36 = vpop.f32.mrb[7].mxu0  ;;  %v11715_v41 = vld [vmem:[#allocation23_spill] sm:$0xff] }
 0x2f5   :  { %v9776_v51 = vpop.f32.mrb[204].mxu1  ;;  %v11717_v36 = vld [vmem:[#allocation193_spill] sm:$0xff] }
 0x2f6   :  { %v9772_v17 = vadd.f32 %v5545_v60, %v3915_v34  ;;  %v2880_v16 = vadd.f32 %v6186_v48, %v11713_v10  ;;  %v3615_v24 = vadd.f32 %v9580_v22, %v3323_v27  ;;  %v9781_v5 = vpop.f32.mrb[205].mxu1  ;;  %v11716_v34 = vld [vmem:[#allocation190_spill] sm:$0xff] }
 0x2f7   :  { %v2569_v33 = vpop.f32.mrb[8].mxu0 }
 0x2f8   :  { %v3329_v19 = vadd.f32 %v11714_v47, %v2880_v16  ;;  %v3923_v28 = vadd.f32 %v9685_v61, %v3615_v24  ;;  %v6187_v55 = vadd.f32 %v2569_v33, %v11715_v41  ;;  %v2571_v6 = vpop.f32.mrb[9].mxu0  ;;  %v11718_v16 = vld [vmem:[#allocation97_spill] sm:$0xff] }
 0x2f9   :  { %v9787_v22 = vpop.f32.mrb[206].mxu1  ;;  %v11720_v6 = vld [vmem:[#allocation101_spill] sm:$0xff] }
 0x2fa   :  { %v3622_v63 = vadd.f32 %v9576_v9, %v3329_v19  ;;  %v9784_v60 = vadd.f32 %v4285_v45, %v3923_v28  ;;  %v2890_v14 = vadd.f32 %v6187_v55, %v11716_v34  ;;  %v9792_v33 = vpop.f32.mrb[207].mxu1  ;;  %v11719_v45 = vld [vmem:[#allocation121_spill] sm:$0xff] }
 0x2fb   :  { %v2576_v48 = vpop.f32.mrb[10].mxu0 }
 0x2fc   :  { %v3931_v27 = vadd.f32 %v9683_v8, %v3622_v63  ;;  %v3335_v10 = vadd.f32 %v11717_v36, %v2890_v14  ;;  %v6188_v61 = vadd.f32 %v2576_v48, %v11718_v16  ;;  %v2578_v24 = vpop.f32.mrb[11].mxu0  ;;  %v11721_v63 = vld [vmem:[#allocation28_spill] sm:$0xff] }
 0x2fd   :  { %v9798_v41 = vpop.f32.mrb[208].mxu1 }
 0x2fe   :  { %v9794_v47 = vadd.f32 %v5548_v56, %v3931_v27  ;;  %v3629_v9 = vadd.f32 %v9588_v32, %v3335_v10  ;;  %v2900_v19 = vadd.f32 %v6188_v61, %v11719_v45  ;;  %v9803_v48 = vpop.f32.mrb[209].mxu1  ;;  %v11722_v56 = vld [vmem:[#allocation125_spill] sm:$0xff]  ;;  %v11723_v61 = vld [vmem:[#allocation166_spill] sm:$0xff]  ;;  %v11724_v45 = vld [vmem:[#allocation100_spill] sm:$0xff] }
 0x2ff   :  { %v2583_v28 = vpop.f32.mrb[12].mxu0 }
 0x300   :  { %v3939_v55 = vadd.f32 %v9689_v44, %v3629_v9  ;;  %v3341_v8 = vadd.f32 %v11720_v6, %v2900_v19  ;;  %v6189_v34 = vadd.f32 %v2583_v28, %v11721_v63  ;;  %v2585_v14 = vpop.f32.mrb[13].mxu0  ;;  %v11725_v6 = vld [vmem:[#allocation124_spill] sm:$0xff] }
 0x301   :  { %v9809_v16 = vpop.f32.mrb[210].mxu1 }
 0x302   :  { %v9805_v36 = vadd.f32 %v4297_v25, %v3939_v55  ;;  %v2910_v27 = vadd.f32 %v6189_v34, %v11722_v56  ;;  %v3636_v32 = vadd.f32 %v9584_v29, %v3341_v8  ;;  %v9813_v19 = vpop.f32.mrb[211].mxu1  ;;  %v11726_v34 = vld [vmem:[#allocation167_spill] sm:$0xff]  ;;  %v11727_v56 = vld [vmem:[#allocation30_spill] sm:$0xff] }
 0x303   :  { %v2590_v10 = vpop.f32.mrb[14].mxu0 }
 0x304   :  { %v3347_v24 = vadd.f32 %v11723_v61, %v2910_v27  ;;  %v6190_v44 = vadd.f32 %v2590_v10, %v11724_v45  ;;  %v2592_v9 = vpop.f32.mrb[15].mxu0  ;;  %v3947_v28 = vadd.f32 %v9687_v49, %v3636_v32  ;;  %v11728_v49 = vld [vmem:[#allocation127_spill] sm:$0xff] }
 0x305   :  { %v9821_v8 = vpop.f32.mrb[212].mxu1  ;;  %v11729_v9 = vld [vmem:[#allocation48_spill] sm:$0xff] }
 0x306   :  { %v2920_v63 = vadd.f32 %v6190_v44, %v11725_v6  ;;  %v9818_v25 = vadd.f32 %v9743_v39, %v3947_v28  ;;  %v3643_v55 = vadd.f32 %v9599_v53, %v3347_v24  ;;  %v9825_v61 = vpop.f32.mrb[213].mxu1  ;;  %v11730_v6 = vld [vmem:[#allocation32_spill] sm:$0xff] }
 0x307   :  { %v2597_v29 = vpop.f32.mrb[16].mxu0 }
 0x308   :  { %v3353_v14 = vadd.f32 %v11726_v34, %v2920_v63  ;;  %v6191_v27 = vadd.f32 %v2597_v29, %v11727_v56  ;;  %v2599_v10 = vpop.f32.mrb[17].mxu0  ;;  %v3955_v45 = vadd.f32 %v9693_v21, %v3643_v55  ;;  %v11731_v21 = vld [vmem:[#allocation199_spill] sm:$0xff] }
 0x309   :  { %v9833_v24 = vpop.f32.mrb[214].mxu1  ;;  %v11732_v10 = vld [vmem:[#allocation196_spill] sm:$0xff] }
 0x30a   :  { %v2930_v32 = vadd.f32 %v6191_v27, %v11728_v49  ;;  %v3650_v44 = vadd.f32 %v9595_v43, %v3353_v14  ;;  %v9831_v39 = vadd.f32 %v9751_v26, %v3955_v45  ;;  %v9837_v34 = vpop.f32.mrb[215].mxu1  ;;  %v11733_v49 = vld [vmem:[#allocation33_spill] sm:$0xff] }
 0x30b   :  { %v2604_v53 = vpop.f32.mrb[18].mxu0 }
 0x30c   :  { %v3359_v28 = vadd.f32 %v11729_v9, %v2930_v32  ;;  %v6192_v63 = vadd.f32 %v2604_v53, %v11730_v6  ;;  %v2606_v29 = vpop.f32.mrb[19].mxu0  ;;  %v3963_v56 = vadd.f32 %v9691_v35, %v3650_v44  ;;  %v11734_v35 = vld [vmem:[#allocation204_spill] sm:$0xff] }
 0x30d   :  { %v9845_v14 = vpop.f32.mrb[216].mxu1  ;;  %v4736_v29 = vlaneseq }
 0x30e   :  { %v2940_v55 = vadd.f32 %v6192_v63, %v11731_v21  ;;  %v9842_v27 = vadd.f32 %v9747_v12, %v3963_v56  ;;  %v3657_v26 = vadd.f32 %v9607_v15, %v3359_v28  ;;  %v9849_v9 = vpop.f32.mrb[217].mxu1  ;;  %v11735_v56 = vld [vmem:[#allocation168_spill] sm:$0xff] }
 0x30f   :  { %v2611_v43 = vpop.f32.mrb[20].mxu0 }
 0x310   :  { %v3365_v45 = vadd.f32 %v11732_v10, %v2940_v55  ;;  %v6193_v32 = vadd.f32 %v2611_v43, %v11733_v49  ;;  %v2613_v53 = vpop.f32.mrb[21].mxu0  ;;  %v3971_v6 = vadd.f32 %v9697_v0, %v3657_v26  ;;  %v11736_v55 = vld [vmem:[#allocation35_spill] sm:$0xff] }
 0x311   :  { %v9857_v28 = vpop.f32.mrb[218].mxu1  ;;  %v11737_v26 = vld [vmem:[#allocation43_spill] sm:$0xff] }
 0x312   :  { %v2950_v44 = vadd.f32 %v6193_v32, %v11734_v35  ;;  %v3664_v63 = vadd.f32 %v9603_v11, %v3365_v45  ;;  %v9855_v12 = vadd.f32 %v9759_v1, %v3971_v6  ;;  %v9861_v49 = vpop.f32.mrb[219].mxu1  ;;  %v9871_v6 = vshrl.u32 %v4736_v29, 7  ;;  %v11738_v35 = vld [vmem:[#allocation200_spill] sm:$0xff] }
 0x313   :  { %v2618_v15 = vpop.f32.mrb[22].mxu0 }
 0x314   :  { %v3371_v21 = vadd.f32 %v11735_v56, %v2950_v44  ;;  %v6194_v43 = vadd.f32 %v2618_v15, %v11736_v55  ;;  %v2620_v10 = vpop.f32.mrb[23].mxu0  ;;  %v3979_v0 = vadd.f32 %v9695_v3, %v3664_v63  ;;  %v11739_v15 = vld [vmem:[#allocation38_spill] sm:$0xff]  ;;  %v11740_v63 = vld [vmem:[#allocation133_spill] sm:$0xff]  ;;  %v4738_v29 = vadd.s32 8, %v9871_v6 }
 0x315   :  { %v9869_v53 = vpop.f32.mrb[220].mxu1 }
 0x316   :  { %v2960_v32 = vadd.f32 %v6194_v43, %v11737_v26  ;;  %v9866_v11 = vadd.f32 %v9755_v4, %v3979_v0  ;;  %v3671_v1 = vadd.f32 %v9615_v2, %v3371_v21  ;;  %v9875_v10 = vpop.f32.mrb[221].mxu1  ;;  %v11742_v26 = vld [vmem:[#allocation201_spill] sm:$0xff] }
 0x317   :  { %v2625_v45 = vpop.f32.mrb[24].mxu0 }
 0x318   :  { %v3377_v44 = vadd.f32 %v11738_v35, %v2960_v32  ;;  %v6195_v56 = vadd.f32 %v2625_v45, %v11739_v15  ;;  %v2627_v55 = vpop.f32.mrb[25].mxu0  ;;  %v3987_v3 = vadd.f32 %v9701_v59, %v3671_v1  ;;  %v11743_v45 = vld [vmem:[#allocation40_spill] sm:$0xff]  ;;  %v9893_v59 = vld [vmem:[%s10154_s2] ss:$0 sm:$0xff] }
 0x319   :  { %v9883_v0 = vpop.f32.mrb[222].mxu1  ;;  %vm4775_vm0 = vcmp.eq.s32.totalorder %v4738_v29, %v9893_v59  ;;  %vm4774_vm1 = vcmp.eq.s32.totalorder %v9871_v6, %v9893_v59  ;;  %v11748_v29 = vld [vmem:[#allocation134_spill] sm:$0xff] }
 0x31a   :  { %v2970_v43 = vadd.f32 %v6195_v56, %v11740_v63  ;;  %v3678_v4 = vadd.f32 %v9611_v42, %v3377_v44  ;;  %v9881_v2 = vadd.f32 %v9770_v38, %v3987_v3  ;;  %11741 = vst [vmem:[#allocation179_spill] sm:$0xff] %v9883_v0  ;;  %v9888_v55 = vpop.f32.mrb[223].mxu1  ;;  %v11745_v38 = vld [vmem:[#allocation130_spill] sm:$0xff] }
 0x31b   :  { %v2632_v21 = vpop.f32.mrb[26].mxu0  ;;  %11744 = vst [vmem:[#allocation180_spill] sm:$0xff] %v9888_v55 }
 0x31c   :  { %v3383_v32 = vadd.f32 %v11742_v26, %v2970_v43  ;;  %v6196_v35 = vadd.f32 %v2632_v21, %v11743_v45  ;;  %v2634_v15 = vpop.f32.mrb[27].mxu0  ;;  %v3995_v42 = vadd.f32 %v9699_v62, %v3678_v4  ;;  %v4739_v43 = vadd.s32 16, %v9871_v6  ;;  %v11746_v21 = vld [vmem:[#allocation52_spill] sm:$0xff]  ;;  %v11747_v45 = vld [vmem:[#allocation42_spill] sm:$0xff] }
 0x31d   :  { %v5625_v63 = vpop.f32.mrb[224].mxu1 }
 0x31e   :  { %v2980_v1 = vadd.f32 %v6196_v35, %v11745_v38  ;;  %v9898_v44 = vadd.f32 %v9765_v40, %v3995_v42  ;;  %v3685_v56 = vadd.f32 %v9623_v23, %v3383_v32  ;;  %v4553_v4 = vadd.f32 %v5625_v63, %v9772_v17  ;;  %v4546_v40 = vpop.f32.mrb[225].mxu1  ;;  %v11750_v63 = vld [vmem:[#allocation44_spill] sm:$0xff] }
 0x31f   :  { %v2639_v3 = vpop.f32.mrb[28].mxu0  ;;  %v4547_v23 = vadd.f32 %v4546_v40, %v9763_v52  ;;  %v4740_v32 = vadd.s32 24, %v9871_v6  ;;  %vm4776_vm2 = vcmp.eq.s32.totalorder %v4739_v43, %v9893_v59  ;;  %v4741_v17 = vadd.s32 32, %v9871_v6  ;;  %v11751_v40 = vld [vmem:[#allocation49_spill] sm:$0xff] }
 0x320   :  { %v3389_v26 = vadd.f32 %v11746_v21, %v2980_v1  ;;  %v6197_v62 = vadd.f32 %v2639_v3, %v11747_v45  ;;  %v2641_v35 = vpop.f32.mrb[29].mxu0  ;;  %v4003_v15 = vadd.f32 %v9705_v46, %v3685_v56  ;;  %v4807_v38 = vsel %vm4775_vm0, %v4553_v4, 0.0  ;;  %v11749_v46 = vld [vmem:[#allocation57_spill] sm:$0xff] }
 0x321   :  { %v4806_v1 = vsel %vm4774_vm1, %v4547_v23, 0.0  ;;  %v5628_v21 = vpop.f32.mrb[226].mxu1  ;;  %vm4777_vm3 = vcmp.eq.s32.totalorder %v4740_v32, %v9893_v59  ;;  %vm4778_vm4 = vcmp.eq.s32.totalorder %v4741_v17, %v9893_v59 }
 0x322   :  { %v2990_v42 = vadd.f32 %v6197_v62, %v11748_v29  ;;  %v3692_v0 = vadd.f32 %v9619_v18, %v3389_v26  ;;  %v9914_v55 = vadd.f32 %v9781_v5, %v4003_v15  ;;  %v4838_v52 = vadd.f32 %v4807_v38, %v4806_v1  ;;  %v4558_v35 = vpop.f32.mrb[227].mxu1 }
 0x323   :  { %v2646_v3 = vpop.f32.mrb[30].mxu0  ;;  %v4565_v62 = vadd.f32 %v5628_v21, %v9794_v47  ;;  %v4559_v18 = vadd.f32 %v4558_v35, %v9784_v60  ;;  %v4742_v5 = vadd.s32 40, %v9871_v6  ;;  %v4743_v47 = vadd.s32 48, %v9871_v6  ;;  %v11752_v60 = vld [vmem:[#allocation2_spill] sm:$0xff] }
 0x324   :  { %v3395_v56 = vadd.f32 %v11749_v46, %v2990_v42  ;;  %v6198_v45 = vadd.f32 %v2646_v3, %v11750_v63  ;;  %v2648_v4 = vpop.f32.mrb[31].mxu0  ;;  %v4011_v26 = vadd.f32 %v9703_v57, %v3692_v0  ;;  %v11753_v57 = vld [vmem:[#allocation46_spill] sm:$0xff]  ;;  %v4744_v35 = vadd.s32 56, %v9871_v6 }
 0x325   :  { %v4808_v23 = vsel %vm4776_vm2, %v4559_v18, 0.0  ;;  %v5631_v42 = vpop.f32.mrb[228].mxu1  ;;  %vm4779_vm5 = vcmp.eq.s32.totalorder %v4742_v5, %v9893_v59  ;;  %vm4780_vm6 = vcmp.eq.s32.totalorder %v4743_v47, %v9893_v59 }
 0x326   :  { %v3000_v15 = vadd.f32 %v6198_v45, %v11751_v40  ;;  %v3699_v43 = vadd.f32 %v9631_v31, %v3395_v56  ;;  %v9930_v38 = vadd.f32 %v9776_v51, %v4011_v26  ;;  %v4839_v3 = vadd.f32 %v4838_v52, %v4808_v23  ;;  %v4570_v46 = vpop.f32.mrb[229].mxu1  ;;  %v11754_v45 = vld [vmem:[#allocation138_spill] sm:$0xff] }
 0x327   :  { %v2653_v29 = vpop.f32.mrb[32].mxu0  ;;  %v4577_v21 = vadd.f32 %v5631_v42, %v9818_v25  ;;  %v4809_v31 = vsel %vm4777_vm3, %v4565_v62, 0.0  ;;  %v4571_v56 = vadd.f32 %v4570_v46, %v9805_v36  ;;  %v4745_v62 = vadd.s32 64, %v9871_v6 }
 0x328   :  { %v3401_v1 = vadd.f32 %v11752_v60, %v3000_v15  ;;  %v6199_v0 = vadd.f32 %v2653_v29, %v11753_v57  ;;  %v2655_v32 = vpop.f32.mrb[33].mxu0  ;;  %v4019_v63 = vadd.f32 %v9709_v13, %v3699_v43  ;;  %v4840_v51 = vadd.f32 %v4839_v3, %v4809_v31  ;;  %v11755_v13 = vld [vmem:[#allocation60_spill] sm:$0xff]  ;;  %v11756_v43 = vld [vmem:[#allocation47_spill] sm:$0xff] }
 0x329   :  { %v4810_v18 = vsel %vm4778_vm4, %v4571_v56, 0.0  ;;  %v5634_v26 = vpop.f32.mrb[230].mxu1  ;;  %v4811_v17 = vsel %vm4779_vm5, %v4577_v21, 0.0  ;;  %vm4781_vm7 = vcmp.eq.s32.totalorder %v4744_v35, %v9893_v59  ;;  %vm4782_vm8 = vcmp.eq.s32.totalorder %v4745_v62, %v9893_v59 }
 0x32a   :  { %v3010_v4 = vadd.f32 %v6199_v0, %v11754_v45  ;;  %v3706_v52 = vadd.f32 %v9627_v54, %v3401_v1  ;;  %v9946_v36 = vadd.f32 %v9792_v33, %v4019_v63  ;;  %v4841_v15 = vadd.f32 %v4840_v51, %v4810_v18  ;;  %v4582_v42 = vpop.f32.mrb[231].mxu1  ;;  %v11757_v33 = vld [vmem:[#allocation156_spill] sm:$0xff]  ;;  %v11759_v63 = vld [vmem:[#allocation54_spill] sm:$0xff]  ;;  %v11760_v18 = vld [vmem:[#allocation141_spill] sm:$0xff] }
 0x32b   :  { %v2660_v25 = vpop.f32.mrb[34].mxu0  ;;  %v4589_v29 = vadd.f32 %v5634_v26, %v9842_v27  ;;  %v4583_v60 = vadd.f32 %v4582_v42, %v9831_v39  ;;  %v4746_v1 = vadd.s32 72, %v9871_v6  ;;  %v4747_v39 = vadd.s32 80, %v9871_v6 }
 0x32c   :  { %v3407_v40 = vadd.f32 %v11755_v13, %v3010_v4  ;;  %v6200_v23 = vadd.f32 %v2660_v25, %v11756_v43  ;;  %v2662_v54 = vpop.f32.mrb[35].mxu0  ;;  %v4027_v3 = vadd.f32 %v9707_v58, %v3706_v52  ;;  %v4842_v0 = vadd.f32 %v4841_v15, %v4811_v17  ;;  %v11758_v58 = vld [vmem:[#allocation202_spill] sm:$0xff] }
 0x32d   :  { %v4812_v27 = vsel %vm4780_vm6, %v4583_v60, 0.0  ;;  %v5637_v31 = vpop.f32.mrb[232].mxu1  ;;  %v4813_v47 = vsel %vm4781_vm7, %v4589_v29, 0.0  ;;  %vm4783_vm9 = vcmp.eq.s32.totalorder %v4746_v1, %v9893_v59  ;;  %v4748_v26 = vadd.s32 88, %v9871_v6  ;;  %v11761_v29 = vld [vmem:[#allocation55_spill] sm:$0xff] }
 0x32e   :  { %v3020_v57 = vadd.f32 %v6200_v23, %v11757_v33  ;;  %v3713_v32 = vadd.f32 %v9639_v7, %v3407_v40  ;;  %v9964_v5 = vadd.f32 %v9787_v22, %v4027_v3  ;;  %v4843_v56 = vadd.f32 %v4842_v0, %v4812_v27  ;;  %v4594_v51 = vpop.f32.mrb[233].mxu1  ;;  %v11763_v0 = vld [vmem:[#allocation8_spill] sm:$0xff] }
 0x32f   :  { %v2667_v46 = vpop.f32.mrb[36].mxu0  ;;  %v4601_v4 = vadd.f32 %v5637_v31, %v9866_v11  ;;  %v4595_v35 = vadd.f32 %v4594_v51, %v9855_v12  ;;  %vm4784_vm10 = vcmp.eq.s32.totalorder %v4747_v39, %v9893_v59  ;;  %v4749_v43 = vadd.s32 96, %v9871_v6  ;;  %v11764_v31 = vld [vmem:[#allocation207_spill] sm:$0xff]  ;;  %v11766_v51 = vld [vmem:[#allocation18_spill] sm:$0xff] }
 0x330   :  { %v3413_v21 = vadd.f32 %v11758_v58, %v3020_v57  ;;  %v6201_v45 = vadd.f32 %v2667_v46, %v11759_v63  ;;  %v2669_v7 = vpop.f32.mrb[37].mxu0  ;;  %v4035_v52 = vadd.f32 %v9713_v37, %v3713_v32  ;;  %v4844_v22 = vadd.f32 %v4843_v56, %v4813_v47 }
 0x331   :  { %v4814_v40 = vsel %vm4782_vm8, %v4595_v35, 0.0  ;;  %v5640_v15 = vpop.f32.mrb[234].mxu1  ;;  %v4815_v62 = vsel %vm4783_vm9, %v4601_v4, 0.0  ;;  %v4750_v3 = vadd.s32 104, %v9871_v6  ;;  %vm4785_vm11 = vcmp.eq.s32.totalorder %v4748_v26, %v9893_v59  ;;  %v11767_v35 = vld [vmem:[#allocation144_spill] sm:$0xff] }
 0x332   :  { %v3030_v25 = vadd.f32 %v6201_v45, %v11760_v18  ;;  %v3720_v13 = vadd.f32 %v9635_v30, %v3413_v21  ;;  %v9980_v12 = vadd.f32 %v9803_v48, %v4035_v52  ;;  %v4845_v23 = vadd.f32 %v4844_v22, %v4814_v40  ;;  %v4606_v17 = vpop.f32.mrb[235].mxu1  ;;  %v11762_v48 = vld [vmem:[#allocation139_spill] sm:$0xff] }
 0x333   :  { %v2674_v11 = vpop.f32.mrb[38].mxu0  ;;  %v4613_v42 = vadd.f32 %v5640_v15, %v9898_v44  ;;  %v4607_v60 = vadd.f32 %v4606_v17, %v9881_v2  ;;  %vm4786_vm12 = vcmp.eq.s32.totalorder %v4749_v43, %v9893_v59  ;;  %v4751_v2 = vadd.s32 112, %v9871_v6  ;;  %v11765_v21 = vld [vmem:[#allocation111_spill] sm:$0xff] }
 0x334   :  { %v3419_v37 = vadd.f32 %v9516_v50, %v3030_v25  ;;  %v6202_v54 = vadd.f32 %v2674_v11, %v11761_v29  ;;  %v2676_v30 = vpop.f32.mrb[39].mxu0  ;;  %v4043_v33 = vadd.f32 %v9711_v20, %v3720_v13  ;;  %v4846_v50 = vadd.f32 %v4845_v23, %v4815_v62  ;;  %v11768_v25 = vld [vmem:[#allocation16_spill] sm:$0xff]  ;;  %v11770_v23 = vld [vmem:[#allocation185_spill] sm:$0xff] }
 0x335   :  { %v4816_v44 = vsel %vm4784_vm10, %v4607_v60, 0.0  ;;  %v5643_v46 = vpop.f32.mrb[236].mxu1  ;;  %v4817_v7 = vsel %vm4785_vm11, %v4613_v42, 0.0  ;;  %vm4787_vm13 = vcmp.eq.s32.totalorder %v4750_v3, %v9893_v59  ;;  %vm4788_vm14 = vcmp.eq.s32.totalorder %v4751_v2, %v9893_v59  ;;  %v11769_v11 = vld [vmem:[#allocation208_spill] sm:$0xff]  ;;  %v11771_v60 = vld [vmem:[#allocation34_spill] sm:$0xff] }
 0x336   :  { %v3040_v57 = vadd.f32 %v6202_v54, %v11762_v48  ;;  %v3727_v32 = vadd.f32 %v11763_v0, %v3419_v37  ;;  %v4376_v1 = vadd.f32 %v9798_v41, %v4043_v33  ;;  %v4847_v58 = vadd.f32 %v4846_v50, %v4816_v44  ;;  %v4618_v4 = vpop.f32.mrb[237].mxu1  ;;  %v11772_v48 = vld [vmem:[#allocation53_spill] sm:$0xff] }
 0x337   :  { %v2681_v27 = vpop.f32.mrb[40].mxu0  ;;  %v4625_v63 = vadd.f32 %v5643_v46, %v9930_v38  ;;  %v4619_v39 = vadd.f32 %v4618_v4, %v9914_v55  ;;  %v4752_v41 = vadd.s32 120, %v9871_v6  ;;  %v4753_v40 = vadd.s32 128, %v9871_v6  ;;  %v11773_v50 = vld [vmem:[#allocation21_spill] sm:$0xff] }
 0x338   :  { %v3425_v20 = vadd.f32 %v11764_v31, %v3040_v57  ;;  %v6203_v56 = vadd.f32 %v2681_v27, %v11765_v21  ;;  %v2683_v45 = vpop.f32.mrb[41].mxu0  ;;  %v4051_v47 = vadd.f32 %v11766_v51, %v3727_v32  ;;  %v4848_v18 = vadd.f32 %v4847_v58, %v4817_v7  ;;  %v11774_v27 = vld [vmem:[#allocation61_spill] sm:$0xff] }
 0x339   :  { %v4818_v26 = vsel %vm4786_vm12, %v4619_v39, 0.0  ;;  %v5646_v13 = vpop.f32.mrb[238].mxu1  ;;  %v4819_v43 = vsel %vm4787_vm13, %v4625_v63, 0.0  ;;  %v4754_v62 = vadd.s32 136, %v9871_v6  ;;  %vm4789_vm15 = vcmp.eq.s32.totalorder %v4752_v41, %v9893_v59  ;;  %v11776_v4 = vld [vmem:[#allocation37_spill] sm:$0xff]  ;;  %v11777_v39 = vld [vmem:[#allocation70_spill] sm:$0xff] }
 0x33a   :  { %v3050_v52 = vadd.f32 %v6203_v56, %v11767_v35  ;;  %v3734_v22 = vadd.f32 %v11768_v25, %v3425_v20  ;;  %v4382_v55 = vadd.f32 %v9813_v19, %v4051_v47  ;;  %v4849_v37 = vadd.f32 %v4848_v18, %v4818_v26  ;;  %v4630_v30 = vpop.f32.mrb[239].mxu1  ;;  %v11775_v20 = vld [vmem:[#allocation56_spill] sm:$0xff]  ;;  %v11778_v35 = vld [vmem:[#allocation9_spill] sm:$0xff] }
 0x33b   :  { %v2688_v38 = vpop.f32.mrb[42].mxu0  ;;  %v4637_v54 = vadd.f32 %v5646_v13, %v9964_v5  ;;  %v4631_v17 = vadd.f32 %v4630_v30, %v9946_v36  ;;  %vm4790_vm0 = vcmp.eq.s32.totalorder %v4753_v40, %v9893_v59  ;;  %v4755_v3 = vadd.s32 144, %v9871_v6  ;;  %v11780_v13 = vld [vmem:[#allocation58_spill] sm:$0xff] }
 0x33c   :  { %v3431_v15 = vadd.f32 %v11769_v11, %v3050_v52  ;;  %v6204_v29 = vadd.f32 %v2688_v38, %v11770_v23  ;;  %v2690_v42 = vpop.f32.mrb[43].mxu0  ;;  %v4059_v33 = vadd.f32 %v11771_v60, %v3734_v22  ;;  %v4850_v57 = vadd.f32 %v4849_v37, %v4819_v43  ;;  %v11779_v22 = vld [vmem:[#allocation169_spill] sm:$0xff]  ;;  %v11783_v60 = vld [vmem:[#allocation172_spill] sm:$0xff] }
 0x33d   :  { %v4820_v5 = vsel %vm4788_vm14, %v4631_v17, 0.0  ;;  %v5649_v44 = vpop.f32.mrb[240].mxu1  ;;  %v4821_v45 = vsel %vm4789_vm15, %v4637_v54, 0.0  ;;  %vm4791_vm1 = vcmp.eq.s32.totalorder %v4754_v62, %v9893_v59  ;;  %v4756_v47 = vadd.s32 152, %v9871_v6  ;;  %v11781_v54 = vld [vmem:[#allocation90_spill] sm:$0xff]  ;;  %v11782_v43 = vld [vmem:[#allocation145_spill] sm:$0xff] }
 0x33e   :  { %v3060_v19 = vadd.f32 %v6204_v29, %v11772_v48  ;;  %v3741_v0 = vadd.f32 %v11773_v50, %v3431_v15  ;;  %v4388_v36 = vadd.f32 %v9809_v16, %v4059_v33  ;;  %v4851_v31 = vadd.f32 %v4850_v57, %v4820_v5  ;;  %v4642_v63 = vpop.f32.mrb[241].mxu1  ;;  %v11784_v50 = vld [vmem:[#allocation6_spill] sm:$0xff] }
 0x33f   :  { %v2695_v32 = vpop.f32.mrb[44].mxu0  ;;  %v4649_v21 = vadd.f32 %v5649_v44, %v4376_v1  ;;  %v4643_v2 = vadd.f32 %v4642_v63, %v9980_v12  ;;  %vm4792_vm2 = vcmp.eq.s32.totalorder %v4755_v3, %v9893_v59  ;;  %v4757_v12 = vadd.s32 160, %v9871_v6  ;;  %v11788_v63 = vld [vmem:[#allocation171_spill] sm:$0xff] }
 0x340   :  { %v3437_v46 = vadd.f32 %v11774_v27, %v3060_v19  ;;  %v6205_v58 = vadd.f32 %v2695_v32, %v11775_v20  ;;  %v2697_v56 = vpop.f32.mrb[45].mxu0  ;;  %v4067_v7 = vadd.f32 %v11776_v4, %v3741_v0  ;;  %v4852_v16 = vadd.f32 %v4851_v31, %v4821_v45  ;;  %v11785_v32 = vld [vmem:[#allocation178_spill] sm:$0xff] }
 0x341   :  { %v4822_v18 = vsel %vm4790_vm0, %v4643_v2, 0.0  ;;  %v5652_v41 = vpop.f32.mrb[242].mxu1  ;;  %v4823_v40 = vsel %vm4791_vm1, %v4649_v21, 0.0  ;;  %v4758_v30 = vadd.s32 168, %v9871_v6  ;;  %vm4793_vm3 = vcmp.eq.s32.totalorder %v4756_v47, %v9893_v59 }
 0x342   :  { %v3070_v51 = vadd.f32 %v6205_v58, %v11777_v39  ;;  %v3748_v52 = vadd.f32 %v11778_v35, %v3437_v46  ;;  %v4394_v25 = vadd.f32 %v9825_v61, %v4067_v7  ;;  %v4853_v38 = vadd.f32 %v4852_v16, %v4822_v18  ;;  %v4654_v23 = vpop.f32.mrb[243].mxu1  ;;  %v11786_v46 = vld [vmem:[#allocation41_spill] sm:$0xff] }
 0x343   :  { %v2702_v1 = vpop.f32.mrb[46].mxu0  ;;  %v4661_v15 = vadd.f32 %v5652_v41, %v4388_v36  ;;  %v4655_v29 = vadd.f32 %v4654_v23, %v4382_v55  ;;  %vm4794_vm4 = vcmp.eq.s32.totalorder %v4757_v12, %v9893_v59  ;;  %v4759_v55 = vadd.s32 176, %v9871_v6  ;;  %v11789_v16 = vld [vmem:[#allocation213_spill] sm:$0xff] }
 0x344   :  { %v3443_v26 = vadd.f32 %v11779_v22, %v3070_v51  ;;  %v6206_v11 = vadd.f32 %v2702_v1, %v11780_v13  ;;  %v2704_v37 = vpop.f32.mrb[47].mxu0  ;;  %v4075_v42 = vadd.f32 %v11781_v54, %v3748_v52  ;;  %v4854_v17 = vadd.f32 %v4853_v38, %v4823_v40  ;;  %v11790_v52 = vld [vmem:[#allocation113_spill] sm:$0xff]  ;;  %v11791_v1 = vld [vmem:[#allocation20_spill] sm:$0xff] }
 0x345   :  { %v4824_v48 = vsel %vm4792_vm2, %v4655_v29, 0.0  ;;  %v5655_v62 = vpop.f32.mrb[244].mxu1  ;;  %v4825_v20 = vsel %vm4793_vm3, %v4661_v15, 0.0  ;;  %vm4795_vm5 = vcmp.eq.s32.totalorder %v4758_v30, %v9893_v59  ;;  %v4760_v51 = vadd.s32 184, %v9871_v6  ;;  %v11793_v15 = vld [vmem:[#allocation10_spill] sm:$0xff] }
 0x346   :  { %v3080_v61 = vadd.f32 %v6206_v11, %v11782_v43  ;;  %v3755_v33 = vadd.f32 %v11783_v60, %v3443_v26  ;;  %v4400_v57 = vadd.f32 %v9821_v8, %v4075_v42  ;;  %v4855_v5 = vadd.f32 %v4854_v17, %v4824_v48  ;;  %v4666_v27 = vpop.f32.mrb[245].mxu1  ;;  %v11787_v8 = vld [vmem:[#allocation72_spill] sm:$0xff]  ;;  %v11792_v26 = vld [vmem:[#allocation149_spill] sm:$0xff] }
 0x347   :  { %v2709_v19 = vpop.f32.mrb[48].mxu0  ;;  %v4667_v58 = vadd.f32 %v4666_v27, %v4394_v25  ;;  %vm4796_vm6 = vcmp.eq.s32.totalorder %v4759_v55, %v9893_v59  ;;  %vm4797_vm7 = vcmp.eq.s32.totalorder %v4760_v51, %v9893_v59  ;;  %v4761_v54 = vadd.s32 192, %v9871_v6  ;;  %v11794_v42 = vld [vmem:[#allocation209_spill] sm:$0xff] }
 0x348   :  { %v3449_v0 = vadd.f32 %v11784_v50, %v3080_v61  ;;  %v6207_v44 = vadd.f32 %v2709_v19, %v11785_v32  ;;  %v2711_v36 = vpop.f32.mrb[49].mxu0  ;;  %v4083_v31 = vadd.f32 %v11786_v46, %v3755_v33  ;;  %v4673_v3 = vadd.f32 %v5655_v62, %v4400_v57  ;;  %v11795_v17 = vld [vmem:[#allocation189_spill] sm:$0xff]  ;;  %v11796_v19 = vld [vmem:[#allocation51_spill] sm:$0xff]  ;;  %v11799_v46 = vld [vmem:[#allocation214_spill] sm:$0xff] }
 0x349   :  { %v4856_v56 = vadd.f32 %v4855_v5, %v4825_v20  ;;  %v4826_v4 = vsel %vm4794_vm4, %v4667_v58, 0.0  ;;  %v5658_v39 = vpop.f32.mrb[246].mxu1  ;;  %v11797_v62 = vld [vmem:[#allocation153_spill] sm:$0xff]  ;;  %v11798_v50 = vld [vmem:[#allocation67_spill] sm:$0xff]  ;;  %v4762_v5 = vadd.s32 200, %v9871_v6  ;;  %vm4798_vm8 = vcmp.eq.s32.totalorder %v4761_v54, %v9893_v59 }
 0x34a   :  { %v3090_v21 = vadd.f32 %v6207_v44, %v11787_v8  ;;  %v3762_v45 = vadd.f32 %v11788_v63, %v3449_v0  ;;  %v4406_v2 = vadd.f32 %v9837_v34, %v4083_v31  ;;  %v4678_v22 = vpop.f32.mrb[247].mxu1  ;;  %v4827_v34 = vsel %vm4795_vm5, %v4673_v3, 0.0  ;;  %v11800_v20 = vld [vmem:[#allocation45_spill] sm:$0xff]  ;;  %v11801_v58 = vld [vmem:[#allocation115_spill] sm:$0xff] }
 0x34b   :  { %v2716_v7 = vpop.f32.mrb[50].mxu0  ;;  %v4857_v35 = vadd.f32 %v4856_v56, %v4826_v4  ;;  %vm4799_vm9 = vcmp.eq.s32.totalorder %v4762_v5, %v9893_v59  ;;  %v4765_v5 = vadd.s32 224, %v9871_v6 }
 0x34c   :  { %v3455_v47 = vadd.f32 %v11789_v16, %v3090_v21  ;;  %v6208_v18 = vadd.f32 %v2716_v7, %v11790_v52  ;;  %v4091_v41 = vadd.f32 %v11791_v1, %v3762_v45  ;;  %v2718_v25 = vpop.f32.mrb[51].mxu0  ;;  %v4679_v12 = vadd.f32 %v4678_v22, %v4406_v2  ;;  %v11802_v2 = vld [vmem:[#allocation151_spill] sm:$0xff]  ;;  %v11803_v7 = vld [vmem:[#allocation78_spill] sm:$0xff]  ;;  %v11804_v52 = vld [vmem:[#allocation12_spill] sm:$0xff] }
 0x34d   :  { %v4858_v11 = vadd.f32 %v4857_v35, %v4827_v34  ;;  %v5661_v29 = vpop.f32.mrb[248].mxu1  ;;  %v4763_v16 = vadd.s32 208, %v9871_v6  ;;  %vm4802_vm12 = vcmp.eq.s32.totalorder %v4765_v5, %v9893_v59 }
 0x34e   :  { %v3100_v38 = vadd.f32 %v6208_v18, %v11792_v26  ;;  %v4412_v13 = vadd.f32 %v9833_v24, %v4091_v41  ;;  %v3769_v37 = vadd.f32 %v11793_v15, %v3455_v47  ;;  %v4828_v23 = vsel %vm4796_vm6, %v4679_v12, 0.0  ;;  %v4690_v48 = vpop.f32.mrb[249].mxu1  ;;  %v11805_v41 = vld [vmem:[#allocation192_spill] sm:$0xff] }
 0x34f   :  { %v2723_v40 = vpop.f32.mrb[52].mxu0  ;;  %v4859_v30 = vadd.f32 %v4858_v11, %v4828_v23  ;;  %v11808_v11 = vld [vmem:[#allocation25_spill] sm:$0xff]  ;;  %vm4800_vm10 = vcmp.eq.s32.totalorder %v4763_v16, %v9893_v59  ;;  %v11819_v16 = vld [vmem:[#allocation50_spill] sm:$0xff] }
 0x350   :  { %v3461_v43 = vadd.f32 %v11794_v42, %v3100_v38  ;;  %v4685_v61 = vadd.f32 %v5658_v39, %v4412_v13  ;;  %v6209_v60 = vadd.f32 %v2723_v40, %v11795_v17  ;;  %v2725_v33 = vpop.f32.mrb[53].mxu0  ;;  %v4099_v24 = vadd.f32 %v11796_v19, %v3769_v37  ;;  %v11807_v38 = vld [vmem:[#allocation157_spill] sm:$0xff] }
 0x351   :  { %v5664_v27 = vpop.f32.mrb[250].mxu1  ;;  %v4764_v37 = vadd.s32 216, %v9871_v6  ;;  %v11809_v42 = vld [vmem:[#allocation13_spill] sm:$0xff] }
 0x352   :  { %v4829_v57 = vsel %vm4797_vm7, %v4685_v61, 0.0  ;;  %v3110_v55 = vadd.f32 %v6209_v60, %v11797_v62  ;;  %v3776_v0 = vadd.f32 %v11798_v50, %v3461_v43  ;;  %v4418_v44 = vadd.f32 %v9849_v9, %v4099_v24  ;;  %v4702_v56 = vpop.f32.mrb[251].mxu1  ;;  %v11810_v61 = vld [vmem:[#allocation62_spill] sm:$0xff]  ;;  %v11811_v17 = vld [vmem:[#allocation181_spill] sm:$0xff] }
 0x353   :  { %v2730_v32 = vpop.f32.mrb[54].mxu0  ;;  %v4860_v36 = vadd.f32 %v4859_v30, %v4829_v57  ;;  %v11812_v57 = vld [vmem:[#allocation79_spill] sm:$0xff]  ;;  %vm4801_vm11 = vcmp.eq.s32.totalorder %v4764_v37, %v9893_v59 }
 0x354   :  { %v3467_v31 = vadd.f32 %v11799_v46, %v3110_v55  ;;  %v4107_v3 = vadd.f32 %v11800_v20, %v3776_v0  ;;  %v6210_v8 = vadd.f32 %v2730_v32, %v11801_v58  ;;  %v2732_v21 = vpop.f32.mrb[55].mxu0  ;;  %v4691_v63 = vadd.f32 %v4690_v48, %v4418_v44  ;;  %v11813_v55 = vld [vmem:[#allocation29_spill] sm:$0xff]  ;;  %v11814_v44 = vld [vmem:[#allocation216_spill] sm:$0xff]  ;;  %v4880_v58 = vpop.permute.xlu0 %4879 }
 0x355   :  { %v5667_v47 = vpop.f32.mrb[252].mxu1 }
 0x356   :  { %v4424_v45 = vadd.f32 %v9845_v14, %v4107_v3  ;;  %v3120_v4 = vadd.f32 %v6210_v8, %v11802_v2  ;;  %v3783_v39 = vadd.f32 %v11803_v7, %v3467_v31  ;;  %v4830_v9 = vsel %vm4798_vm8, %v4691_v63, 0.0  ;;  %v4714_v34 = vpop.f32.mrb[253].mxu1  ;;  %v11806_v14 = vld [vmem:[#allocation175_spill] sm:$0xff]  ;;  %v11815_v31 = vld [vmem:[#allocation116_spill] sm:$0xff]  ;;  %v11816_v8 = vld [vmem:[#allocation109_spill] sm:$0xff] }
 0x357   :  { %v2737_v51 = vpop.f32.mrb[56].mxu0  ;;  %v4861_v1 = vadd.f32 %v4860_v36, %v4830_v9  ;;  %v11817_v63 = vld [vmem:[#allocation160_spill] sm:$0xff] }
 0x358   :  { %v4697_v35 = vadd.f32 %v5661_v29, %v4424_v45  ;;  %v3473_v18 = vadd.f32 %v11804_v52, %v3120_v4  ;;  %v6211_v25 = vadd.f32 %v2737_v51, %v11805_v41  ;;  %v2739_v22 = vpop.f32.mrb[57].mxu0  ;;  %v4115_v12 = vadd.f32 %v11806_v14, %v3783_v39  ;;  %v11818_v2 = vld [vmem:[#allocation80_spill] sm:$0xff] }
 0x359   :  { %v10099_v54 = vpop.f32.mrb[254].mxu1  ;;  %v11820_v52 = vld [vmem:[#allocation176_spill] sm:$0xff] }
 0x35a   :  { %v4831_v26 = vsel %vm4799_vm9, %v4697_v35, 0.0  ;;  %v3130_v13 = vadd.f32 %v6211_v25, %v11807_v38  ;;  %v3790_v15 = vadd.f32 %v11808_v11, %v3473_v18  ;;  %v4430_v40 = vadd.f32 %v9861_v49, %v4115_v12  ;;  %v4726_v48 = vpop.f32.mrb[255].mxu1  ;;  %v11822_v12 = vld [vmem:[#allocation158_spill] sm:$0xff]  ;;  %v11823_v38 = vld [vmem:[#allocation83_spill] sm:$0xff] }
 0x35b   :  { %v2744_v23 = vpop.f32.mrb[58].mxu0  ;;  %v4862_v29 = vadd.f32 %v4861_v1, %v4831_v26  ;;  %v11821_v1 = vld [vmem:[#allocation197_spill] sm:$0xff] }
 0x35c   :  { %v3479_v43 = vadd.f32 %v11809_v42, %v3130_v13  ;;  %v4123_v30 = vadd.f32 %v11810_v61, %v3790_v15  ;;  %v6212_v60 = vadd.f32 %v2744_v23, %v11811_v17  ;;  %v2746_v33 = vpop.f32.mrb[59].mxu0  ;;  %v4703_v19 = vadd.f32 %v4702_v56, %v4430_v40  ;;  %v11824_v23 = vld [vmem:[#allocation7_spill] sm:$0xff]  ;;  %v11825_v42 = vld [vmem:[#allocation64_spill] sm:$0xff] }
 0x35d   :  { %v4767_v15 = vadd.s32 240, %v9871_v6 }
 0x35e   :  { %v4436_v24 = vadd.f32 %v9857_v28, %v4123_v30  ;;  %v3140_v62 = vadd.f32 %v6212_v60, %v11812_v57  ;;  %v3797_v49 = vadd.f32 %v11813_v55, %v3479_v43  ;;  %v4832_v50 = vsel %vm4800_vm10, %v4703_v19, 0.0  ;;  %v4876_v28 = vld [vmem:[%s10155_s3] sm:$0xff] }
 0x35f   :  { %v2751_v0 = vpop.f32.mrb[60].mxu0  ;;  %v4863_v46 = vadd.f32 %v4862_v29, %v4832_v50  ;;  %v4882_v51 = vmul.f32 %v4880_v58, %v4876_v28  ;;  %v4768_v60 = vadd.s32 248, %v9871_v6  ;;  %vm4804_vm14 = vcmp.eq.s32.totalorder %v4767_v15, %v9893_v59 }
 0x360   :  { %v4709_v32 = vadd.f32 %v5664_v27, %v4436_v24  ;;  %v3485_v36 = vadd.f32 %v11814_v44, %v3140_v62  ;;  %v6213_v20 = vadd.f32 %v2751_v0, %v11815_v31  ;;  %v2753_v3 = vpop.f32.mrb[61].mxu0  ;;  %v4131_v21 = vadd.f32 %v11816_v8, %v3797_v49  ;;  %v11828_v24 = vld [vmem:[#allocation31_spill] sm:$0xff] }
 0x361   :  { %v4766_v27 = vadd.s32 232, %v9871_v6  ;;  %v4883_v11 = vmax.f32 %v4882_v51, 0.0  ;;  %vm4805_vm15 = vcmp.eq.s32.totalorder %v4768_v60, %v9893_v59 }
 0x362   :  { %v4833_v56 = vsel %vm4801_vm11, %v4709_v32, 0.0  ;;  %v3150_v45 = vadd.f32 %v6213_v20, %v11817_v63  ;;  %v3804_v4 = vadd.f32 %v11818_v2, %v3485_v36  ;;  %v4442_v39 = vadd.f32 %v9875_v10, %v4131_v21  ;;  %v4895_v63 = vld [vmem:[%s10155_s3 + $0x5] sm:$0x1] }
 0x363   :  { %v2758_v7 = vpop.f32.mrb[62].mxu0  ;;  %v4864_v9 = vadd.f32 %v4863_v46, %v4833_v56  ;;  %vm4803_vm13 = vcmp.eq.s32.totalorder %v4766_v27, %v9893_v59  ;;  %v4884_v33 = vrot.slane %v4883_v11, 4  ;;  %v4890_v59 = vld [vmem:[%s10155_s3 + $0x3] sm:$0x1] }
 0x364   :  { %v3491_v35 = vadd.f32 %v11819_v16, %v3150_v45  ;;  %v4139_v18 = vadd.f32 %v11820_v52, %v3804_v4  ;;  %v6214_v41 = vadd.f32 %v2758_v7, %v11821_v1  ;;  %v2760_v25 = vpop.f32.mrb[63].mxu0  ;;  %v4715_v22 = vadd.f32 %v4714_v34, %v4442_v39  ;;  %v11826_v34 = vld [vmem:[#allocation15_spill] sm:$0xff] }
 0x365   :  { %v4885_v50 = vadd.f32 %v4884_v33, %v4883_v11 }
 0x366   :  { %v4448_v14 = vadd.f32 %v9869_v53, %v4139_v18  ;;  %v3160_v26 = vadd.f32 %v6214_v41, %v11822_v12  ;;  %v3811_v13 = vadd.f32 %v11823_v38, %v3491_v35  ;;  %v4834_v10 = vsel %vm4802_vm12, %v4715_v22, 0.0  ;;  %v11827_v53 = vld [vmem:[#allocation180_spill] sm:$0xff] }
 0x367   :  { %v4865_v29 = vadd.f32 %v4864_v9, %v4834_v10  ;;  %v4886_v44 = vrot.slane %v4885_v50, 2 }
 0x368   :  { %v4721_v37 = vadd.f32 %v5667_v47, %v4448_v14  ;;  %v3497_v40 = vadd.f32 %v11824_v23, %v3160_v26  ;;  %v4147_v43 = vadd.f32 %v11825_v42, %v3811_v13  ;;  %v11829_v47 = vld [vmem:[#allocation179_spill] sm:$0xff] }
 0x369   :  { %v4887_v46 = vadd.f32 %v4886_v44, %v4885_v50 }
 0x36a   :  { %v4835_v61 = vsel %vm4803_vm13, %v4721_v37, 0.0  ;;  %v3818_v30 = vadd.f32 %v11826_v34, %v3497_v40  ;;  %v4454_v17 = vadd.f32 %v11827_v53, %v4147_v43 }
 0x36b   :  { %v4866_v19 = vadd.f32 %v4865_v29, %v4835_v61  ;;  %v4888_v3 = vrot.slane %v4887_v46, 1 }
 0x36c   :  { %v4155_v57 = vadd.f32 %v11828_v24, %v3818_v30  ;;  %v4727_v62 = vadd.f32 %v4726_v48, %v4454_v17 }
 0x36d   :  { %v4889_v48 = vadd.f32 %v4888_v3, %v4887_v46 }
 0x36e   :  { %v4460_v55 = vadd.f32 %v11829_v47, %v4155_v57  ;;  %v4836_v49 = vsel %vm4804_vm14, %v4727_v62, 0.0 }
 0x36f   :  { %v4867_v0 = vadd.f32 %v4866_v19, %v4836_v49 }
 0x370   :  { %v4733_v5 = vadd.f32 %v10099_v54, %v4460_v55  ;;  %v4893_v54 = vld [vmem:[%s10155_s3 + $0x4] sm:$0x1] }
 0x372   :  { %v4837_v32 = vsel %vm4805_vm15, %v4733_v5, 0.0 }
 0x373   :  { %v4868_v36 = vadd.f32 %v4867_v0, %v4837_v32 }
 0x375   :  { %v4869_v6 = vrot.slane %v4868_v36, 4 }
 0x377   :  { %v4870_v31 = vadd.f32 %v4869_v6, %v4868_v36 }
 0x379   :  { %v4871_v20 = vrot.slane %v4870_v31, 2 }
 0x37b   :  { %v4872_v58 = vadd.f32 %v4871_v20, %v4870_v31 }
 0x37d   :  { %v4873_v28 = vrot.slane %v4872_v58, 1 }
 0x37f   :  { %v4874_v8 = vadd.f32 %v4873_v28, %v4872_v58 }
 0x381   :  { %v4891_v21 = vadd.f32 %v4889_v48, %v4874_v8 }
 0x383   :  { %v4892_v56 = vmul.f32 %v4891_v21, %v4890_v59 }
 0x385   :  { %v4894_v45 = vmul.f32 %v4893_v54, %v4892_v56 }
 0x387   :  { %v4896_v2 = vmul.f32 %v4895_v63, %v4894_v45 }
 0x389   :  { %4897 = vst [vmem:[%s10156_s5] sm:$0x1] %v4896_v2 }

</bundles_post_ra>
